<compile_context>
chip_gen: v7x
topology: tpu7x:2x2x1
jax: 0.10.0
libtpu: 0.0.40
codegen_flags: <defaults>
</compile_context>

<pallas_src>
import functools

import jax
import jax.numpy as jnp
from jax.experimental import pallas as pl
from jax.experimental.pallas import tpu as pltpu


# ----------------------------- Pallas kernels ------------------------------ #
def _branches_kernel(pw0, pw1, ph0, ph1, qw0, qw1, qh0, qh1,
                     ww, wh, ww2, wh2, sc1, bi1, sc2, bi2,
                     y1_ref, y2_ref):
    """Both pinwheel branches for one row tile.

    Each branch = four Conv->BN->SiLU sub-convs whose kernel taps are folded
    into the MXU contraction dim (im2col patches).  Sub-convs sharing a weight
    reuse the same resident weight ref; the four (tm, cq) results are lane-
    concatenated and stored as one (tm, c2) slab (== torch.cat channel order).
    """
    def branch(p_refs, w_a_ref, w_b_ref, sc_ref, bi_ref, o_ref):
        wa = w_a_ref[...]
        wb = w_b_ref[...]
        pieces = [
            jnp.dot(p_refs[0][...], wa, preferred_element_type=jnp.float32),
            jnp.dot(p_refs[1][...], wa, preferred_element_type=jnp.float32),
            jnp.dot(p_refs[2][...], wb, preferred_element_type=jnp.float32),
            jnp.dot(p_refs[3][...], wb, preferred_element_type=jnp.float32),
        ]
        y = jnp.concatenate(pieces, axis=-1) * sc_ref[...] + bi_ref[...]
        o_ref[...] = (y * jax.nn.sigmoid(y)).astype(o_ref.dtype)     # SiLU

    branch((pw0, pw1, ph0, ph1), ww, wh, sc1, bi1, y1_ref)
    branch((qw0, qw1, qh0, qh1), ww2, wh2, sc2, bi2, y2_ref)


def _cat_add_kernel(a0, a1, a2, a3, b0, b1, b2, b3,
                    w_ref, sc_ref, bi_ref, o_ref):
    """Both 2x2 'cat' convs (shared weights) + the final residual add.

    out = silu(bn(cat2x2(y1))) + silu(bn(cat2x2(y2))), with the four 2x2 taps
    supplied as shifted row views and accumulated in f32 (no im2col slab)."""
    def cat(p_refs):
        acc = jnp.dot(p_refs[0][...], w_ref[0],
                      preferred_element_type=jnp.float32)
        for t in range(1, 4):
            acc = acc + jnp.dot(p_refs[t][...], w_ref[t],
                                preferred_element_type=jnp.float32)
        return acc * sc_ref[...] + bi_ref[...]

    y1 = cat((a0, a1, a2, a3))
    y2 = cat((b0, b1, b2, b3))
    o_ref[...] = (y1 * jax.nn.sigmoid(y1)
                  + y2 * jax.nn.sigmoid(y2)).astype(o_ref.dtype)


# ------------------------------ launch helpers ----------------------------- #
def _round_up(a, b):
    return (a + b - 1) // b * b


def _vmem_limit_bytes():
    """Generation-aware scoped-VMEM limit (v5e/v6e: 128 MiB, v7x: 64 MiB)."""
    cap = 64 * 1024 * 1024                       # conservative floor (v7x)
    try:
        info = pltpu.get_tpu_info()
        cap = int(getattr(info, "vmem_capacity_bytes", cap) or cap)
    except Exception:
        pass
    return int(min(cap * 7 // 10, 80 * 1024 * 1024))


def _pick_row_tile(n_rows, stream_bytes_per_row, resident_bytes, vmem_limit,
                   min_steps=4):
    """Largest row tile (multiple of 16 for bf16 sublane packing) such that
    (a) double-buffered streaming tiles + resident weights stay well inside
    the scoped-VMEM limit, and (b) the 'parallel' row grid keeps >= min_steps
    steps so v7x's two TensorCores both get work and the HBM stream pipelines.
    """
    budget = max(1 << 20, vmem_limit // 2 - resident_bytes)
    cap = budget // max(1, 2 * stream_bytes_per_row)        # 2x: double buffer
    cap = max(16, min(1024, (cap // 16) * 16))
    depth_cap = max(16, _round_up(pl.cdiv(n_rows, min_steps), 16))
    return min(cap, depth_cap, _round_up(n_rows, 16))


def _launch_branches(pA, pB, wA, wB, sc1, bi1, sc2, bi2, R, c2, vmem_limit):
    D1 = pA[0].shape[1]
    D2 = pB[0].shape[1]
    cq = c2 // 4

    stream = 2 * 4 * (D1 + D2) + 2 * 2 * c2              # bf16 ins + 2 bf16 outs
    resident = 2 * 2 * (D1 + D2) * cq + 4 * c2 * 4       # bf16 weights + f32 bn
    tm = _pick_row_tile(R, stream, resident, vmem_limit)

    row_spec = lambda d: pl.BlockSpec((tm, d), lambda i: (i, 0))
    const = lambda shape: pl.BlockSpec(shape, lambda i: (0,) * len(shape))

    y1, y2 = pl.pallas_call(
        _branches_kernel,
        out_shape=(jax.ShapeDtypeStruct((R, c2), jnp.bfloat16),
                   jax.ShapeDtypeStruct((R, c2), jnp.bfloat16)),
        grid_spec=pltpu.PrefetchScalarGridSpec(
            num_scalar_prefetch=0,
            grid=(pl.cdiv(R, tm),),
            in_specs=[row_spec(D1)] * 4 + [row_spec(D2)] * 4 + [
                const((D1, cq)), const((D1, cq)),          # w_w, w_h (resident)
                const((D2, cq)), const((D2, cq)),          # w_w2, w_h2
                const((1, c2)), const((1, c2)),            # BN scale/bias br.1
                const((1, c2)), const((1, c2)),            # BN scale/bias br.2
            ],
            out_specs=(pl.BlockSpec((tm, c2), lambda i: (i, 0)),
                       pl.BlockSpec((tm, c2), lambda i: (i, 0))),
        ),
        compiler_params=pltpu.CompilerParams(
            dimension_semantics=("parallel",),
            vmem_limit_bytes=vmem_limit),
    )(*pA, *pB, *wA, *wB, sc1, bi1, sc2, bi2)
    return y1, y2


def _launch_cat(p1_views, p2_views, w_cat, scale, bias, Rc, c2, vmem_limit):
    stream = 8 * c2 * 2 + c2 * 4                 # 8 bf16 tap views + f32 output
    resident = 4 * c2 * c2 * 2 + 2 * c2 * 4
    tm = _pick_row_tile(Rc, stream, resident, vmem_limit)

    row_spec = pl.BlockSpec((tm, c2), lambda i: (i, 0))
    out = pl.pallas_call(
        _cat_add_kernel,
        out_shape=jax.ShapeDtypeStruct((Rc, c2), jnp.float32),
        grid_spec=pltpu.PrefetchScalarGridSpec(
            num_scalar_prefetch=0,
            grid=(pl.cdiv(Rc, tm),),
            in_specs=[row_spec] * 8 + [
                pl.BlockSpec((4, c2, c2), lambda i: (0, 0, 0)),   # cat weight
                pl.BlockSpec((1, c2), lambda i: (0, 0)),          # BN scale
                pl.BlockSpec((1, c2), lambda i: (0, 0)),          # BN bias
            ],
            out_specs=pl.BlockSpec((tm, c2), lambda i: (i, 0)),
        ),
        compiler_params=pltpu.CompilerParams(
            dimension_semantics=("parallel",),
            vmem_limit_bytes=vmem_limit),
    )(*p1_views, *p2_views, w_cat, scale, bias)
    return out


# --------------------------- wrapper-side im2col --------------------------- #
def _zpad(t, left, right, top, bottom):          # torch.nn.ZeroPad2d ordering
    return jnp.pad(t, ((0, 0), (top, bottom), (left, right), (0, 0)))


def _im2col(xp, kh, kw, s, compute_dtype=jnp.bfloat16):
    """Padded NHWC input -> (N*Ho*Wo, kh*kw*Cin) patch matrix, taps folded into
    the contraction dim (row-major (kh, kw, ci) ordering == HWIO reshape)."""
    N, Hp, Wp, Cin = xp.shape
    Ho = (Hp - kh) // s + 1
    Wo = (Wp - kw) // s + 1
    cols = []
    for ih in range(kh):
        for iw in range(kw):
            v = xp[:, ih: ih + (Ho - 1) * s + 1: s,
                      iw: iw + (Wo - 1) * s + 1: s, :]
            cols.append(v.reshape(N * Ho * Wo, Cin))
    return jnp.concatenate(cols, axis=-1).astype(compute_dtype), (N, Ho, Wo)


def _branch_patches(x, K, s):
    """Four asymmetric-pad sub-conv patch matrices (NOT concatenated)."""
    p0, dims = _im2col(_zpad(x, K, 0, 1, 0), 1, K, s)
    p1, _ = _im2col(_zpad(x, 0, K, 0, 1), 1, K, s)
    p2, _ = _im2col(_zpad(x, 0, 1, K, 0), K, 1, s)
    p3, _ = _im2col(_zpad(x, 1, 0, 0, K), K, 1, s)
    return [p0, p1, p2, p3], dims


def _cat_tap_views(y, Hc, Wc):
    """Four shifted (N*Hc*Wc, C) views of the 2x2 window over y (N,Ho,Wo,C)."""
    c = y.shape[-1]
    views = []
    for dh in range(2):
        for dw in range(2):
            views.append(
                y[:, dh:dh + Hc, dw:dw + Wc, :].reshape(-1, c)
                .astype(jnp.bfloat16))
    return views


# ------------------------------- PPConv forward ----------------------------- #
def ppconv_forward(x_nchw, params, k, s):
    # NCHW -> NHWC; matmul operands in bf16, epilogues stay f32 in-kernel.
    x = jnp.transpose(x_nchw, (0, 2, 3, 1)).astype(jnp.bfloat16)
    N, H, W, Cin = x.shape
    vmem_limit = _vmem_limit_bytes()

    w_w, sc_w, bi_w = params["cw"]                 # (1, k, Cin, cq)
    w_h, sc_h, bi_h = params["ch"]                 # (k, 1, Cin, cq)
    w_w2, sc_w2, bi_w2 = params["cw2"]             # (1, k+2, Cin, cq)
    w_h2, sc_h2, bi_h2 = params["ch2"]             # (k+2, 1, Cin, cq)
    cq = w_w.shape[-1]
    c2 = 4 * cq

    # --- stage 1: both pinwheel branches, one pallas_call ---
    pA, (_, Ho, Wo) = _branch_patches(x, k, s)
    pB, _ = _branch_patches(x, k + 2, s)
    R = N * Ho * Wo
    D1 = k * Cin
    D2 = (k + 2) * Cin

    wA = [w_w.reshape(D1, cq).astype(jnp.bfloat16),
          w_h.reshape(D1, cq).astype(jnp.bfloat16)]
    wB = [w_w2.reshape(D2, cq).astype(jnp.bfloat16),
          w_h2.reshape(D2, cq).astype(jnp.bfloat16)]
    sc1 = jnp.concatenate([sc_w, sc_w, sc_h, sc_h]).reshape(1, c2).astype(jnp.float32)
    bi1 = jnp.concatenate([bi_w, bi_w, bi_h, bi_h]).reshape(1, c2).astype(jnp.float32)
    sc2 = jnp.concatenate([sc_w2, sc_w2, sc_h2, sc_h2]).reshape(1, c2).astype(jnp.float32)
    bi2 = jnp.concatenate([bi_w2, bi_w2, bi_h2, bi_h2]).reshape(1, c2).astype(jnp.float32)

    y1, y2 = _launch_branches(pA, pB, wA, wB, sc1, bi1, sc2, bi2,
                              R, c2, vmem_limit)
    y1 = y1.reshape(N, Ho, Wo, c2)
    y2 = y2.reshape(N, Ho, Wo, c2)

    # --- stage 2: both 2x2 'cat' convs + residual add, one pallas_call ---
    w_c, sc_c, bi_c = params["cat"]                # (2, 2, c2, c2)
    Hc, Wc = Ho - 1, Wo - 1
    p1v = _cat_tap_views(y1, Hc, Wc)
    p2v = _cat_tap_views(y2, Hc, Wc)
    out = _launch_cat(
        p1v, p2v,
        w_c.reshape(4, c2, c2).astype(jnp.bfloat16),
        sc_c.reshape(1, c2).astype(jnp.float32),
        bi_c.reshape(1, c2).astype(jnp.float32),
        N * Hc * Wc, c2, vmem_limit)
    out = out.reshape(N, Hc, Wc, c2)
    return jnp.transpose(out, (0, 3, 1, 2))        # -> NCHW


# ----------------------- parameter initialization -------------------------- #
def _init_conv_block(key, kh, kw, cin, cout, eps=1e-5):
    """Deterministic Conv2d weight (HWIO) + folded inference-mode BatchNorm."""
    kw_, kg, kb, km, kv = jax.random.split(key, 5)
    w = jax.random.normal(kw_, (kh, kw, cin, cout), jnp.float32) * 0.1
    gamma = jax.random.uniform(kg, (cout,), jnp.float32, 0.5, 1.5)
    beta = jax.random.normal(kb, (cout,), jnp.float32) * 0.1
    mean = jax.random.normal(km, (cout,), jnp.float32) * 0.1
    var = jax.random.uniform(kv, (cout,), jnp.float32, 0.5, 1.5)
    scale = gamma / jnp.sqrt(var + eps)
    bias = beta - mean * scale
    return (w, scale, bias)


def init_ppconv_params(key, c1, c2, k):
    assert c2 % 4 == 0
    k_cw, k_ch, k_cw2, k_ch2, k_cat = jax.random.split(key, 5)
    return {
        "cw":  _init_conv_block(k_cw,  1, k,     c1, c2 // 4),
        "ch":  _init_conv_block(k_ch,  k, 1,     c1, c2 // 4),
        "cw2": _init_conv_block(k_cw2, 1, k + 2, c1, c2 // 4),
        "ch2": _init_conv_block(k_ch2, k + 2, 1, c1, c2 // 4),
        "cat": _init_conv_block(k_cat, 2, 2,     c2, c2),
    }


# ------------------------ pure-JAX (XLA) reference -------------------------- #
def _ref_conv_block(xp, params, s):
    w, scale, bias = params
    y = jax.lax.conv_general_dilated(
        xp, w, window_strides=(s, s), padding="VALID",
        dimension_numbers=("NHWC", "HWIO", "NHWC"))
    y = y * scale + bias
    return y * jax.nn.sigmoid(y)


def ppconv_reference(x_nchw, params, k, s):
    x = jnp.transpose(x_nchw, (0, 2, 3, 1))
    p1 = [(k, 0, 1, 0), (0, k, 0, 1), (0, 1, k, 0), (1, 0, 0, k)]
    p2 = [(k + 2, 0, 1, 0), (0, k + 2, 0, 1), (0, 1, k + 2, 0), (1, 0, 0, k + 2)]
    yw0 = _ref_conv_block(_zpad(x, *p1[0]), params["cw"], s)
    yw1 = _ref_conv_block(_zpad(x, *p1[1]), params["cw"], s)
    yh0 = _ref_conv_block(_zpad(x, *p1[2]), params["ch"], s)
    yh1 = _ref_conv_block(_zpad(x, *p1[3]), params["ch"], s)
    o1 = _ref_conv_block(jnp.concatenate([yw0, yw1, yh0, yh1], -1),
                         params["cat"], 1)
    yw2 = _ref_conv_block(_zpad(x, *p2[0]), params["cw2"], s)
    yw3 = _ref_conv_block(_zpad(x, *p2[1]), params["cw2"], s)
    yh2 = _ref_conv_block(_zpad(x, *p2[2]), params["ch2"], s)
    yh3 = _ref_conv_block(_zpad(x, *p2[3]), params["ch2"], s)
    o2 = _ref_conv_block(jnp.concatenate([yw2, yw3, yh2, yh3], -1),
                         params["cat"], 1)
    return jnp.transpose(o1 + o2, (0, 3, 1, 2))


# ---------------------------------- main ------------------------------------ #
if __name__ == "__main__":
    key = jax.random.PRNGKey(0)
    k_x, k_p = jax.random.split(key)

    N, C1, C2, H, W, K = 2, 4, 8, 16, 16, 3
    x = jax.random.normal(k_x, (N, C1, H, W), jnp.float32)
    params = init_ppconv_params(k_p, C1, C2, K)

    # Validate both stride 1 and stride 2 (the four asymmetric-pad sub-convs
    # must produce identical output extents in both cases).
    for S in (1, 2):
        fwd = jax.jit(functools.partial(ppconv_forward, k=K, s=S))
        out = jax.block_until_ready(fwd(x, params))

        expected_shape = (N, C2, H // S, W // S)
        assert out.shape == expected_shape, (out.shape, expected_shape)
        assert bool(jnp.all(jnp.isfinite(out)))

        # Numerical check against a pure-JAX f32 reference.  The kernel uses
        # bf16 matmul operands across two GEMM stages, so the tolerance is
        # loose but far below any structural bug.
        ref = jax.block_until_ready(ppconv_reference(x, params, K, S))
        err = float(jnp.max(jnp.abs(out - ref)))
        assert err < 0.2, f"s={S}: max abs err vs reference: {err}"

    print("KERNEL_OK")
</pallas_src>

<mosaic_0001>
module attributes {stable_mosaic.version = 11 : i64} {
  func.func @_branches_kernel(%arg0: i32, %arg1: memref<160x12xbf16, #tpu.memory_space<vmem>>, %arg2: memref<160x12xbf16, #tpu.memory_space<vmem>>, %arg3: memref<160x12xbf16, #tpu.memory_space<vmem>>, %arg4: memref<160x12xbf16, #tpu.memory_space<vmem>>, %arg5: memref<160x20xbf16, #tpu.memory_space<vmem>>, %arg6: memref<160x20xbf16, #tpu.memory_space<vmem>>, %arg7: memref<160x20xbf16, #tpu.memory_space<vmem>>, %arg8: memref<160x20xbf16, #tpu.memory_space<vmem>>, %arg9: memref<12x2xbf16, #tpu.memory_space<vmem>>, %arg10: memref<12x2xbf16, #tpu.memory_space<vmem>>, %arg11: memref<20x2xbf16, #tpu.memory_space<vmem>>, %arg12: memref<20x2xbf16, #tpu.memory_space<vmem>>, %arg13: memref<1x8xf32, #tpu.memory_space<vmem>>, %arg14: memref<1x8xf32, #tpu.memory_space<vmem>>, %arg15: memref<1x8xf32, #tpu.memory_space<vmem>>, %arg16: memref<1x8xf32, #tpu.memory_space<vmem>>, %arg17: memref<160x8xbf16, #tpu.memory_space<vmem>>, %arg18: memref<160x8xbf16, #tpu.memory_space<vmem>>) attributes {dimension_semantics = [#tpu.dimension_semantics<parallel>], iteration_bounds = array<i64: 4>, scalar_prefetch = 0 : i64, scratch_operands = 0 : i64, tpu.core_type = #tpu.core_type<tc>, window_params = [{transform_indices = @transform_0, window_bounds = array<i64: 160, 12>}, {transform_indices = @transform_1, window_bounds = array<i64: 160, 12>}, {transform_indices = @transform_2, window_bounds = array<i64: 160, 12>}, {transform_indices = @transform_3, window_bounds = array<i64: 160, 12>}, {transform_indices = @transform_4, window_bounds = array<i64: 160, 20>}, {transform_indices = @transform_5, window_bounds = array<i64: 160, 20>}, {transform_indices = @transform_6, window_bounds = array<i64: 160, 20>}, {transform_indices = @transform_7, window_bounds = array<i64: 160, 20>}, {pipeline_mode = #tpu.pipeline_mode<synchronous>, transform_indices = @transform_8, window_bounds = array<i64: 12, 2>}, {pipeline_mode = #tpu.pipeline_mode<synchronous>, transform_indices = @transform_9, window_bounds = array<i64: 12, 2>}, {pipeline_mode = #tpu.pipeline_mode<synchronous>, transform_indices = @transform_10, window_bounds = array<i64: 20, 2>}, {pipeline_mode = #tpu.pipeline_mode<synchronous>, transform_indices = @transform_11, window_bounds = array<i64: 20, 2>}, {pipeline_mode = #tpu.pipeline_mode<synchronous>, transform_indices = @transform_12, window_bounds = array<i64: 1, 8>}, {pipeline_mode = #tpu.pipeline_mode<synchronous>, transform_indices = @transform_13, window_bounds = array<i64: 1, 8>}, {pipeline_mode = #tpu.pipeline_mode<synchronous>, transform_indices = @transform_14, window_bounds = array<i64: 1, 8>}, {pipeline_mode = #tpu.pipeline_mode<synchronous>, transform_indices = @transform_15, window_bounds = array<i64: 1, 8>}, {transform_indices = @transform_16, window_bounds = array<i64: 160, 8>}, {transform_indices = @transform_17, window_bounds = array<i64: 160, 8>}]} {
    %c0 = arith.constant 0 : index
    %c0_0 = arith.constant 0 : index
    %0 = vector.load %arg9[%c0, %c0_0] : memref<12x2xbf16, #tpu.memory_space<vmem>>, vector<12x2xbf16>
    %c0_1 = arith.constant 0 : index
    %c0_2 = arith.constant 0 : index
    %1 = vector.load %arg10[%c0_1, %c0_2] : memref<12x2xbf16, #tpu.memory_space<vmem>>, vector<12x2xbf16>
    %c0_3 = arith.constant 0 : index
    %c0_4 = arith.constant 0 : index
    %2 = vector.load %arg1[%c0_3, %c0_4] : memref<160x12xbf16, #tpu.memory_space<vmem>>, vector<160x12xbf16>
    %cst = arith.constant dense<0.000000e+00> : vector<160x2xf32>
    %3 = tpu.matmul %2, %0, %cst {dimension_numbers = #tpu.dot_dimension_numbers<[1], [0], [0], [1], [0, 0, 1, 1], [], []>} : vector<160x12xbf16>, vector<12x2xbf16>, vector<160x2xf32> -> vector<160x2xf32>
    %c0_5 = arith.constant 0 : index
    %c0_6 = arith.constant 0 : index
    %4 = vector.load %arg2[%c0_5, %c0_6] : memref<160x12xbf16, #tpu.memory_space<vmem>>, vector<160x12xbf16>
    %cst_7 = arith.constant dense<0.000000e+00> : vector<160x2xf32>
    %5 = tpu.matmul %4, %0, %cst_7 {dimension_numbers = #tpu.dot_dimension_numbers<[1], [0], [0], [1], [0, 0, 1, 1], [], []>} : vector<160x12xbf16>, vector<12x2xbf16>, vector<160x2xf32> -> vector<160x2xf32>
    %c0_8 = arith.constant 0 : index
    %c0_9 = arith.constant 0 : index
    %6 = vector.load %arg3[%c0_8, %c0_9] : memref<160x12xbf16, #tpu.memory_space<vmem>>, vector<160x12xbf16>
    %cst_10 = arith.constant dense<0.000000e+00> : vector<160x2xf32>
    %7 = tpu.matmul %6, %1, %cst_10 {dimension_numbers = #tpu.dot_dimension_numbers<[1], [0], [0], [1], [0, 0, 1, 1], [], []>} : vector<160x12xbf16>, vector<12x2xbf16>, vector<160x2xf32> -> vector<160x2xf32>
    %c0_11 = arith.constant 0 : index
    %c0_12 = arith.constant 0 : index
    %8 = vector.load %arg4[%c0_11, %c0_12] : memref<160x12xbf16, #tpu.memory_space<vmem>>, vector<160x12xbf16>
    %cst_13 = arith.constant dense<0.000000e+00> : vector<160x2xf32>
    %9 = tpu.matmul %8, %1, %cst_13 {dimension_numbers = #tpu.dot_dimension_numbers<[1], [0], [0], [1], [0, 0, 1, 1], [], []>} : vector<160x12xbf16>, vector<12x2xbf16>, vector<160x2xf32> -> vector<160x2xf32>
    %10 = tpu.concatenate %3, %5, %7, %9 in 1 : vector<160x2xf32>, vector<160x2xf32>, vector<160x2xf32>, vector<160x2xf32> -> vector<160x8xf32>
    %c0_14 = arith.constant 0 : index
    %c0_15 = arith.constant 0 : index
    %11 = vector.load %arg13[%c0_14, %c0_15] : memref<1x8xf32, #tpu.memory_space<vmem>>, vector<1x8xf32>
    %12 = vector.broadcast %11 : vector<1x8xf32> to vector<160x8xf32>
    %13 = arith.mulf %10, %12 : vector<160x8xf32>
    %c0_16 = arith.constant 0 : index
    %c0_17 = arith.constant 0 : index
    %14 = vector.load %arg14[%c0_16, %c0_17] : memref<1x8xf32, #tpu.memory_space<vmem>>, vector<1x8xf32>
    %15 = vector.broadcast %14 : vector<1x8xf32> to vector<160x8xf32>
    %16 = arith.addf %13, %15 : vector<160x8xf32>
    %17 = arith.negf %16 : vector<160x8xf32>
    %18 = math.exp %17 : vector<160x8xf32>
    %cst_18 = arith.constant 1.000000e+00 : f32
    %19 = vector.broadcast %cst_18 : f32 to vector<160x8xf32>
    %20 = arith.addf %19, %18 : vector<160x8xf32>
    %21 = arith.divf %19, %20 : vector<160x8xf32>
    %22 = arith.mulf %16, %21 : vector<160x8xf32>
    %23 = arith.truncf %22 : vector<160x8xf32> to vector<160x8xbf16>
    %c0_19 = arith.constant 0 : index
    %c0_20 = arith.constant 0 : index
    %24 = vector.load %arg17[%c0_19, %c0_20] : memref<160x8xbf16, #tpu.memory_space<vmem>>, vector<160x8xbf16>
    tpu.vector_store %arg17[%c0_19, %c0_20], %23 {strides = array<i32>} : memref<160x8xbf16, #tpu.memory_space<vmem>>, vector<160x8xbf16>,
    %c0_21 = arith.constant 0 : index
    %c0_22 = arith.constant 0 : index
    %25 = vector.load %arg11[%c0_21, %c0_22] : memref<20x2xbf16, #tpu.memory_space<vmem>>, vector<20x2xbf16>
    %c0_23 = arith.constant 0 : index
    %c0_24 = arith.constant 0 : index
    %26 = vector.load %arg12[%c0_23, %c0_24] : memref<20x2xbf16, #tpu.memory_space<vmem>>, vector<20x2xbf16>
    %c0_25 = arith.constant 0 : index
    %c0_26 = arith.constant 0 : index
    %27 = vector.load %arg5[%c0_25, %c0_26] : memref<160x20xbf16, #tpu.memory_space<vmem>>, vector<160x20xbf16>
    %cst_27 = arith.constant dense<0.000000e+00> : vector<160x2xf32>
    %28 = tpu.matmul %27, %25, %cst_27 {dimension_numbers = #tpu.dot_dimension_numbers<[1], [0], [0], [1], [0, 0, 1, 1], [], []>} : vector<160x20xbf16>, vector<20x2xbf16>, vector<160x2xf32> -> vector<160x2xf32>
    %c0_28 = arith.constant 0 : index
    %c0_29 = arith.constant 0 : index
    %29 = vector.load %arg6[%c0_28, %c0_29] : memref<160x20xbf16, #tpu.memory_space<vmem>>, vector<160x20xbf16>
    %cst_30 = arith.constant dense<0.000000e+00> : vector<160x2xf32>
    %30 = tpu.matmul %29, %25, %cst_30 {dimension_numbers = #tpu.dot_dimension_numbers<[1], [0], [0], [1], [0, 0, 1, 1], [], []>} : vector<160x20xbf16>, vector<20x2xbf16>, vector<160x2xf32> -> vector<160x2xf32>
    %c0_31 = arith.constant 0 : index
    %c0_32 = arith.constant 0 : index
    %31 = vector.load %arg7[%c0_31, %c0_32] : memref<160x20xbf16, #tpu.memory_space<vmem>>, vector<160x20xbf16>
    %cst_33 = arith.constant dense<0.000000e+00> : vector<160x2xf32>
    %32 = tpu.matmul %31, %26, %cst_33 {dimension_numbers = #tpu.dot_dimension_numbers<[1], [0], [0], [1], [0, 0, 1, 1], [], []>} : vector<160x20xbf16>, vector<20x2xbf16>, vector<160x2xf32> -> vector<160x2xf32>
    %c0_34 = arith.constant 0 : index
    %c0_35 = arith.constant 0 : index
    %33 = vector.load %arg8[%c0_34, %c0_35] : memref<160x20xbf16, #tpu.memory_space<vmem>>, vector<160x20xbf16>
    %cst_36 = arith.constant dense<0.000000e+00> : vector<160x2xf32>
    %34 = tpu.matmul %33, %26, %cst_36 {dimension_numbers = #tpu.dot_dimension_numbers<[1], [0], [0], [1], [0, 0, 1, 1], [], []>} : vector<160x20xbf16>, vector<20x2xbf16>, vector<160x2xf32> -> vector<160x2xf32>
    %35 = tpu.concatenate %28, %30, %32, %34 in 1 : vector<160x2xf32>, vector<160x2xf32>, vector<160x2xf32>, vector<160x2xf32> -> vector<160x8xf32>
    %c0_37 = arith.constant 0 : index
    %c0_38 = arith.constant 0 : index
    %36 = vector.load %arg15[%c0_37, %c0_38] : memref<1x8xf32, #tpu.memory_space<vmem>>, vector<1x8xf32>
    %37 = vector.broadcast %36 : vector<1x8xf32> to vector<160x8xf32>
    %38 = arith.mulf %35, %37 : vector<160x8xf32>
    %c0_39 = arith.constant 0 : index
    %c0_40 = arith.constant 0 : index
    %39 = vector.load %arg16[%c0_39, %c0_40] : memref<1x8xf32, #tpu.memory_space<vmem>>, vector<1x8xf32>
    %40 = vector.broadcast %39 : vector<1x8xf32> to vector<160x8xf32>
    %41 = arith.addf %38, %40 : vector<160x8xf32>
    %42 = arith.negf %41 : vector<160x8xf32>
    %43 = math.exp %42 : vector<160x8xf32>
    %cst_41 = arith.constant 1.000000e+00 : f32
    %44 = vector.broadcast %cst_41 : f32 to vector<160x8xf32>
    %45 = arith.addf %44, %43 : vector<160x8xf32>
    %46 = arith.divf %44, %45 : vector<160x8xf32>
    %47 = arith.mulf %41, %46 : vector<160x8xf32>
    %48 = arith.truncf %47 : vector<160x8xf32> to vector<160x8xbf16>
    %c0_42 = arith.constant 0 : index
    %c0_43 = arith.constant 0 : index
    %49 = vector.load %arg18[%c0_42, %c0_43] : memref<160x8xbf16, #tpu.memory_space<vmem>>, vector<160x8xbf16>
    tpu.vector_store %arg18[%c0_42, %c0_43], %48 {strides = array<i32>} : memref<160x8xbf16, #tpu.memory_space<vmem>>, vector<160x8xbf16>,
    return
  }
  func.func @transform_0(%arg0: i32) -> (i32, i32) {
    %c0_i32 = arith.constant 0 : i32
    %c0_i32_0 = arith.constant 0 : i32
    return %arg0, %c0_i32 : i32, i32
  }
  func.func @transform_1(%arg0: i32) -> (i32, i32) {
    %c0_i32 = arith.constant 0 : i32
    %c0_i32_0 = arith.constant 0 : i32
    return %arg0, %c0_i32 : i32, i32
  }
  func.func @transform_2(%arg0: i32) -> (i32, i32) {
    %c0_i32 = arith.constant 0 : i32
    %c0_i32_0 = arith.constant 0 : i32
    return %arg0, %c0_i32 : i32, i32
  }
  func.func @transform_3(%arg0: i32) -> (i32, i32) {
    %c0_i32 = arith.constant 0 : i32
    %c0_i32_0 = arith.constant 0 : i32
    return %arg0, %c0_i32 : i32, i32
  }
  func.func @transform_4(%arg0: i32) -> (i32, i32) {
    %c0_i32 = arith.constant 0 : i32
    %c0_i32_0 = arith.constant 0 : i32
    return %arg0, %c0_i32 : i32, i32
  }
  func.func @transform_5(%arg0: i32) -> (i32, i32) {
    %c0_i32 = arith.constant 0 : i32
    %c0_i32_0 = arith.constant 0 : i32
    return %arg0, %c0_i32 : i32, i32
  }
  func.func @transform_6(%arg0: i32) -> (i32, i32) {
    %c0_i32 = arith.constant 0 : i32
    %c0_i32_0 = arith.constant 0 : i32
    return %arg0, %c0_i32 : i32, i32
  }
  func.func @transform_7(%arg0: i32) -> (i32, i32) {
    %c0_i32 = arith.constant 0 : i32
    %c0_i32_0 = arith.constant 0 : i32
    return %arg0, %c0_i32 : i32, i32
  }
  func.func @transform_8(%arg0: i32) -> (i32, i32) {
    %c0_i32 = arith.constant 0 : i32
    %c0_i32_0 = arith.constant 0 : i32
    %c0_i32_1 = arith.constant 0 : i32
    return %c0_i32, %c0_i32_0 : i32, i32
  }
  func.func @transform_9(%arg0: i32) -> (i32, i32) {
    %c0_i32 = arith.constant 0 : i32
    %c0_i32_0 = arith.constant 0 : i32
    %c0_i32_1 = arith.constant 0 : i32
    return %c0_i32, %c0_i32_0 : i32, i32
  }
  func.func @transform_10(%arg0: i32) -> (i32, i32) {
    %c0_i32 = arith.constant 0 : i32
    %c0_i32_0 = arith.constant 0 : i32
    %c0_i32_1 = arith.constant 0 : i32
    return %c0_i32, %c0_i32_0 : i32, i32
  }
  func.func @transform_11(%arg0: i32) -> (i32, i32) {
    %c0_i32 = arith.constant 0 : i32
    %c0_i32_0 = arith.constant 0 : i32
    %c0_i32_1 = arith.constant 0 : i32
    return %c0_i32, %c0_i32_0 : i32, i32
  }
  func.func @transform_12(%arg0: i32) -> (i32, i32) {
    %c0_i32 = arith.constant 0 : i32
    %c0_i32_0 = arith.constant 0 : i32
    %c0_i32_1 = arith.constant 0 : i32
    return %c0_i32, %c0_i32_0 : i32, i32
  }
  func.func @transform_13(%arg0: i32) -> (i32, i32) {
    %c0_i32 = arith.constant 0 : i32
    %c0_i32_0 = arith.constant 0 : i32
    %c0_i32_1 = arith.constant 0 : i32
    return %c0_i32, %c0_i32_0 : i32, i32
  }
  func.func @transform_14(%arg0: i32) -> (i32, i32) {
    %c0_i32 = arith.constant 0 : i32
    %c0_i32_0 = arith.constant 0 : i32
    %c0_i32_1 = arith.constant 0 : i32
    return %c0_i32, %c0_i32_0 : i32, i32
  }
  func.func @transform_15(%arg0: i32) -> (i32, i32) {
    %c0_i32 = arith.constant 0 : i32
    %c0_i32_0 = arith.constant 0 : i32
    %c0_i32_1 = arith.constant 0 : i32
    return %c0_i32, %c0_i32_0 : i32, i32
  }
  func.func @transform_16(%arg0: i32) -> (i32, i32) {
    %c0_i32 = arith.constant 0 : i32
    %c0_i32_0 = arith.constant 0 : i32
    return %arg0, %c0_i32 : i32, i32
  }
  func.func @transform_17(%arg0: i32) -> (i32, i32) {
    %c0_i32 = arith.constant 0 : i32
    %c0_i32_0 = arith.constant 0 : i32
    return %arg0, %c0_i32 : i32, i32
  }
}

module attributes {stable_mosaic.version = 11 : i64} {
  func.func @_cat_add_kernel(%arg0: i32, %arg1: memref<128x8xbf16, #tpu.memory_space<vmem>>, %arg2: memref<128x8xbf16, #tpu.memory_space<vmem>>, %arg3: memref<128x8xbf16, #tpu.memory_space<vmem>>, %arg4: memref<128x8xbf16, #tpu.memory_space<vmem>>, %arg5: memref<128x8xbf16, #tpu.memory_space<vmem>>, %arg6: memref<128x8xbf16, #tpu.memory_space<vmem>>, %arg7: memref<128x8xbf16, #tpu.memory_space<vmem>>, %arg8: memref<128x8xbf16, #tpu.memory_space<vmem>>, %arg9: memref<4x8x8xbf16, #tpu.memory_space<vmem>>, %arg10: memref<1x8xf32, #tpu.memory_space<vmem>>, %arg11: memref<1x8xf32, #tpu.memory_space<vmem>>, %arg12: memref<128x8xf32, #tpu.memory_space<vmem>>) attributes {dimension_semantics = [#tpu.dimension_semantics<parallel>], iteration_bounds = array<i64: 4>, scalar_prefetch = 0 : i64, scratch_operands = 0 : i64, tpu.core_type = #tpu.core_type<tc>, window_params = [{transform_indices = @transform_0, window_bounds = array<i64: 128, 8>}, {transform_indices = @transform_1, window_bounds = array<i64: 128, 8>}, {transform_indices = @transform_2, window_bounds = array<i64: 128, 8>}, {transform_indices = @transform_3, window_bounds = array<i64: 128, 8>}, {transform_indices = @transform_4, window_bounds = array<i64: 128, 8>}, {transform_indices = @transform_5, window_bounds = array<i64: 128, 8>}, {transform_indices = @transform_6, window_bounds = array<i64: 128, 8>}, {transform_indices = @transform_7, window_bounds = array<i64: 128, 8>}, {pipeline_mode = #tpu.pipeline_mode<synchronous>, transform_indices = @transform_8, window_bounds = array<i64: 4, 8, 8>}, {pipeline_mode = #tpu.pipeline_mode<synchronous>, transform_indices = @transform_9, window_bounds = array<i64: 1, 8>}, {pipeline_mode = #tpu.pipeline_mode<synchronous>, transform_indices = @transform_10, window_bounds = array<i64: 1, 8>}, {transform_indices = @transform_11, window_bounds = array<i64: 128, 8>}]} {
    %c0 = arith.constant 0 : index
    %c0_0 = arith.constant 0 : index
    %0 = vector.load %arg1[%c0, %c0_0] : memref<128x8xbf16, #tpu.memory_space<vmem>>, vector<128x8xbf16>
    %c0_1 = arith.constant 0 : index
    %c0_2 = arith.constant 0 : index
    %c0_3 = arith.constant 0 : index
    %1 = vector.load %arg9[%c0_1, %c0_2, %c0_3] : memref<4x8x8xbf16, #tpu.memory_space<vmem>>, vector<1x8x8xbf16>
    %2 = vector.shape_cast %1 : vector<1x8x8xbf16> to vector<8x8xbf16>
    %cst = arith.constant dense<0.000000e+00> : vector<128x8xf32>
    %3 = tpu.matmul %0, %2, %cst {dimension_numbers = #tpu.dot_dimension_numbers<[1], [0], [0], [1], [0, 0, 1, 1], [], []>} : vector<128x8xbf16>, vector<8x8xbf16>, vector<128x8xf32> -> vector<128x8xf32>
    %c0_4 = arith.constant 0 : index
    %c0_5 = arith.constant 0 : index
    %4 = vector.load %arg2[%c0_4, %c0_5] : memref<128x8xbf16, #tpu.memory_space<vmem>>, vector<128x8xbf16>
    %c1 = arith.constant 1 : index
    %c0_6 = arith.constant 0 : index
    %c0_7 = arith.constant 0 : index
    %5 = vector.load %arg9[%c1, %c0_6, %c0_7] : memref<4x8x8xbf16, #tpu.memory_space<vmem>>, vector<1x8x8xbf16>
    %6 = vector.shape_cast %5 : vector<1x8x8xbf16> to vector<8x8xbf16>
    %cst_8 = arith.constant dense<0.000000e+00> : vector<128x8xf32>
    %7 = tpu.matmul %4, %6, %cst_8 {dimension_numbers = #tpu.dot_dimension_numbers<[1], [0], [0], [1], [0, 0, 1, 1], [], []>} : vector<128x8xbf16>, vector<8x8xbf16>, vector<128x8xf32> -> vector<128x8xf32>
    %8 = arith.addf %3, %7 : vector<128x8xf32>
    %c0_9 = arith.constant 0 : index
    %c0_10 = arith.constant 0 : index
    %9 = vector.load %arg3[%c0_9, %c0_10] : memref<128x8xbf16, #tpu.memory_space<vmem>>, vector<128x8xbf16>
    %c2 = arith.constant 2 : index
    %c0_11 = arith.constant 0 : index
    %c0_12 = arith.constant 0 : index
    %10 = vector.load %arg9[%c2, %c0_11, %c0_12] : memref<4x8x8xbf16, #tpu.memory_space<vmem>>, vector<1x8x8xbf16>
    %11 = vector.shape_cast %10 : vector<1x8x8xbf16> to vector<8x8xbf16>
    %cst_13 = arith.constant dense<0.000000e+00> : vector<128x8xf32>
    %12 = tpu.matmul %9, %11, %cst_13 {dimension_numbers = #tpu.dot_dimension_numbers<[1], [0], [0], [1], [0, 0, 1, 1], [], []>} : vector<128x8xbf16>, vector<8x8xbf16>, vector<128x8xf32> -> vector<128x8xf32>
    %13 = arith.addf %8, %12 : vector<128x8xf32>
    %c0_14 = arith.constant 0 : index
    %c0_15 = arith.constant 0 : index
    %14 = vector.load %arg4[%c0_14, %c0_15] : memref<128x8xbf16, #tpu.memory_space<vmem>>, vector<128x8xbf16>
    %c3 = arith.constant 3 : index
    %c0_16 = arith.constant 0 : index
    %c0_17 = arith.constant 0 : index
    %15 = vector.load %arg9[%c3, %c0_16, %c0_17] : memref<4x8x8xbf16, #tpu.memory_space<vmem>>, vector<1x8x8xbf16>
    %16 = vector.shape_cast %15 : vector<1x8x8xbf16> to vector<8x8xbf16>
    %cst_18 = arith.constant dense<0.000000e+00> : vector<128x8xf32>
    %17 = tpu.matmul %14, %16, %cst_18 {dimension_numbers = #tpu.dot_dimension_numbers<[1], [0], [0], [1], [0, 0, 1, 1], [], []>} : vector<128x8xbf16>, vector<8x8xbf16>, vector<128x8xf32> -> vector<128x8xf32>
    %18 = arith.addf %13, %17 : vector<128x8xf32>
    %c0_19 = arith.constant 0 : index
    %c0_20 = arith.constant 0 : index
    %19 = vector.load %arg10[%c0_19, %c0_20] : memref<1x8xf32, #tpu.memory_space<vmem>>, vector<1x8xf32>
    %20 = vector.broadcast %19 : vector<1x8xf32> to vector<128x8xf32>
    %21 = arith.mulf %18, %20 : vector<128x8xf32>
    %c0_21 = arith.constant 0 : index
    %c0_22 = arith.constant 0 : index
    %22 = vector.load %arg11[%c0_21, %c0_22] : memref<1x8xf32, #tpu.memory_space<vmem>>, vector<1x8xf32>
    %23 = vector.broadcast %22 : vector<1x8xf32> to vector<128x8xf32>
    %24 = arith.addf %21, %23 : vector<128x8xf32>
    %c0_23 = arith.constant 0 : index
    %c0_24 = arith.constant 0 : index
    %25 = vector.load %arg5[%c0_23, %c0_24] : memref<128x8xbf16, #tpu.memory_space<vmem>>, vector<128x8xbf16>
    %c0_25 = arith.constant 0 : index
    %c0_26 = arith.constant 0 : index
    %c0_27 = arith.constant 0 : index
    %26 = vector.load %arg9[%c0_25, %c0_26, %c0_27] : memref<4x8x8xbf16, #tpu.memory_space<vmem>>, vector<1x8x8xbf16>
    %27 = vector.shape_cast %26 : vector<1x8x8xbf16> to vector<8x8xbf16>
    %cst_28 = arith.constant dense<0.000000e+00> : vector<128x8xf32>
    %28 = tpu.matmul %25, %27, %cst_28 {dimension_numbers = #tpu.dot_dimension_numbers<[1], [0], [0], [1], [0, 0, 1, 1], [], []>} : vector<128x8xbf16>, vector<8x8xbf16>, vector<128x8xf32> -> vector<128x8xf32>
    %c0_29 = arith.constant 0 : index
    %c0_30 = arith.constant 0 : index
    %29 = vector.load %arg6[%c0_29, %c0_30] : memref<128x8xbf16, #tpu.memory_space<vmem>>, vector<128x8xbf16>
    %c1_31 = arith.constant 1 : index
    %c0_32 = arith.constant 0 : index
    %c0_33 = arith.constant 0 : index
    %30 = vector.load %arg9[%c1_31, %c0_32, %c0_33] : memref<4x8x8xbf16, #tpu.memory_space<vmem>>, vector<1x8x8xbf16>
    %31 = vector.shape_cast %30 : vector<1x8x8xbf16> to vector<8x8xbf16>
    %cst_34 = arith.constant dense<0.000000e+00> : vector<128x8xf32>
    %32 = tpu.matmul %29, %31, %cst_34 {dimension_numbers = #tpu.dot_dimension_numbers<[1], [0], [0], [1], [0, 0, 1, 1], [], []>} : vector<128x8xbf16>, vector<8x8xbf16>, vector<128x8xf32> -> vector<128x8xf32>
    %33 = arith.addf %28, %32 : vector<128x8xf32>
    %c0_35 = arith.constant 0 : index
    %c0_36 = arith.constant 0 : index
    %34 = vector.load %arg7[%c0_35, %c0_36] : memref<128x8xbf16, #tpu.memory_space<vmem>>, vector<128x8xbf16>
    %c2_37 = arith.constant 2 : index
    %c0_38 = arith.constant 0 : index
    %c0_39 = arith.constant 0 : index
    %35 = vector.load %arg9[%c2_37, %c0_38, %c0_39] : memref<4x8x8xbf16, #tpu.memory_space<vmem>>, vector<1x8x8xbf16>
    %36 = vector.shape_cast %35 : vector<1x8x8xbf16> to vector<8x8xbf16>
    %cst_40 = arith.constant dense<0.000000e+00> : vector<128x8xf32>
    %37 = tpu.matmul %34, %36, %cst_40 {dimension_numbers = #tpu.dot_dimension_numbers<[1], [0], [0], [1], [0, 0, 1, 1], [], []>} : vector<128x8xbf16>, vector<8x8xbf16>, vector<128x8xf32> -> vector<128x8xf32>
    %38 = arith.addf %33, %37 : vector<128x8xf32>
    %c0_41 = arith.constant 0 : index
    %c0_42 = arith.constant 0 : index
    %39 = vector.load %arg8[%c0_41, %c0_42] : memref<128x8xbf16, #tpu.memory_space<vmem>>, vector<128x8xbf16>
    %c3_43 = arith.constant 3 : index
    %c0_44 = arith.constant 0 : index
    %c0_45 = arith.constant 0 : index
    %40 = vector.load %arg9[%c3_43, %c0_44, %c0_45] : memref<4x8x8xbf16, #tpu.memory_space<vmem>>, vector<1x8x8xbf16>
    %41 = vector.shape_cast %40 : vector<1x8x8xbf16> to vector<8x8xbf16>
    %cst_46 = arith.constant dense<0.000000e+00> : vector<128x8xf32>
    %42 = tpu.matmul %39, %41, %cst_46 {dimension_numbers = #tpu.dot_dimension_numbers<[1], [0], [0], [1], [0, 0, 1, 1], [], []>} : vector<128x8xbf16>, vector<8x8xbf16>, vector<128x8xf32> -> vector<128x8xf32>
    %43 = arith.addf %38, %42 : vector<128x8xf32>
    %c0_47 = arith.constant 0 : index
    %c0_48 = arith.constant 0 : index
    %44 = vector.load %arg10[%c0_47, %c0_48] : memref<1x8xf32, #tpu.memory_space<vmem>>, vector<1x8xf32>
    %45 = vector.broadcast %44 : vector<1x8xf32> to vector<128x8xf32>
    %46 = arith.mulf %43, %45 : vector<128x8xf32>
    %c0_49 = arith.constant 0 : index
    %c0_50 = arith.constant 0 : index
    %47 = vector.load %arg11[%c0_49, %c0_50] : memref<1x8xf32, #tpu.memory_space<vmem>>, vector<1x8xf32>
    %48 = vector.broadcast %47 : vector<1x8xf32> to vector<128x8xf32>
    %49 = arith.addf %46, %48 : vector<128x8xf32>
    %50 = arith.negf %24 : vector<128x8xf32>
    %51 = math.exp %50 : vector<128x8xf32>
    %cst_51 = arith.constant 1.000000e+00 : f32
    %52 = vector.broadcast %cst_51 : f32 to vector<128x8xf32>
    %53 = arith.addf %52, %51 : vector<128x8xf32>
    %54 = arith.divf %52, %53 : vector<128x8xf32>
    %55 = arith.mulf %24, %54 : vector<128x8xf32>
    %56 = arith.negf %49 : vector<128x8xf32>
    %57 = math.exp %56 : vector<128x8xf32>
    %cst_52 = arith.constant 1.000000e+00 : f32
    %58 = vector.broadcast %cst_52 : f32 to vector<128x8xf32>
    %59 = arith.addf %58, %57 : vector<128x8xf32>
    %60 = arith.divf %58, %59 : vector<128x8xf32>
    %61 = arith.mulf %49, %60 : vector<128x8xf32>
    %62 = arith.addf %55, %61 : vector<128x8xf32>
    %c0_53 = arith.constant 0 : index
    %c0_54 = arith.constant 0 : index
    %63 = vector.load %arg12[%c0_53, %c0_54] : memref<128x8xf32, #tpu.memory_space<vmem>>, vector<128x8xf32>
    tpu.vector_store %arg12[%c0_53, %c0_54], %62 {strides = array<i32>} : memref<128x8xf32, #tpu.memory_space<vmem>>, vector<128x8xf32>,
    return
  }
  func.func @transform_0(%arg0: i32) -> (i32, i32) {
    %c0_i32 = arith.constant 0 : i32
    %c0_i32_0 = arith.constant 0 : i32
    return %arg0, %c0_i32 : i32, i32
  }
  func.func @transform_1(%arg0: i32) -> (i32, i32) {
    %c0_i32 = arith.constant 0 : i32
    %c0_i32_0 = arith.constant 0 : i32
    return %arg0, %c0_i32 : i32, i32
  }
  func.func @transform_2(%arg0: i32) -> (i32, i32) {
    %c0_i32 = arith.constant 0 : i32
    %c0_i32_0 = arith.constant 0 : i32
    return %arg0, %c0_i32 : i32, i32
  }
  func.func @transform_3(%arg0: i32) -> (i32, i32) {
    %c0_i32 = arith.constant 0 : i32
    %c0_i32_0 = arith.constant 0 : i32
    return %arg0, %c0_i32 : i32, i32
  }
  func.func @transform_4(%arg0: i32) -> (i32, i32) {
    %c0_i32 = arith.constant 0 : i32
    %c0_i32_0 = arith.constant 0 : i32
    return %arg0, %c0_i32 : i32, i32
  }
  func.func @transform_5(%arg0: i32) -> (i32, i32) {
    %c0_i32 = arith.constant 0 : i32
    %c0_i32_0 = arith.constant 0 : i32
    return %arg0, %c0_i32 : i32, i32
  }
  func.func @transform_6(%arg0: i32) -> (i32, i32) {
    %c0_i32 = arith.constant 0 : i32
    %c0_i32_0 = arith.constant 0 : i32
    return %arg0, %c0_i32 : i32, i32
  }
  func.func @transform_7(%arg0: i32) -> (i32, i32) {
    %c0_i32 = arith.constant 0 : i32
    %c0_i32_0 = arith.constant 0 : i32
    return %arg0, %c0_i32 : i32, i32
  }
  func.func @transform_8(%arg0: i32) -> (i32, i32, i32) {
    %c0_i32 = arith.constant 0 : i32
    %c0_i32_0 = arith.constant 0 : i32
    %c0_i32_1 = arith.constant 0 : i32
    %c0_i32_2 = arith.constant 0 : i32
    return %c0_i32, %c0_i32_0, %c0_i32_1 : i32, i32, i32
  }
  func.func @transform_9(%arg0: i32) -> (i32, i32) {
    %c0_i32 = arith.constant 0 : i32
    %c0_i32_0 = arith.constant 0 : i32
    %c0_i32_1 = arith.constant 0 : i32
    return %c0_i32, %c0_i32_0 : i32, i32
  }
  func.func @transform_10(%arg0: i32) -> (i32, i32) {
    %c0_i32 = arith.constant 0 : i32
    %c0_i32_0 = arith.constant 0 : i32
    %c0_i32_1 = arith.constant 0 : i32
    return %c0_i32, %c0_i32_0 : i32, i32
  }
  func.func @transform_11(%arg0: i32) -> (i32, i32) {
    %c0_i32 = arith.constant 0 : i32
    %c0_i32_0 = arith.constant 0 : i32
    return %arg0, %c0_i32 : i32, i32
  }
}

</mosaic_0001>

<bundles_post_ra>
// kernel: ppconv_forward.2
= control target key start
LH: loop header
LB: loop body
LE: loop exit
PB: predicated region body
PF: predicated region fallthrough
CT: control target
= control target key end

     0   :  { %s7223_s0 = inlined_call_operand.vmem [shape: bf16[578,12], index: 0, kind: input, shape index: {}]   ;;  %s7224_s1 = inlined_call_operand.vmem [shape: bf16[578,12], index: 1, kind: input, shape index: {}]   ;;  %s7225_s2 = inlined_call_operand.vmem [shape: bf16[578,12], index: 2, kind: input, shape index: {}]   ;;  %s7226_s3 = inlined_call_operand.vmem [shape: bf16[578,12], index: 3, kind: input, shape index: {}]   ;;  %s7227_s4 = inlined_call_operand.vmem [shape: bf16[578,20], index: 4, kind: input, shape index: {}]   ;;  %s7228_s5 = inlined_call_operand.vmem [shape: bf16[578,20], index: 5, kind: input, shape index: {}]   ;;  %s7229_s6 = inlined_call_operand.vmem [shape: bf16[578,20], index: 6, kind: input, shape index: {}]   ;;  %s7230_s7 = inlined_call_operand.vmem [shape: bf16[578,20], index: 7, kind: input, shape index: {}]   ;;  %s7231_s8 = inlined_call_operand.vmem [shape: bf16[12,2], index: 8, kind: input, shape index: {}]   ;;  %s7232_s9 = inlined_call_operand.vmem [shape: bf16[12,2], index: 9, kind: input, shape index: {}]   ;;  %s7233_s10 = inlined_call_operand.vmem [shape: bf16[20,2], index: 10, kind: input, shape index: {}]   ;;  %s7234_s11 = inlined_call_operand.vmem [shape: bf16[20,2], index: 11, kind: input, shape index: {}]   ;;  %s7235_s12 = inlined_call_operand.vmem [shape: f32[1,8], index: 12, kind: input, shape index: {}]   ;;  %s7236_s13 = inlined_call_operand.vmem [shape: f32[1,8], index: 13, kind: input, shape index: {}]   ;;  %s7237_s14 = inlined_call_operand.vmem [shape: f32[1,8], index: 14, kind: input, shape index: {}]   ;;  %s7238_s15 = inlined_call_operand.vmem [shape: f32[1,8], index: 15, kind: input, shape index: {}]   ;;  %s7239_s16 = inlined_call_operand.vmem [shape: bf16[578,8], index: 16, kind: output, shape index: {0}]   ;;  %s7240_s17 = inlined_call_operand.vmem [shape: bf16[578,8], index: 17, kind: output, shape index: {1}]  }
   0x1   :  { %7241 = sst [smem:[#allocation51_spill]] %s7223_s0 }
   0x2   :  { %7242 = sst [smem:[#allocation52_spill]] %s7224_s1 }
   0x3   :  { %7243 = sst [smem:[#allocation53_spill]] %s7225_s2 }
   0x4   :  { %7244 = sst [smem:[#allocation54_spill]] %s7226_s3 }
   0x5   :  { %7245 = sst [smem:[#allocation55_spill]] %s7227_s4 }
   0x6   :  { %7246 = sst [smem:[#allocation56_spill]] %s7228_s5 }
   0x7   :  { %7247 = sst [smem:[#allocation57_spill]] %s7229_s6 }
   0x8   :  { %7248 = sst [smem:[#allocation58_spill]] %s7230_s7 }
   0x9   :  { %7249 = sst [smem:[#allocation59_spill]] %s7231_s8 }
   0xa   :  { %7250 = sst [smem:[#allocation60_spill]] %s7232_s9 }
   0xb   :  { %7251 = sst [smem:[#allocation61_spill]] %s7233_s10 }
   0xc   :  { %s5739_s24 = smov 0   ;;  %s5741_s25 = smov 0  }
   0xd   :  { %s5743_s26 = smov 0  }
   0xe LB: > { %s5752_s27 = sadd.s32 4294967295, %s5580_s26   ;;  %s5754_s28 = sadd.s32 1, %s5580_s26   ;;  %s5580_s26 = sphi %s5743_s26, %s7366_s26   ;;  %s5576_s25 = sphi %s5741_s25, %s7365_s25   ;;  %s5572_s24 = sphi %s5739_s24, %s7364_s24  }
   0xf   : > { %s408_s29 = ssub.s32 %s5580_s26, %s5754_s28  ;;  %s411_s0 = sadd.s32 1, %s5576_s25 }
  0x10   : > { %p409_p0 = scmp.eq.s32.totalorder %s408_s29, 0  ;;  %p421_p1 = scmp.ne.s32.totalorder %s5576_s25, %s5572_s24 }
  0x11   : > { %p422_p2 = scmp.eq.s32.totalorder %s5752_s27, 3  ;;  %p4475_p3 = scmp.ge.s32.totalorder %s5580_s26, 1 }
  0x12   : > { %s5762_s30 = scalar_select %p409_p0, %s5576_s25, %s411_s0  }
  0x13   : > { %p5764_p4 = por %p422_p2, %p421_p1  ;;  %p632_p5 = scmp.lt.s32.totalorder %s5580_s26, 5 }
  0x15   : > { %p633_p6 = pnand %p4475_p3, %p632_p5 }
  0x17   : > { %636 = sbr.rel (%p633_p6) target bundleno = 803 (0x323), region = 84 }
  0x1e   : > { %s7253_s8 = sld [smem:[#allocation59_spill]]  ;;  %vm987_vm0 = vcmask 1045504   ;;  %s5772_s20 = smul.u32 20, %s5752_s27  ;;  %vm956_vm1 = vcmask 97280   ;;  %vm2465_vm2 = vcmask 1041408   ;;  %v5288_v32 = vld [vmem:[%s7234_s11] sm:$0xff]  }
  0x1f   : > { %s7254_s9 = sld [smem:[#allocation60_spill]]  ;;  %s7255_s19 = sld [smem:[#allocation51_spill]]  ;;  %vm2434_vm3 = vcmask 162816   ;;  %v5297_v54 = vld [vmem:[%s7234_s11 + $0x8] ss:$0 sps:$4 sm:$0x33]  }
  0x20   : > { %p759_p7 = scmp.lt.s32.totalorder %s5772_s20, 72  ;;  %s7257_s10 = sld [smem:[#allocation61_spill]]  ;;  %v2905_v55 = vsel %vm2465_vm2, %v5297_v54, 0  ;;  %vm1991_vm4 = vcmask 15360   ;;  %vm2012_vm5 = vcmask 31744   ;;  %vm2033_vm6 = vcmask 48128  }
  0x21   : > { %s7258_s2 = sld [smem:[#allocation53_spill]]  ;;  %s7259_s3 = sld [smem:[#allocation54_spill]]  ;;  %vm2328_vm7 = vcmask 60416  }
  0x22   : > { %s760_s23 = scalar_select %p759_p7, %s5772_s20, 72 }
  0x23   : > { %s7260_s4 = sld [smem:[#allocation55_spill]]  ;;  %s7261_s5 = sld [smem:[#allocation56_spill]] }
  0x24   : > { %v5240_v0 = vld [vmem:[%s7253_s8] sm:$0x3f]   ;;  %s5784_s26 = sshll.u32 %s760_s23, 2  ;;  %s7256_s8 = sld [smem:[#allocation52_spill]] }
  0x25   : > { %5074 = vmatprep.subr.msk.bf16.mxu0 %vm987_vm0, %v5240_v0  ;;  %v989_v1 = vsel %vm987_vm0, %v5240_v0, 0  ;;  %5075 = vmatprep.subr.msk.bf16.mxu1 %vm987_vm0, %v5240_v0  ;;  %v5243_v2 = vld [vmem:[%s7254_s9] sm:$0x3f]   ;;  %s5790_s1 = scalar_lea.vmem %s7255_s19, %s5784_s26  ;;  %s7262_s6 = sld [smem:[#allocation57_spill]] }
  0x26   : > { %4891 = vmatpush3.bf16.msra.mxu0 %v989_v1  ;;  %4913 = vmatpush3.bf16.msra.mxu1 %v989_v1  ;;  %v5241_v3 = vld [vmem:[%s5790_s1] sm:$0xff]   ;;  %v5244_v6 = vld [vmem:[%s5790_s1 + $0x8] sm:$0xff]   ;;  %v1423_v7 = vsel %vm987_vm0, %v5243_v2, 0  ;;  %v5246_v9 = vld [vmem:[%s5790_s1 + $0x10] sm:$0xff]   ;;  %s7263_s7 = sld [smem:[#allocation58_spill]]  ;;  %s745_s29 = sand.u32 1, %s5572_s24  }
  0x27   : > { %5076 = vmatprep.subr.msk.bf16.mxu0 %vm987_vm0, %v5243_v2  ;;  %5077 = vmatprep.subr.msk.bf16.mxu1 %vm987_vm0, %v5243_v2  ;;  %v5803_v5 = vld [vmem:[%s7257_s10] sm:$0xff]   ;;  %v5248_v11 = vld [vmem:[%s5790_s1 + $0x18] sm:$0xff]   ;;  %v5252_v15 = vld [vmem:[%s5790_s1 + $0x28] sm:$0xff]   ;;  %s5834_s19 = scalar_lea.vmem %s7258_s2, %s5784_s26  ;;  %s5843_s23 = scalar_lea.vmem %s7259_s3, %s5784_s26 }
  0x28   : > { %4892 = vmatprep.mubr.msk.bf16.mxu0 %vm956_vm1, %v5241_v3  ;;  %v5250_v13 = vld [vmem:[%s5790_s1 + $0x20] sm:$0xff]   ;;  %v5254_v17 = vld [vmem:[%s5790_s1 + $0x30] sm:$0xff]   ;;  %v5256_v19 = vld [vmem:[%s5790_s1 + $0x38] sm:$0xff]   ;;  %s6482_s24 = smul.u32 80, %s745_s29  ;;  %s3839_s2 = ssub.s32 (%p5764_p4), 73, %s5772_s20 }
  0x29   : > { %4893 = vmatmul.mubr.msk.bf16.vlgmr.msra.gmra.mrb[0].mxu0 %vm956_vm1, %v5244_v6  ;;  %v5258_v21 = vld [vmem:[%s5790_s1 + $0x40] sm:$0xff]   ;;  %v5260_v23 = vld [vmem:[%s5790_s1 + $0x48] sm:$0xff]   ;;  %s5867_s0 = scalar_lea.vmem %s7260_s4, %s5784_s26  ;;  %s5874_s21 = scalar_lea.vmem %s7261_s5, %s5784_s26  ;;  %v5266_v29 = vld [vmem:[%s5834_s19 + $0x10] sm:$0xff]  }
  0x2a   : > { %s5796_s9 = scalar_lea.vmem %s7256_s8, %s5784_s26  ;;  %4935 = vmatpush3.bf16.msra.mxu0 %v1423_v7  ;;  %4896 = vmatprep.mubr.msk.bf16.mxu0 %vm956_vm1, %v5246_v9  ;;  %v5262_v25 = vld [vmem:[%s5834_s19] sm:$0xff]   ;;  %v5263_v27 = vld [vmem:[%s5834_s19 + $0x8] sm:$0xff]   ;;  %v5268_v31 = vld [vmem:[%s5843_s23 + $0x10] sm:$0xff]   ;;  %s4796_s1 = smul.u32 (%p5764_p4), 80, %s5752_s27 }
  0x2b   : > { %v5242_v4 = vld [vmem:[%s5796_s9] sm:$0xff]   ;;  %v5245_v8 = vld [vmem:[%s5796_s9 + $0x8] sm:$0xff]   ;;  %v5247_v10 = vld [vmem:[%s5796_s9 + $0x10] sm:$0xff]   ;;  %4978 = vmatprep.subr.bf16.mxu0 %v5803_v5  ;;  %p3840_p8 = scmp.lt.s32.totalorder (%p5764_p4), %s3839_s2, 20 }
  0x2c   : > { %4914 = vmatprep.mubr.msk.bf16.mxu1 %vm956_vm1, %v5242_v4  ;;  %v5249_v12 = vld [vmem:[%s5796_s9 + $0x18] sm:$0xff]   ;;  %v5251_v14 = vld [vmem:[%s5796_s9 + $0x20] sm:$0xff]   ;;  %v5253_v16 = vld [vmem:[%s5796_s9 + $0x28] sm:$0xff]   ;;  %s5918_s8 = scalar_lea.vmem %s7263_s7, %s5784_s26  ;;  %s7028_s29 = scalar_lea.vmem (%p5764_p4), %s7239_s16, %s4796_s1  }
  0x2d   : > { %4915 = vmatmul.mubr.msk.bf16.vlgmr.msra.gmra.mrb[0].mxu1 %vm956_vm1, %v5245_v8  ;;  %v5255_v18 = vld [vmem:[%s5796_s9 + $0x30] sm:$0xff]   ;;  %v5257_v20 = vld [vmem:[%s5796_s9 + $0x38] sm:$0xff]   ;;  %v5259_v22 = vld [vmem:[%s5796_s9 + $0x40] sm:$0xff]  }
  0x2e   : > { %4957 = vmatpush3.bf16.msra.mxu1 %v1423_v7  ;;  %4918 = vmatprep.mubr.msk.bf16.mxu1 %vm956_vm1, %v5247_v10  ;;  %v5261_v24 = vld [vmem:[%s5796_s9 + $0x48] sm:$0xff]   ;;  %v5264_v26 = vld [vmem:[%s5843_s23] sm:$0xff]   ;;  %v5267_v33 = vld [vmem:[%s5834_s19 + $0x18] sm:$0xff]   ;;  %s5909_s9 = scalar_lea.vmem %s7262_s6, %s5784_s26 }
  0x2f   : > { %5002 = vmatprep.subr.bf16.mxu1 %v5803_v5  ;;  %v5265_v28 = vld [vmem:[%s5843_s23 + $0x8] sm:$0xff]   ;;  %v5269_v35 = vld [vmem:[%s5843_s23 + $0x18] sm:$0xff]   ;;  %v5270_v36 = vld [vmem:[%s5834_s19 + $0x20] sm:$0xff]  }
  0x30   : > { %v5279_v30 = vld [vmem:[%s7257_s10 + $0x8] ss:$0 sps:$4 sm:$0x33]   ;;  %v5272_v37 = vld [vmem:[%s5843_s23 + $0x20] sm:$0xff]   ;;  %v5275_v40 = vld [vmem:[%s5834_s19 + $0x30] sm:$0xff]  }
  0x31   : > { %4897 = vmatmul.mubr.msk.bf16.gmra.mrb[4].mxu0 %vm956_vm1, %v5248_v11  ;;  %v2467_v34 = vsel %vm2465_vm2, %v5279_v30, 0  ;;  %v5271_v38 = vld [vmem:[%s5834_s19 + $0x28] sm:$0xff]   ;;  %v5277_v41 = vld [vmem:[%s5843_s23 + $0x30] sm:$0xff]   ;;  %v5276_v42 = vld [vmem:[%s5834_s19 + $0x38] sm:$0xff]  }
  0x32   : > { %4900 = vmatprep.mubr.msk.bf16.mxu0 %vm956_vm1, %v5250_v13  ;;  %v5273_v39 = vld [vmem:[%s5843_s23 + $0x28] sm:$0xff]   ;;  %v5278_v43 = vld [vmem:[%s5843_s23 + $0x38] sm:$0xff]   ;;  %v5280_v44 = vld [vmem:[%s5834_s19 + $0x40] sm:$0xff]  }
  0x33   : > { %v5282_v45 = vld [vmem:[%s5843_s23 + $0x40] sm:$0xff]   ;;  %v5281_v46 = vld [vmem:[%s5834_s19 + $0x48] sm:$0xff]   ;;  %v5289_v52 = vld [vmem:[%s5867_s0 + $0x10] sm:$0xff]  }
  0x34   : > { %v5283_v47 = vld [vmem:[%s5843_s23 + $0x48] sm:$0xff]   ;;  %v5284_v48 = vld [vmem:[%s5867_s0] sm:$0xff]   ;;  %v5290_v53 = vld [vmem:[%s5874_s21 + $0x10] sm:$0xff]   ;;  %s5646_s23 = smov 2  }
  0x35   : > { %4919 = vmatmul.mubr.msk.bf16.gmra.mrb[4].mxu1 %vm956_vm1, %v5249_v12  ;;  %v5285_v49 = vld [vmem:[%s5874_s21] sm:$0xff]   ;;  %v5286_v50 = vld [vmem:[%s5867_s0 + $0x8] sm:$0xff]   ;;  %v5291_v56 = vld [vmem:[%s5867_s0 + $0x18] sm:$0xff]  }
  0x36   : > { %4922 = vmatprep.mubr.msk.bf16.mxu1 %vm956_vm1, %v5251_v14  ;;  %v5287_v51 = vld [vmem:[%s5874_s21 + $0x8] sm:$0xff]   ;;  %v5292_v57 = vld [vmem:[%s5874_s21 + $0x18] sm:$0xff]   ;;  %v5293_v58 = vld [vmem:[%s5867_s0 + $0x20] sm:$0xff]  }
  0x37   : > { %v5294_v59 = vld [vmem:[%s5874_s21 + $0x20] sm:$0xff]   ;;  %v5295_v60 = vld [vmem:[%s5867_s0 + $0x28] sm:$0xff]   ;;  %v5298_v62 = vld [vmem:[%s5867_s0 + $0x30] sm:$0xff]  }
  0x38   : > { %v5296_v61 = vld [vmem:[%s5874_s21 + $0x28] sm:$0xff]   ;;  %v5299_v63 = vld [vmem:[%s5874_s21 + $0x30] sm:$0xff]   ;;  %v5300_v0 = vld [vmem:[%s5867_s0 + $0x38] sm:$0xff]  }
  0x39   : > { %4901 = vmatmul.mubr.msk.bf16.gmra.mrb[8].mxu0 %vm956_vm1, %v5252_v15  ;;  %v5301_v1 = vld [vmem:[%s5874_s21 + $0x38] sm:$0xff]   ;;  %v5302_v2 = vld [vmem:[%s5867_s0 + $0x40] sm:$0xff]   ;;  %v5304_v4 = vld [vmem:[%s5867_s0 + $0x48] sm:$0xff]   ;;  %s5647_s0 = smov 4  }
  0x3a   : > { %4904 = vmatprep.mubr.msk.bf16.mxu0 %vm956_vm1, %v5254_v17  ;;  %v5303_v3 = vld [vmem:[%s5874_s21 + $0x40] sm:$0xff]   ;;  %v5307_v8 = vld [vmem:[%s5909_s9 + $0x8] sm:$0xff]   ;;  %v5310_v10 = vld [vmem:[%s5909_s9 + $0x10] sm:$0xff]  }
  0x3b   : > { %v5306_v6 = vld [vmem:[%s5909_s9] sm:$0xff]   ;;  %v5309_v9 = vld [vmem:[%s5918_s8 + $0x8] sm:$0xff]   ;;  %v5312_v11 = vld [vmem:[%s5918_s8 + $0x10] sm:$0xff]  }
  0x3c   : > { %v5308_v7 = vld [vmem:[%s5918_s8] sm:$0xff]   ;;  %v5311_v12 = vld [vmem:[%s5909_s9 + $0x18] sm:$0xff]   ;;  %v5317_v17 = vld [vmem:[%s5918_s8 + $0x28] sm:$0xff]  }
  0x3d   : > { %4923 = vmatmul.mubr.msk.bf16.gmra.mrb[8].mxu1 %vm956_vm1, %v5253_v16  ;;  %v5313_v13 = vld [vmem:[%s5918_s8 + $0x18] sm:$0xff]   ;;  %v5314_v14 = vld [vmem:[%s5909_s9 + $0x20] sm:$0xff]   ;;  %v5315_v16 = vld [vmem:[%s5909_s9 + $0x28] sm:$0xff]  }
  0x3e   : > { %4926 = vmatprep.mubr.msk.bf16.mxu1 %vm956_vm1, %v5255_v18  ;;  %v5316_v15 = vld [vmem:[%s5918_s8 + $0x20] sm:$0xff]   ;;  %v5318_v18 = vld [vmem:[%s5909_s9 + $0x30] sm:$0xff]  }
  0x41   : > { %4905 = vmatmul.mubr.msk.bf16.gmra.mrb[12].mxu0 %vm956_vm1, %v5256_v19  ;;  %v5320_v19 = vld [vmem:[%s5918_s8 + $0x30] sm:$0xff]  }
  0x42   : > { %4908 = vmatprep.mubr.msk.bf16.mxu0 %vm956_vm1, %v5258_v21  ;;  %v5321_v21 = vld [vmem:[%s5918_s8 + $0x38] sm:$0xff]  }
  0x45   : > { %4927 = vmatmul.mubr.msk.bf16.gmra.mrb[12].mxu1 %vm956_vm1, %v5257_v20  ;;  %v5319_v20 = vld [vmem:[%s5909_s9 + $0x38] sm:$0xff]  }
  0x46   : > { %4930 = vmatprep.mubr.msk.bf16.mxu1 %vm956_vm1, %v5259_v22  ;;  %v5322_v22 = vld [vmem:[%s5909_s9 + $0x40] sm:$0xff]  }
  0x49   : > { %4909 = vmatmul.mubr.msk.bf16.gmra.mrb[16].mxu0 %vm956_vm1, %v5260_v23  ;;  %v5324_v23 = vld [vmem:[%s5918_s8 + $0x40] sm:$0xff]  }
  0x4a   : > { %4936 = vmatprep.mubr.msk.bf16.mxu0 %vm956_vm1, %v5262_v25  ;;  %v5325_v25 = vld [vmem:[%s5918_s8 + $0x48] sm:$0xff]   ;;  %s6512_s8 = scalar_lea.vmem [#allocation2], %s6482_s24  }
  0x4d   : > { %4931 = vmatmul.mubr.msk.bf16.gmra.mrb[16].mxu1 %vm956_vm1, %v5261_v24  ;;  %v5323_v24 = vld [vmem:[%s5909_s9 + $0x48] sm:$0xff]  }
  0x4e   : > { %4958 = vmatprep.mubr.msk.bf16.mxu1 %vm956_vm1, %v5264_v26 }
  0x51   : > { %4937 = vmatmul.mubr.msk.bf16.vlgmr.msra.gmra.mrb[20].mxu0 %vm956_vm1, %v5263_v27 }
  0x52   : > { %4940 = vmatprep.mubr.msk.bf16.mxu0 %vm956_vm1, %v5266_v29  ;;  %4979 = vmatpush3.bf16.msra.mxu0 %v5803_v5 }
  0x53   : > { %5078 = vmatprep.subr.msk.bf16.mxu0 %vm2465_vm2, %v5279_v30 }
  0x55   : > { %4959 = vmatmul.mubr.msk.bf16.vlgmr.msra.gmra.mrb[20].mxu1 %vm956_vm1, %v5265_v28 }
  0x56   : > { %4962 = vmatprep.mubr.msk.bf16.mxu1 %vm956_vm1, %v5268_v31  ;;  %5003 = vmatpush3.bf16.msra.mxu1 %v5803_v5  ;;  %v5305_v5 = vld [vmem:[%s5874_s21 + $0x48] sm:$0xff]   ;;  %s5648_s21 = smov 6  }
  0x57   : > { %5079 = vmatprep.subr.msk.bf16.mxu1 %vm2465_vm2, %v5279_v30  ;;  %4981 = vmatpush3.bf16.msra.mxu0 %v2467_v34 }
  0x58   : > { %5026 = vmatprep.subr.bf16.mxu0 %v5288_v32 }
  0x59   : > { %4941 = vmatmul.mubr.msk.bf16.gmra.mrb[24].mxu0 %vm956_vm1, %v5267_v33 }
  0x5a   : > { %5005 = vmatpush3.bf16.msra.mxu1 %v2467_v34  ;;  %4944 = vmatprep.mubr.msk.bf16.mxu0 %vm956_vm1, %v5270_v36 }
  0x5b   : > { %5050 = vmatprep.subr.bf16.mxu1 %v5288_v32 }
  0x5d   : > { %4963 = vmatmul.mubr.msk.bf16.gmra.mrb[24].mxu1 %vm956_vm1, %v5269_v35 }
  0x5e   : > { %4966 = vmatprep.mubr.msk.bf16.mxu1 %vm956_vm1, %v5272_v37 }
  0x61   : > { %4945 = vmatmul.mubr.msk.bf16.gmra.mrb[28].mxu0 %vm956_vm1, %v5271_v38 }
  0x62   : > { %4948 = vmatprep.mubr.msk.bf16.mxu0 %vm956_vm1, %v5275_v40 }
  0x65   : > { %4967 = vmatmul.mubr.msk.bf16.gmra.mrb[28].mxu1 %vm956_vm1, %v5273_v39 }
  0x66   : > { %4970 = vmatprep.mubr.msk.bf16.mxu1 %vm956_vm1, %v5277_v41 }
  0x69   : > { %4949 = vmatmul.mubr.msk.bf16.gmra.mrb[32].mxu0 %vm956_vm1, %v5276_v42 }
  0x6a   : > { %4952 = vmatprep.mubr.msk.bf16.mxu0 %vm956_vm1, %v5280_v44 }
  0x6d   : > { %4971 = vmatmul.mubr.msk.bf16.gmra.mrb[32].mxu1 %vm956_vm1, %v5278_v43 }
  0x6e   : > { %4974 = vmatprep.mubr.msk.bf16.mxu1 %vm956_vm1, %v5282_v45 }
  0x71   : > { %4953 = vmatmul.mubr.msk.bf16.gmra.mrb[36].mxu0 %vm956_vm1, %v5281_v46 }
  0x72   : > { %4982 = vmatprep.mubr.msk.bf16.mxu0 %vm2434_vm3, %v5284_v48 }
  0x75   : > { %4975 = vmatmul.mubr.msk.bf16.gmra.mrb[36].mxu1 %vm956_vm1, %v5283_v47 }
  0x76   : > { %5006 = vmatprep.mubr.msk.bf16.mxu1 %vm2434_vm3, %v5285_v49 }
  0x79   : > { %4983 = vmatmul.mubr.msk.bf16.vlgmr.msra.gmra.mrb[40].mxu0 %vm2434_vm3, %v5286_v50 }
  0x7a   : > { %5027 = vmatpush3.bf16.msra.mxu0 %v5288_v32  ;;  %4986 = vmatprep.mubr.msk.bf16.mxu0 %vm2434_vm3, %v5289_v52 }
  0x7b   : > { %5080 = vmatprep.subr.msk.bf16.mxu0 %vm2465_vm2, %v5297_v54 }
  0x7d   : > { %5007 = vmatmul.mubr.msk.bf16.vlgmr.msra.gmra.mrb[40].mxu1 %vm2434_vm3, %v5287_v51 }
  0x7e   : > { %5010 = vmatprep.mubr.msk.bf16.mxu1 %vm2434_vm3, %v5290_v53  ;;  %5051 = vmatpush3.bf16.msra.mxu1 %v5288_v32 }
  0x7f   : > { %5081 = vmatprep.subr.msk.bf16.mxu1 %vm2465_vm2, %v5297_v54  ;;  %5029 = vmatpush3.bf16.msra.mxu0 %v2905_v55 }
  0x81   : > { %4987 = vmatmul.mubr.msk.bf16.gmra.mrb[44].mxu0 %vm2434_vm3, %v5291_v56 }
  0x82   : > { %5053 = vmatpush3.bf16.msra.mxu1 %v2905_v55  ;;  %4990 = vmatprep.mubr.msk.bf16.mxu0 %vm2434_vm3, %v5293_v58 }
  0x85   : > { %5011 = vmatmul.mubr.msk.bf16.gmra.mrb[44].mxu1 %vm2434_vm3, %v5292_v57 }
  0x86   : > { %5014 = vmatprep.mubr.msk.bf16.mxu1 %vm2434_vm3, %v5294_v59 }
  0x89   : > { %4991 = vmatmul.mubr.msk.bf16.gmra.mrb[48].mxu0 %vm2434_vm3, %v5295_v60 }
  0x8a   : > { %4994 = vmatprep.mubr.msk.bf16.mxu0 %vm2434_vm3, %v5298_v62 }
  0x8d   : > { %5015 = vmatmul.mubr.msk.bf16.gmra.mrb[48].mxu1 %vm2434_vm3, %v5296_v61 }
  0x8e   : > { %5018 = vmatprep.mubr.msk.bf16.mxu1 %vm2434_vm3, %v5299_v63 }
  0x91   : > { %4995 = vmatmul.mubr.msk.bf16.gmra.mrb[52].mxu0 %vm2434_vm3, %v5300_v0 }
  0x92   : > { %4998 = vmatprep.mubr.msk.bf16.mxu0 %vm2434_vm3, %v5302_v2 }
  0x95   : > { %5019 = vmatmul.mubr.msk.bf16.gmra.mrb[52].mxu1 %vm2434_vm3, %v5301_v1 }
  0x96   : > { %5022 = vmatprep.mubr.msk.bf16.mxu1 %vm2434_vm3, %v5303_v3 }
  0x99   : > { %4999 = vmatmul.mubr.msk.bf16.gmra.mrb[56].mxu0 %vm2434_vm3, %v5304_v4 }
  0x9a   : > { %5030 = vmatprep.mubr.msk.bf16.mxu0 %vm2434_vm3, %v5306_v6 }
  0x9d   : > { %5023 = vmatmul.mubr.msk.bf16.gmra.mrb[56].mxu1 %vm2434_vm3, %v5305_v5 }
  0x9e   : > { %5054 = vmatprep.mubr.msk.bf16.mxu1 %vm2434_vm3, %v5308_v7 }
  0xa1   : > { %5031 = vmatmul.mubr.msk.bf16.vlgmr.msra.gmra.mrb[60].mxu0 %vm2434_vm3, %v5307_v8 }
  0xa2   : > { %5034 = vmatprep.mubr.msk.bf16.mxu0 %vm2434_vm3, %v5310_v10 }
  0xa5   : > { %5055 = vmatmul.mubr.msk.bf16.vlgmr.msra.gmra.mrb[60].mxu1 %vm2434_vm3, %v5309_v9 }
  0xa6   : > { %5058 = vmatprep.mubr.msk.bf16.mxu1 %vm2434_vm3, %v5312_v11 }
  0xa9   : > { %5035 = vmatmul.mubr.msk.bf16.gmra.mrb[64].mxu0 %vm2434_vm3, %v5311_v12 }
  0xaa   : > { %5038 = vmatprep.mubr.msk.bf16.mxu0 %vm2434_vm3, %v5314_v14 }
  0xad   : > { %5059 = vmatmul.mubr.msk.bf16.gmra.mrb[64].mxu1 %vm2434_vm3, %v5313_v13 }
  0xae   : > { %5062 = vmatprep.mubr.msk.bf16.mxu1 %vm2434_vm3, %v5316_v15 }
  0xb1   : > { %5039 = vmatmul.mubr.msk.bf16.gmra.mrb[68].mxu0 %vm2434_vm3, %v5315_v16 }
  0xb2   : > { %5042 = vmatprep.mubr.msk.bf16.mxu0 %vm2434_vm3, %v5318_v18 }
  0xb5   : > { %5063 = vmatmul.mubr.msk.bf16.gmra.mrb[68].mxu1 %vm2434_vm3, %v5317_v17 }
  0xb6   : > { %5066 = vmatprep.mubr.msk.bf16.mxu1 %vm2434_vm3, %v5320_v19 }
  0xb9   : > { %5043 = vmatmul.mubr.msk.bf16.gmra.mrb[72].mxu0 %vm2434_vm3, %v5319_v20 }
  0xba   : > { %5046 = vmatprep.mubr.msk.bf16.mxu0 %vm2434_vm3, %v5322_v22 }
  0xbd   : > { %5067 = vmatmul.mubr.msk.bf16.gmra.mrb[72].mxu1 %vm2434_vm3, %v5321_v21 }
  0xbe   : > { %5070 = vmatprep.mubr.msk.bf16.mxu1 %vm2434_vm3, %v5324_v23 }
  0xc1   : > { %5047 = vmatmul.mubr.msk.bf16.gmra.mrb[76].mxu0 %vm2434_vm3, %v5323_v24 }
  0xc5   : > { %5071 = vmatmul.mubr.msk.bf16.gmra.mrb[76].mxu1 %vm2434_vm3, %v5325_v25 }
  0xfc   : > { %v6019_v26 = vpop.f32.mrb[0].mxu0 }
  0xfd   : > { %v6021_v28 = vpop.f32.mrb[1].mxu0 }
  0xfe   : > { %v6024_v30 = vpop.f32.mrb[2].mxu0 }
  0xff   : > { %v6027_v32 = vpop.f32.mrb[3].mxu0 }
 0x100   : > { %v4916_v27 = vpop.f32.mrb[0].mxu1 }
 0x101   : > { %1775 = vrot.lane.b32.xlu1 %v4916_v27, %s5646_s23  ;;  %v1238_v29 = vpop.f32.mrb[1].mxu1 }
 0x102   : > { %1771 = vrot.lane.b32.xlu0 %v1238_v29, %s5646_s23  ;;  %v4917_v31 = vpop.f32.mrb[2].mxu1 }
 0x103   : > { %v1241_v33 = vpop.f32.mrb[3].mxu1 }
 0x104   : > { %v6031_v34 = vpop.f32.mrb[4].mxu0 }
 0x105   : > { %1777 = vrot.lane.b32.xlu1 %v4917_v31, %s5646_s23  ;;  %v6033_v36 = vpop.f32.mrb[5].mxu0 }
 0x106   : > { %1773 = vrot.lane.b32.xlu0 %v1241_v33, %s5646_s23  ;;  %v6035_v38 = vpop.f32.mrb[6].mxu0 }
 0x107   : > { %v6038_v40 = vpop.f32.mrb[7].mxu0 }
 0x108   : > { %v4920_v35 = vpop.f32.mrb[4].mxu1 }
 0x109   : > { %v1254_v37 = vpop.f32.mrb[5].mxu1 }
 0x10a   : > { %1783 = vrot.lane.b32.xlu0 %v4920_v35, %s5646_s23  ;;  %v4921_v39 = vpop.f32.mrb[6].mxu1 }
 0x10b   : > { %1785 = vrot.lane.b32.xlu1 %v4921_v39, %s5646_s23  ;;  %v1257_v41 = vpop.f32.mrb[7].mxu1 }
 0x10c   : > { %v6043_v42 = vpop.f32.mrb[8].mxu0 }
 0x10d   : > { %v6045_v44 = vpop.f32.mrb[9].mxu0 }
 0x10e   : > { %1779 = vrot.lane.b32.xlu0 %v1254_v37, %s5646_s23  ;;  %v6047_v46 = vpop.f32.mrb[10].mxu0 }
 0x10f   : > { %1781 = vrot.lane.b32.xlu1 %v1257_v41, %s5646_s23  ;;  %v6050_v48 = vpop.f32.mrb[11].mxu0 }
 0x110   : > { %v4924_v43 = vpop.f32.mrb[8].mxu1 }
 0x111   : > { %v1270_v45 = vpop.f32.mrb[9].mxu1 }
 0x112   : > { %1791 = vrot.lane.b32.xlu0 %v4924_v43, %s5646_s23  ;;  %v4925_v47 = vpop.f32.mrb[10].mxu1 }
 0x113   : > { %1793 = vrot.lane.b32.xlu1 %v4925_v47, %s5646_s23  ;;  %v1273_v49 = vpop.f32.mrb[11].mxu1 }
 0x114   : > { %v6055_v50 = vpop.f32.mrb[12].mxu0 }
 0x115   : > { %7264 = vst [vmem:[#allocation4_spill] sm:$0xff] %v6055_v50  ;;  %v6057_v52 = vpop.f32.mrb[13].mxu0 }
 0x116   : > { %1787 = vrot.lane.b32.xlu0 %v1270_v45, %s5646_s23  ;;  %7265 = vst [vmem:[#allocation5_spill] sm:$0xff] %v6057_v52  ;;  %v6059_v54 = vpop.f32.mrb[14].mxu0 }
 0x117   : > { %1789 = vrot.lane.b32.xlu1 %v1273_v49, %s5646_s23  ;;  %7266 = vst [vmem:[#allocation6_spill] sm:$0xff] %v6059_v54  ;;  %v6062_v56 = vpop.f32.mrb[15].mxu0 }
 0x118   : > { %v4928_v51 = vpop.f32.mrb[12].mxu1  ;;  %7267 = vst [vmem:[#allocation7_spill] sm:$0xff] %v6062_v56 }
 0x119   : > { %v1286_v53 = vpop.f32.mrb[13].mxu1 }
 0x11a   : > { %1799 = vrot.lane.b32.xlu0 %v4928_v51, %s5646_s23  ;;  %v4929_v55 = vpop.f32.mrb[14].mxu1 }
 0x11b   : > { %1801 = vrot.lane.b32.xlu1 %v4929_v55, %s5646_s23  ;;  %v1289_v57 = vpop.f32.mrb[15].mxu1 }
 0x11c   : > { %v6067_v58 = vpop.f32.mrb[16].mxu0 }
 0x11d   : > { %7268 = vst [vmem:[#allocation8_spill] sm:$0xff] %v6067_v58  ;;  %v6069_v60 = vpop.f32.mrb[17].mxu0 }
 0x11e   : > { %1795 = vrot.lane.b32.xlu0 %v1286_v53, %s5646_s23  ;;  %7269 = vst [vmem:[#allocation9_spill] sm:$0xff] %v6069_v60  ;;  %v6071_v62 = vpop.f32.mrb[18].mxu0 }
 0x11f   : > { %1797 = vrot.lane.b32.xlu1 %v1289_v57, %s5646_s23  ;;  %7270 = vst [vmem:[#allocation10_spill] sm:$0xff] %v6071_v62  ;;  %v6074_v0 = vpop.f32.mrb[19].mxu0 }
 0x120   : > { %v4932_v59 = vpop.f32.mrb[16].mxu1  ;;  %7271 = vst [vmem:[#allocation11_spill] sm:$0xff] %v6074_v0 }
 0x121   : > { %v1302_v61 = vpop.f32.mrb[17].mxu1 }
 0x122   : > { %1807 = vrot.lane.b32.xlu0 %v4932_v59, %s5646_s23  ;;  %v4933_v63 = vpop.f32.mrb[18].mxu1 }
 0x123   : > { %1809 = vrot.lane.b32.xlu1 %v4933_v63, %s5646_s23  ;;  %v1305_v1 = vpop.f32.mrb[19].mxu1 }
 0x124   : > { %v4938_v2 = vpop.f32.mrb[20].mxu0 }
 0x125   : > { %v1459_v3 = vpop.f32.mrb[21].mxu0 }
 0x126   : > { %1803 = vrot.lane.b32.xlu0 %v1302_v61, %s5646_s23  ;;  %v4939_v6 = vpop.f32.mrb[22].mxu0 }
 0x127   : > { %1805 = vrot.lane.b32.xlu1 %v1305_v1, %s5646_s23  ;;  %v1462_v8 = vpop.f32.mrb[23].mxu0 }
 0x128   : > { %v4960_v4 = vpop.f32.mrb[20].mxu1 }
 0x129   : > { %v1672_v5 = vpop.f32.mrb[21].mxu1 }
 0x12a   : > { %1855 = vrot.lane.b32.xlu0 %v4938_v2, %s5647_s0  ;;  %v4961_v7 = vpop.f32.mrb[22].mxu1 }
 0x12b   : > { %1857 = vrot.lane.b32.xlu1 %v4939_v6, %s5647_s0  ;;  %v1675_v9 = vpop.f32.mrb[23].mxu1 }
 0x12c   : > { %v4942_v10 = vpop.f32.mrb[24].mxu0 }
 0x12d   : > { %v1475_v11 = vpop.f32.mrb[25].mxu0 }
 0x12e   : > { %1935 = vrot.lane.b32.xlu0 %v4960_v4, %s5648_s21  ;;  %v4943_v13 = vpop.f32.mrb[26].mxu0 }
 0x12f   : > { %1937 = vrot.lane.b32.xlu1 %v4961_v7, %s5648_s21  ;;  %v1478_v15 = vpop.f32.mrb[27].mxu0 }
 0x130   : > { %v4964_v12 = vpop.f32.mrb[24].mxu1 }
 0x131   : > { %v1688_v14 = vpop.f32.mrb[25].mxu1 }
 0x132   : > { %1851 = vrot.lane.b32.xlu0 %v1459_v3, %s5647_s0  ;;  %v4965_v16 = vpop.f32.mrb[26].mxu1 }
 0x133   : > { %1853 = vrot.lane.b32.xlu1 %v1462_v8, %s5647_s0  ;;  %v1691_v17 = vpop.f32.mrb[27].mxu1 }
 0x134   : > { %v4946_v18 = vpop.f32.mrb[28].mxu0 }
 0x135   : > { %v1491_v19 = vpop.f32.mrb[29].mxu0 }
 0x136   : > { %1931 = vrot.lane.b32.xlu0 %v1672_v5, %s5648_s21  ;;  %v4947_v21 = vpop.f32.mrb[30].mxu0 }
 0x137   : > { %1933 = vrot.lane.b32.xlu1 %v1675_v9, %s5648_s21  ;;  %v1494_v23 = vpop.f32.mrb[31].mxu0 }
 0x138   : > { %v4968_v20 = vpop.f32.mrb[28].mxu1 }
 0x139   : > { %v1704_v22 = vpop.f32.mrb[29].mxu1 }
 0x13a   : > { %1863 = vrot.lane.b32.xlu0 %v4942_v10, %s5647_s0  ;;  %v4969_v24 = vpop.f32.mrb[30].mxu1 }
 0x13b   : > { %1865 = vrot.lane.b32.xlu1 %v4943_v13, %s5647_s0  ;;  %v1707_v25 = vpop.f32.mrb[31].mxu1 }
 0x13c   : > { %v4950_v27 = vpop.f32.mrb[32].mxu0 }
 0x13d   : > { %v1507_v29 = vpop.f32.mrb[33].mxu0 }
 0x13e   : > { %1943 = vrot.lane.b32.xlu0 %v4964_v12, %s5648_s21  ;;  %v4951_v33 = vpop.f32.mrb[34].mxu0 }
 0x13f   : > { %1945 = vrot.lane.b32.xlu1 %v4965_v16, %s5648_s21  ;;  %v1510_v37 = vpop.f32.mrb[35].mxu0 }
 0x140   : > { %v4972_v31 = vpop.f32.mrb[32].mxu1 }
 0x141   : > { %v1720_v35 = vpop.f32.mrb[33].mxu1 }
 0x142   : > { %1859 = vrot.lane.b32.xlu0 %v1475_v11, %s5647_s0  ;;  %v4973_v39 = vpop.f32.mrb[34].mxu1 }
 0x143   : > { %1861 = vrot.lane.b32.xlu1 %v1478_v15, %s5647_s0  ;;  %v1723_v41 = vpop.f32.mrb[35].mxu1 }
 0x144   : > { %v4954_v43 = vpop.f32.mrb[36].mxu0 }
 0x145   : > { %v6095_v45 = vpop.f32.mrb[37].mxu0 }
 0x146   : > { %1939 = vrot.lane.b32.xlu0 %v1688_v14, %s5648_s21  ;;  %v4955_v49 = vpop.f32.mrb[38].mxu0 }
 0x147   : > { %1941 = vrot.lane.b32.xlu1 %v1691_v17, %s5648_s21  ;;  %v1526_v53 = vpop.f32.mrb[39].mxu0 }
 0x148   : > { %v4976_v47 = vpop.f32.mrb[36].mxu1 }
 0x149   : > { %v6097_v51 = vpop.f32.mrb[37].mxu1 }
 0x14a   : > { %1871 = vrot.lane.b32.xlu0 %v4946_v18, %s5647_s0  ;;  %v4977_v55 = vpop.f32.mrb[38].mxu1 }
 0x14b   : > { %1873 = vrot.lane.b32.xlu1 %v4947_v21, %s5647_s0  ;;  %v6101_v57 = vpop.f32.mrb[39].mxu1 }
 0x14c   : > { %v6105_v59 = vpop.f32.mrb[40].mxu0 }
 0x14d   : > { %7272 = vst [vmem:[#allocation12_spill] sm:$0xff] %v6105_v59  ;;  %v6109_v63 = vpop.f32.mrb[41].mxu0 }
 0x14e   : > { %1951 = vrot.lane.b32.xlu0 %v4968_v20, %s5648_s21  ;;  %7273 = vst [vmem:[#allocation13_spill] sm:$0xff] %v6109_v63  ;;  %v6113_v2 = vpop.f32.mrb[42].mxu0 }
 0x14f   : > { %1953 = vrot.lane.b32.xlu1 %v4969_v24, %s5648_s21  ;;  %7274 = vst [vmem:[#allocation14_spill] sm:$0xff] %v6113_v2  ;;  %v6118_v4 = vpop.f32.mrb[43].mxu0 }
 0x150   : > { %v6107_v61 = vpop.f32.mrb[40].mxu1  ;;  %7275 = vst [vmem:[#allocation15_spill] sm:$0xff] %v6118_v4 }
 0x151   : > { %v6111_v1 = vpop.f32.mrb[41].mxu1 }
 0x152   : > { %1867 = vrot.lane.b32.xlu0 %v1491_v19, %s5647_s0  ;;  %v6116_v3 = vpop.f32.mrb[42].mxu1 }
 0x153   : > { %1869 = vrot.lane.b32.xlu1 %v1494_v23, %s5647_s0  ;;  %v6121_v5 = vpop.f32.mrb[43].mxu1 }
 0x154   : > { %v6125_v6 = vpop.f32.mrb[44].mxu0 }
 0x155   : > { %7276 = vst [vmem:[#allocation16_spill] sm:$0xff] %v6125_v6  ;;  %v6129_v8 = vpop.f32.mrb[45].mxu0 }
 0x156   : > { %1947 = vrot.lane.b32.xlu0 %v1704_v22, %s5648_s21  ;;  %7277 = vst [vmem:[#allocation17_spill] sm:$0xff] %v6129_v8  ;;  %v6133_v10 = vpop.f32.mrb[46].mxu0 }
 0x157   : > { %1949 = vrot.lane.b32.xlu1 %v1707_v25, %s5648_s21  ;;  %7278 = vst [vmem:[#allocation18_spill] sm:$0xff] %v6133_v10  ;;  %v6138_v12 = vpop.f32.mrb[47].mxu0 }
 0x158   : > { %v6127_v7 = vpop.f32.mrb[44].mxu1  ;;  %7279 = vst [vmem:[#allocation19_spill] sm:$0xff] %v6138_v12 }
 0x159   : > { %v6131_v9 = vpop.f32.mrb[45].mxu1 }
 0x15a   : > { %1879 = vrot.lane.b32.xlu0 %v4950_v27, %s5647_s0  ;;  %v6136_v11 = vpop.f32.mrb[46].mxu1 }
 0x15b   : > { %1881 = vrot.lane.b32.xlu1 %v4951_v33, %s5647_s0  ;;  %v6141_v13 = vpop.f32.mrb[47].mxu1 }
 0x15c   : > { %v6145_v14 = vpop.f32.mrb[48].mxu0 }
 0x15d   : > { %7280 = vst [vmem:[#allocation20_spill] sm:$0xff] %v6145_v14  ;;  %v6149_v16 = vpop.f32.mrb[49].mxu0 }
 0x15e   : > { %1959 = vrot.lane.b32.xlu0 %v4972_v31, %s5648_s21  ;;  %7281 = vst [vmem:[#allocation21_spill] sm:$0xff] %v6149_v16  ;;  %v6153_v18 = vpop.f32.mrb[50].mxu0 }
 0x15f   : > { %1961 = vrot.lane.b32.xlu1 %v4973_v39, %s5648_s21  ;;  %7282 = vst [vmem:[#allocation22_spill] sm:$0xff] %v6153_v18  ;;  %v6158_v20 = vpop.f32.mrb[51].mxu0 }
 0x160   : > { %v6147_v15 = vpop.f32.mrb[48].mxu1  ;;  %7283 = vst [vmem:[#allocation23_spill] sm:$0xff] %v6158_v20 }
 0x161   : > { %v6151_v17 = vpop.f32.mrb[49].mxu1 }
 0x162   : > { %1875 = vrot.lane.b32.xlu0 %v1507_v29, %s5647_s0  ;;  %v6156_v19 = vpop.f32.mrb[50].mxu1 }
 0x163   : > { %1877 = vrot.lane.b32.xlu1 %v1510_v37, %s5647_s0  ;;  %v6161_v21 = vpop.f32.mrb[51].mxu1 }
 0x164   : > { %v6165_v22 = vpop.f32.mrb[52].mxu0 }
 0x165   : > { %7284 = vst [vmem:[#allocation24_spill] sm:$0xff] %v6165_v22  ;;  %v6169_v24 = vpop.f32.mrb[53].mxu0 }
 0x166   : > { %1955 = vrot.lane.b32.xlu0 %v1720_v35, %s5648_s21  ;;  %7285 = vst [vmem:[#allocation25_spill] sm:$0xff] %v6169_v24  ;;  %v6173_v27 = vpop.f32.mrb[54].mxu0 }
 0x167   : > { %1957 = vrot.lane.b32.xlu1 %v1723_v41, %s5648_s21  ;;  %7286 = vst [vmem:[#allocation26_spill] sm:$0xff] %v6173_v27  ;;  %v6178_v31 = vpop.f32.mrb[55].mxu0 }
 0x168   : > { %v6167_v23 = vpop.f32.mrb[52].mxu1  ;;  %7287 = vst [vmem:[#allocation27_spill] sm:$0xff] %v6178_v31 }
 0x169   : > { %v6171_v25 = vpop.f32.mrb[53].mxu1 }
 0x16a   : > { %1887 = vrot.lane.b32.xlu0 %v4954_v43, %s5647_s0  ;;  %v6176_v29 = vpop.f32.mrb[54].mxu1 }
 0x16b   : > { %1889 = vrot.lane.b32.xlu1 %v4955_v49, %s5647_s0  ;;  %v6181_v33 = vpop.f32.mrb[55].mxu1 }
 0x16c   : > { %v6185_v35 = vpop.f32.mrb[56].mxu0 }
 0x16d   : > { %7288 = vst [vmem:[#allocation28_spill] sm:$0xff] %v6185_v35  ;;  %v6189_v39 = vpop.f32.mrb[57].mxu0 }
 0x16e   : > { %1967 = vrot.lane.b32.xlu0 %v4976_v47, %s5648_s21  ;;  %7289 = vst [vmem:[#allocation29_spill] sm:$0xff] %v6189_v39  ;;  %v6193_v43 = vpop.f32.mrb[58].mxu0 }
 0x16f   : > { %1969 = vrot.lane.b32.xlu1 %v4977_v55, %s5648_s21  ;;  %7290 = vst [vmem:[#allocation30_spill] sm:$0xff] %v6193_v43  ;;  %v6199_v20 = vpop.f32.mrb[59].mxu0 }
 0x170   : > { %v6187_v37 = vpop.f32.mrb[56].mxu1  ;;  %7291 = vst [vmem:[#allocation31_spill] sm:$0xff] %v6199_v20 }
 0x171   : > { %v6191_v41 = vpop.f32.mrb[57].mxu1 }
 0x172   : > { %1883 = vrot.lane.b32.xlu0 %v6095_v45, %s5647_s0  ;;  %v6197_v49 = vpop.f32.mrb[58].mxu1 }
 0x173   : > { %v6201_v47 = vpop.permute.xlu1 %1775  ;;  %1885 = vrot.lane.b32.xlu1 %v1526_v53, %s5647_s0  ;;  %v6204_v55 = vpop.f32.mrb[59].mxu1 }
 0x174   : > { %v6206_v16 = vpop.permute.xlu0 %1771  ;;  %v6214_v45 = vpop.f32.mrb[60].mxu0 }
 0x175   : > { %v6218_v12 = vpop.f32.mrb[61].mxu0 }
 0x176   : > { %1963 = vrot.lane.b32.xlu0 %v6097_v51, %s5648_s21  ;;  %v6220_v8 = vpop.f32.mrb[62].mxu0 }
 0x177   : > { %v6210_v18 = vpop.permute.xlu1 %1777  ;;  %1965 = vrot.lane.b32.xlu1 %v6101_v57, %s5648_s21  ;;  %v6226_v10 = vpop.f32.mrb[63].mxu0 }
 0x178   : > { %v6216_v14 = vpop.permute.xlu0 %1773  ;;  %v6222_v53 = vpop.f32.mrb[60].mxu1 }
 0x179   : > { %v6228_v51 = vpop.f32.mrb[61].mxu1 }
 0x17a   : > { %3257 = vrot.lane.b32.xlu0 %v6107_v61, %s5646_s23  ;;  %v6232_v57 = vpop.f32.mrb[62].mxu1 }
 0x17b   : > { %3259 = vrot.lane.b32.xlu1 %v6116_v3, %s5646_s23  ;;  %v6236_v4 = vpop.f32.mrb[63].mxu1 }
 0x17c   : > { %v6234_v6 = vpop.permute.xlu0 %1783  ;;  %v6244_v61 = vpop.f32.mrb[64].mxu0 }
 0x17d   : > { %v6238_v63 = vpop.permute.xlu1 %1785  ;;  %v6248_v59 = vpop.f32.mrb[65].mxu0 }
 0x17e   : > { %3253 = vrot.lane.b32.xlu0 %v6111_v1, %s5646_s23  ;;  %v6252_v20 = vpop.f32.mrb[66].mxu0 }
 0x17f   : > { %3255 = vrot.lane.b32.xlu1 %v6121_v5, %s5646_s23  ;;  %v6256_v39 = vpop.f32.mrb[67].mxu0 }
 0x180   : > { %v6246_v2 = vpop.permute.xlu0 %1779  ;;  %v6258_v43 = vpop.f32.mrb[64].mxu1 }
 0x181   : > { %v6250_v3 = vpop.permute.xlu1 %1781  ;;  %v6262_v1 = vpop.f32.mrb[65].mxu1 }
 0x182   : > { %3265 = vrot.lane.b32.xlu0 %v6127_v7, %s5646_s23  ;;  %v6266_v35 = vpop.f32.mrb[66].mxu1 }
 0x183   : > { %3267 = vrot.lane.b32.xlu1 %v6136_v11, %s5646_s23  ;;  %v6270_v24 = vpop.f32.mrb[67].mxu1 }
 0x184   : > { %v6264_v5 = vpop.permute.xlu0 %1791  ;;  %v6276_v7 = vpop.f32.mrb[68].mxu0 }
 0x185   : > { %v6268_v31 = vpop.permute.xlu1 %1793  ;;  %v6280_v11 = vpop.f32.mrb[69].mxu0 }
 0x186   : > { %3261 = vrot.lane.b32.xlu0 %v6131_v9, %s5646_s23  ;;  %v6284_v0 = vpop.f32.mrb[70].mxu0 }
 0x187   : > { %3263 = vrot.lane.b32.xlu1 %v6141_v13, %s5646_s23  ;;  %v6288_v60 = vpop.f32.mrb[71].mxu0 }
 0x188   : > { %v6278_v27 = vpop.permute.xlu0 %1787  ;;  %v6290_v62 = vpop.f32.mrb[68].mxu1 }
 0x189   : > { %v6282_v22 = vpop.permute.xlu1 %1789  ;;  %v6294_v9 = vpop.f32.mrb[69].mxu1 }
 0x18a   : > { %3273 = vrot.lane.b32.xlu0 %v6147_v15, %s5646_s23  ;;  %v6298_v58 = vpop.f32.mrb[70].mxu1 }
 0x18b   : > { %3275 = vrot.lane.b32.xlu1 %v6156_v19, %s5646_s23  ;;  %v6302_v52 = vpop.f32.mrb[71].mxu1 }
 0x18c   : > { %v6296_v13 = vpop.permute.xlu0 %1799  ;;  %7294 = vst [vmem:[#allocation34_spill] sm:$0xff] %v6302_v52  ;;  %v6308_v15 = vpop.f32.mrb[72].mxu0 }
 0x18d   : > { %7292 = vst [vmem:[#allocation32_spill] sm:$0xff] %v6296_v13  ;;  %v6300_v56 = vpop.permute.xlu1 %1801  ;;  %v6312_v19 = vpop.f32.mrb[73].mxu0 }
 0x18e   : > { %7293 = vst [vmem:[#allocation33_spill] sm:$0xff] %v6300_v56  ;;  %3269 = vrot.lane.b32.xlu0 %v6151_v17, %s5646_s23  ;;  %7296 = vst [vmem:[#allocation36_spill] sm:$0xff] %v6312_v19  ;;  %v6316_v13 = vpop.f32.mrb[74].mxu0 }
 0x18f   : > { %3271 = vrot.lane.b32.xlu1 %v6161_v21, %s5646_s23  ;;  %v6320_v56 = vpop.f32.mrb[75].mxu0 }
 0x190   : > { %v6310_v54 = vpop.permute.xlu0 %1795  ;;  %7298 = vst [vmem:[#allocation38_spill] sm:$0xff] %v6320_v56  ;;  %v6322_v52 = vpop.f32.mrb[72].mxu1 }
 0x191   : > { %7295 = vst [vmem:[#allocation35_spill] sm:$0xff] %v6310_v54  ;;  %v6314_v50 = vpop.permute.xlu1 %1797  ;;  %v6326_v17 = vpop.f32.mrb[73].mxu1 }
 0x192   : > { %7297 = vst [vmem:[#allocation37_spill] sm:$0xff] %v6314_v50  ;;  %3281 = vrot.lane.b32.xlu0 %v6167_v23, %s5646_s23  ;;  %7299 = vst [vmem:[#allocation39_spill] sm:$0xff] %v6326_v17  ;;  %v6330_v54 = vpop.f32.mrb[74].mxu1 }
 0x193   : > { %3283 = vrot.lane.b32.xlu1 %v6176_v29, %s5646_s23  ;;  %v6334_v50 = vpop.f32.mrb[75].mxu1 }
 0x194   : > { %v6328_v21 = vpop.permute.xlu0 %1807  ;;  %7302 = vst [vmem:[#allocation42_spill] sm:$0xff] %v6334_v50  ;;  %v6340_v23 = vpop.f32.mrb[76].mxu0 }
 0x195   : > { %7300 = vst [vmem:[#allocation40_spill] sm:$0xff] %v6328_v21  ;;  %v6332_v19 = vpop.permute.xlu1 %1809  ;;  %v6344_v29 = vpop.f32.mrb[77].mxu0 }
 0x196   : > { %7301 = vst [vmem:[#allocation41_spill] sm:$0xff] %v6332_v19  ;;  %3277 = vrot.lane.b32.xlu0 %v6171_v25, %s5646_s23  ;;  %7304 = vst [vmem:[#allocation44_spill] sm:$0xff] %v6344_v29  ;;  %v6348_v21 = vpop.f32.mrb[78].mxu0 }
 0x197   : > { %3279 = vrot.lane.b32.xlu1 %v6181_v33, %s5646_s23  ;;  %v6352_v19 = vpop.f32.mrb[79].mxu0 }
 0x198   : > { %v6342_v56 = vpop.permute.xlu0 %1803  ;;  %7306 = vst [vmem:[#allocation46_spill] sm:$0xff] %v6352_v19  ;;  %v6354_v50 = vpop.f32.mrb[76].mxu1 }
 0x199   : > { %7303 = vst [vmem:[#allocation43_spill] sm:$0xff] %v6342_v56  ;;  %v6346_v17 = vpop.permute.xlu1 %1805  ;;  %7307 = vst [vmem:[#allocation47_spill] sm:$0xff] %v6354_v50  ;;  %v6358_v25 = vpop.f32.mrb[77].mxu1 }
 0x19a   : > { %7305 = vst [vmem:[#allocation45_spill] sm:$0xff] %v6346_v17  ;;  %3289 = vrot.lane.b32.xlu0 %v6187_v37, %s5646_s23  ;;  %7308 = vst [vmem:[#allocation48_spill] sm:$0xff] %v6358_v25  ;;  %v6360_v56 = vpop.f32.mrb[78].mxu1  ;;  %v1994_v37 = vsel %vm1991_vm4, %v6019_v26, %v6201_v47  ;;  %v6384_v26 = vld [vmem:[%s7236_s13] ss:$0 sm:$0xff] }
 0x19b   : > { %3291 = vrot.lane.b32.xlu1 %v6197_v49, %s5646_s23  ;;  %7309 = vst [vmem:[#allocation49_spill] sm:$0xff] %v6360_v56  ;;  %v6362_v29 = vpop.f32.mrb[79].mxu1  ;;  %v6374_v49 = vld [vmem:[%s7235_s12] ss:$0 sm:$0xff]  ;;  %v1995_v56 = vsel %vm1991_vm4, %v6024_v30, %v6210_v18 }
 0x19c   : > { %v1856_v33 = vpop.permute.xlu0 %1855  ;;  %7310 = vst [vmem:[#allocation50_spill] sm:$0xff] %v6362_v29 }
 0x19d   : > { %v1858_v17 = vpop.permute.xlu1 %1857  ;;  %v2015_v50 = vsel %vm2012_vm5, %v1994_v37, %v1856_v33 }
 0x19e   : > { %3285 = vrot.lane.b32.xlu0 %v6191_v41, %s5646_s23  ;;  %v2016_v29 = vsel %vm2012_vm5, %v1995_v56, %v1858_v17 }
 0x19f   : > { %3287 = vrot.lane.b32.xlu1 %v6204_v55, %s5646_s23 }
 0x1a0   : > { %v1936_v41 = vpop.permute.xlu0 %1935 }
 0x1a1   : > { %v2036_v47 = vsel %vm2033_vm6, %v2015_v50, %v1936_v41  ;;  %v1938_v55 = vpop.permute.xlu1 %1937 }
 0x1a2   : > { %v2063_v25 = vmul.f32 %v6374_v49, %v2036_v47  ;;  %v2037_v19 = vsel %vm2033_vm6, %v2016_v29, %v1938_v55  ;;  %3337 = vrot.lane.b32.xlu0 %v6214_v45, %s5647_s0  ;;  %v1992_v45 = vsel %vm1991_vm4, %v6021_v28, %v6206_v16 }
 0x1a3   : > { %v2064_v30 = vmul.f32 %v6374_v49, %v2037_v19  ;;  %3339 = vrot.lane.b32.xlu1 %v6220_v8, %s5647_s0  ;;  %v1993_v8 = vsel %vm1991_vm4, %v6027_v32, %v6216_v14 }
 0x1a4   : > { %v6395_v56 = vadd.f32 %v6384_v26, %v2063_v25  ;;  %v1852_v18 = vpop.permute.xlu0 %1851 }
 0x1a5   : > { %v6398_v17 = vadd.f32 %v6384_v26, %v2064_v30  ;;  %v1854_v50 = vpop.permute.xlu1 %1853  ;;  %v2013_v29 = vsel %vm2012_vm5, %v1992_v45, %v1852_v18 }
 0x1a6   : > { %v4570_v33 = vmul.f32 -1.442695, %v6395_v56  ;;  %3417 = vrot.lane.b32.xlu0 %v6222_v53, %s5648_s21  ;;  %v2014_v53 = vsel %vm2012_vm5, %v1993_v8, %v1854_v50 }
 0x1a7   : > { %v4571_v19 = vmul.f32 -1.442695, %v6398_v17  ;;  %3419 = vrot.lane.b32.xlu1 %v6232_v57, %s5648_s21 }
 0x1a8   : > { %5326 = vpow2.f32 %v4570_v33  ;;  %v1932_v25 = vpop.permute.xlu0 %1931 }
 0x1a9   : > { %5328 = vpow2.f32 %v4571_v19  ;;  %v2034_v37 = vsel %vm2033_vm6, %v2013_v29, %v1932_v25  ;;  %v1934_v41 = vpop.permute.xlu1 %1933 }
 0x1aa   : > { %v2061_v28 = vmul.f32 %v6374_v49, %v2034_v37  ;;  %v2035_v16 = vsel %vm2033_vm6, %v2014_v53, %v1934_v41  ;;  %3333 = vrot.lane.b32.xlu0 %v6218_v12, %s5647_s0  ;;  %v1998_v12 = vsel %vm1991_vm4, %v6031_v34, %v6234_v6 }
 0x1ab   : > { %v2062_v57 = vmul.f32 %v6374_v49, %v2035_v16  ;;  %3335 = vrot.lane.b32.xlu1 %v6226_v10, %s5647_s0  ;;  %v1999_v10 = vsel %vm1991_vm4, %v6035_v38, %v6238_v63  ;;  %v1997_v16 = vsel %vm1991_vm4, %v6038_v40, %v6250_v3 }
 0x1ac   : > { %v6423_v32 = vadd.f32 %v6384_v26, %v2061_v28  ;;  %v1864_v14 = vpop.permute.xlu0 %1863 }
 0x1ad   : > { %v6426_v47 = vadd.f32 %v6384_v26, %v2062_v57  ;;  %v1866_v55 = vpop.permute.xlu1 %1865  ;;  %v2019_v50 = vsel %vm2012_vm5, %v1998_v12, %v1864_v14 }
 0x1ae   : > { %v4568_v30 = vmul.f32 -1.442695, %v6423_v32  ;;  %3413 = vrot.lane.b32.xlu0 %v6228_v51, %s5648_s21  ;;  %v2020_v51 = vsel %vm2012_vm5, %v1999_v10, %v1866_v55 }
 0x1af   : > { %v4569_v18 = vmul.f32 -1.442695, %v6426_v47  ;;  %3415 = vrot.lane.b32.xlu1 %v6236_v4, %s5648_s21 }
 0x1b0   : > { %5330 = vpow2.f32 %v4568_v30  ;;  %v1944_v33 = vpop.permute.xlu0 %1943 }
 0x1b1   : > { %5332 = vpow2.f32 %v4569_v18  ;;  %v2040_v45 = vsel %vm2033_vm6, %v2019_v50, %v1944_v33  ;;  %v1946_v19 = vpop.permute.xlu1 %1945 }
 0x1b2   : > { %v5327_v34 = vpop.eup %5326  ;;  %v2067_v6 = vmul.f32 %v6374_v49, %v2040_v45  ;;  %v2041_v8 = vsel %vm2033_vm6, %v2020_v51, %v1946_v19  ;;  %3345 = vrot.lane.b32.xlu0 %v6244_v61, %s5647_s0 }
 0x1b3   : > { %v5329_v4 = vpop.eup %5328  ;;  %v2170_v38 = vadd.f32 1.0, %v5327_v34  ;;  %v2068_v63 = vmul.f32 %v6374_v49, %v2041_v8  ;;  %3347 = vrot.lane.b32.xlu1 %v6252_v20, %s5647_s0  ;;  %v1996_v20 = vsel %vm1991_vm4, %v6033_v36, %v6246_v2 }
 0x1b4   : > { %v2171_v29 = vadd.f32 1.0, %v5329_v4  ;;  %v6451_v25 = vadd.f32 %v6384_v26, %v2067_v6  ;;  %v1860_v53 = vpop.permute.xlu0 %1859  ;;  %v2003_v6 = vsel %vm1991_vm4, %v6047_v46, %v6268_v31 }
 0x1b5   : > { %5334 = vrcp.f32 %v2170_v38  ;;  %v6454_v37 = vadd.f32 %v6384_v26, %v2068_v63  ;;  %v1862_v41 = vpop.permute.xlu1 %1861  ;;  %v2017_v57 = vsel %vm2012_vm5, %v1996_v20, %v1860_v53 }
 0x1b6   : > { %5336 = vrcp.f32 %v2171_v29  ;;  %v4574_v61 = vmul.f32 -1.442695, %v6451_v25  ;;  %3425 = vrot.lane.b32.xlu0 %v6258_v43, %s5648_s21  ;;  %v2018_v43 = vsel %vm2012_vm5, %v1997_v16, %v1862_v41 }
 0x1b7   : > { %v4575_v28 = vmul.f32 -1.442695, %v6454_v37  ;;  %3427 = vrot.lane.b32.xlu1 %v6266_v35, %s5648_s21 }
 0x1b8   : > { %5338 = vpow2.f32 %v4574_v61  ;;  %v1940_v14 = vpop.permute.xlu0 %1939 }
 0x1b9   : > { %5340 = vpow2.f32 %v4575_v28  ;;  %v2038_v55 = vsel %vm2033_vm6, %v2017_v57, %v1940_v14  ;;  %v1942_v30 = vpop.permute.xlu1 %1941  ;;  %v2000_v14 = vsel %vm1991_vm4, %v6045_v44, %v6278_v27 }
 0x1ba   : > { %v5331_v36 = vpop.eup %5330  ;;  %v2065_v2 = vmul.f32 %v6374_v49, %v2038_v55  ;;  %v2039_v35 = vsel %vm2033_vm6, %v2018_v43, %v1942_v30  ;;  %3341 = vrot.lane.b32.xlu0 %v6248_v59, %s5647_s0  ;;  %v2001_v30 = vsel %vm1991_vm4, %v6050_v48, %v6282_v22 }
 0x1bb   : > { %v5333_v40 = vpop.eup %5332  ;;  %v2168_v3 = vadd.f32 1.0, %v5331_v36  ;;  %v2066_v12 = vmul.f32 %v6374_v49, %v2039_v35  ;;  %3343 = vrot.lane.b32.xlu1 %v6256_v39, %s5647_s0  ;;  %v2002_v39 = vsel %vm1991_vm4, %v6043_v42, %v6264_v5 }
 0x1bc   : > { %v2169_v18 = vadd.f32 1.0, %v5333_v40  ;;  %v6480_v10 = vadd.f32 %v6384_v26, %v2065_v2  ;;  %v1872_v50 = vpop.permute.xlu0 %1871 }
 0x1bd   : > { %5342 = vrcp.f32 %v2168_v3  ;;  %v6485_v33 = vadd.f32 %v6384_v26, %v2066_v12  ;;  %v1874_v51 = vpop.permute.xlu1 %1873 }
 0x1be   : > { %5344 = vrcp.f32 %v2169_v18  ;;  %v4572_v59 = vmul.f32 -1.442695, %v6480_v10  ;;  %3421 = vrot.lane.b32.xlu0 %v6262_v1, %s5648_s21  ;;  %v2023_v1 = vsel %vm2012_vm5, %v2002_v39, %v1872_v50  ;;  %v2024_v5 = vsel %vm2012_vm5, %v2003_v6, %v1874_v51 }
 0x1bf   : > { %v5335_v45 = vpop.eup %5334  ;;  %v4573_v19 = vmul.f32 -1.442695, %v6485_v33  ;;  %3423 = vrot.lane.b32.xlu1 %v6270_v24, %s5648_s21 }
 0x1c0   : > { %v5337_v34 = vpop.eup %5336  ;;  %v2230_v8 = vmul.f32 %v5335_v45, %v6395_v56  ;;  %5346 = vpow2.f32 %v4572_v59  ;;  %v1952_v4 = vpop.permute.xlu0 %1951 }
 0x1c1   : > { %v2231_v42 = vmul.f32 %v5337_v34, %v6398_v17  ;;  %5348 = vpow2.f32 %v4573_v19  ;;  %v2044_v38 = vsel %vm2033_vm6, %v2023_v1, %v1952_v4  ;;  %v1954_v24 = vpop.permute.xlu1 %1953  ;;  %v7311_v19 = vld [vmem:[#allocation32_spill] sm:$0xff]  ;;  %v7313_v1 = vld [vmem:[#allocation34_spill] sm:$0xff] }
 0x1c2   : > { %v5339_v63 = vpop.eup %5338  ;;  %v4758_v29 = vpack.c.bf16 %v2230_v8, %v2230_v8  ;;  %v2071_v53 = vmul.f32 %v6374_v49, %v2044_v38  ;;  %v2045_v46 = vsel %vm2033_vm6, %v2024_v5, %v1954_v24  ;;  %3353 = vrot.lane.b32.xlu0 %v6276_v7, %s5647_s0  ;;  %v7312_v34 = vld [vmem:[#allocation4_spill] sm:$0xff]  ;;  %v7315_v5 = vld [vmem:[#allocation6_spill] sm:$0xff] }
 0x1c3   : > { %v5341_v31 = vpop.eup %5340  ;;  %v4759_v56 = vpack.c.bf16 %v2231_v42, %v2231_v42  ;;  %v2174_v41 = vadd.f32 1.0, %v5339_v63  ;;  %v2072_v17 = vmul.f32 %v6374_v49, %v2045_v46  ;;  %3355 = vrot.lane.b32.xlu1 %v6284_v0, %s5647_s0  ;;  %v2006_v6 = vsel %vm1991_vm4, %v7312_v34, %v7311_v19  ;;  %v7314_v42 = vld [vmem:[#allocation33_spill] sm:$0xff] }
 0x1c4   : > { %2331 = vst.msk [vmem:[%s6512_s8 + $0x8] sm:$0xf] %vm2328_vm7, %v4758_v29  ;;  %v2175_v61 = vadd.f32 1.0, %v5341_v31  ;;  %v6517_v20 = vadd.f32 %v6384_v26, %v2071_v53  ;;  %v1868_v28 = vpop.permute.xlu0 %1867  ;;  %v2007_v38 = vsel %vm1991_vm4, %v7315_v5, %v7314_v42  ;;  %v7322_v42 = vld [vmem:[#allocation39_spill] sm:$0xff] }
 0x1c5   : > { %2332 = vst.msk [vmem:[%s6512_s8 + $0xc] sm:$0xf] %vm2328_vm7, %v4759_v56  ;;  %5350 = vrcp.f32 %v2174_v41  ;;  %v6522_v7 = vadd.f32 %v6384_v26, %v2072_v17  ;;  %v1870_v16 = vpop.permute.xlu1 %1869 }
 0x1c6   : > { %5352 = vrcp.f32 %v2175_v61  ;;  %v4578_v0 = vmul.f32 -1.442695, %v6517_v20  ;;  %3433 = vrot.lane.b32.xlu0 %v6290_v62, %s5648_s21  ;;  %v2021_v62 = vsel %vm2012_vm5, %v2000_v14, %v1868_v28  ;;  %v2022_v44 = vsel %vm2012_vm5, %v2001_v30, %v1870_v16  ;;  %v7316_v30 = vld [vmem:[#allocation35_spill] sm:$0xff] }
 0x1c7   : > { %v5343_v57 = vpop.eup %5342  ;;  %v4579_v43 = vmul.f32 -1.442695, %v6522_v7  ;;  %3435 = vrot.lane.b32.xlu1 %v6298_v58, %s5648_s21 }
 0x1c8   : > { %v5345_v55 = vpop.eup %5344  ;;  %v2228_v36 = vmul.f32 %v5343_v57, %v6423_v32  ;;  %5354 = vpow2.f32 %v4578_v0  ;;  %v1948_v2 = vpop.permute.xlu0 %1947 }
 0x1c9   : > { %v2229_v35 = vmul.f32 %v5345_v55, %v6426_v47  ;;  %5356 = vpow2.f32 %v4579_v43  ;;  %v2042_v27 = vsel %vm2033_vm6, %v2021_v62, %v1948_v2  ;;  %v1950_v58 = vpop.permute.xlu1 %1949 }
 0x1ca   : > { %v5347_v40 = vpop.eup %5346  ;;  %v4756_v3 = vpack.c.bf16 %v2228_v36, %v2228_v36  ;;  %v2069_v48 = vmul.f32 %v6374_v49, %v2042_v27  ;;  %v2043_v22 = vsel %vm2033_vm6, %v2022_v44, %v1950_v58  ;;  %3349 = vrot.lane.b32.xlu0 %v6280_v11, %s5647_s0  ;;  %v7317_v36 = vld [vmem:[#allocation5_spill] sm:$0xff]  ;;  %v7319_v27 = vld [vmem:[#allocation7_spill] sm:$0xff] }
 0x1cb   : > { %v5349_v32 = vpop.eup %5348  ;;  %v4757_v12 = vpack.c.bf16 %v2229_v35, %v2229_v35  ;;  %v2172_v18 = vadd.f32 1.0, %v5347_v40  ;;  %v2070_v47 = vmul.f32 %v6374_v49, %v2043_v22  ;;  %3351 = vrot.lane.b32.xlu1 %v6288_v60, %s5647_s0  ;;  %v2004_v62 = vsel %vm1991_vm4, %v7317_v36, %v7316_v30  ;;  %v7318_v44 = vld [vmem:[#allocation37_spill] sm:$0xff] }
 0x1cc   : > { %2329 = vst.msk [vmem:[%s6512_s8] sm:$0xf] %vm2328_vm7, %v4756_v3  ;;  %v2173_v50 = vadd.f32 1.0, %v5349_v32  ;;  %v6551_v51 = vadd.f32 %v6384_v26, %v2069_v48  ;;  %v1880_v59 = vpop.permute.xlu0 %1879  ;;  %v2005_v58 = vsel %vm1991_vm4, %v7319_v27, %v7318_v44  ;;  %v7328_v27 = vld [vmem:[#allocation44_spill] sm:$0xff] }
 0x1cd   : > { %2330 = vst.msk [vmem:[%s6512_s8 + $0x4] sm:$0xf] %vm2328_vm7, %v4757_v12  ;;  %5358 = vrcp.f32 %v2172_v18  ;;  %v6556_v11 = vadd.f32 %v6384_v26, %v2070_v47  ;;  %v1882_v45 = vpop.permute.xlu1 %1881 }
 0x1ce   : > { %5360 = vrcp.f32 %v2173_v50  ;;  %v4576_v39 = vmul.f32 -1.442695, %v6551_v51  ;;  %3429 = vrot.lane.b32.xlu0 %v6294_v9, %s5648_s21  ;;  %v2027_v9 = vsel %vm2012_vm5, %v2006_v6, %v1880_v59  ;;  %v2028_v53 = vsel %vm2012_vm5, %v2007_v38, %v1882_v45  ;;  %v7320_v50 = vld [vmem:[#allocation36_spill] sm:$0xff] }
 0x1cf   : > { %v5351_v60 = vpop.eup %5350  ;;  %v4577_v8 = vmul.f32 -1.442695, %v6556_v11  ;;  %3431 = vrot.lane.b32.xlu1 %v7313_v1, %s5648_s21  ;;  %v7323_v38 = vld [vmem:[#allocation40_spill] sm:$0xff] }
 0x1d0   : > { %v5353_v4 = vpop.eup %5352  ;;  %v2234_v24 = vmul.f32 %v5351_v60, %v6451_v25  ;;  %5362 = vpow2.f32 %v4576_v39  ;;  %v1960_v63 = vpop.permute.xlu0 %1959  ;;  %v7321_v60 = vld [vmem:[#allocation38_spill] sm:$0xff] }
 0x1d1   : > { %v2235_v29 = vmul.f32 %v5353_v4, %v6454_v37  ;;  %5364 = vpow2.f32 %v4577_v8  ;;  %v2048_v46 = vsel %vm2033_vm6, %v2027_v9, %v1960_v63  ;;  %v1962_v31 = vpop.permute.xlu1 %1961 }
 0x1d2   : > { %v5355_v56 = vpop.eup %5354  ;;  %v4762_v41 = vpack.c.bf16 %v2234_v24, %v2234_v24  ;;  %v2075_v17 = vmul.f32 %v6374_v49, %v2048_v46  ;;  %v2049_v25 = vsel %vm2033_vm6, %v2028_v53, %v1962_v31  ;;  %3361 = vrot.lane.b32.xlu0 %v6308_v15, %s5647_s0  ;;  %v7324_v24 = vld [vmem:[#allocation8_spill] sm:$0xff]  ;;  %v7326_v46 = vld [vmem:[#allocation41_spill] sm:$0xff]  ;;  %v7327_v31 = vld [vmem:[#allocation10_spill] sm:$0xff] }
 0x1d3   : > { %v5357_v61 = vpop.eup %5356  ;;  %v4763_v28 = vpack.c.bf16 %v2235_v29, %v2235_v29  ;;  %v2178_v16 = vadd.f32 1.0, %v5355_v56  ;;  %v2076_v37 = vmul.f32 %v6374_v49, %v2049_v25  ;;  %3363 = vrot.lane.b32.xlu1 %v6316_v13, %s5647_s0  ;;  %v2010_v9 = vsel %vm1991_vm4, %v7324_v24, %v7323_v38  ;;  %v7325_v29 = vld [vmem:[#allocation42_spill] sm:$0xff] }
 0x1d4   : > { %2335 = vst.msk [vmem:[%s6512_s8 + $0x18] sm:$0xf] %vm2328_vm7, %v4762_v41  ;;  %v2179_v0 = vadd.f32 1.0, %v5357_v61  ;;  %v6585_v57 = vadd.f32 %v6384_v26, %v2075_v17  ;;  %v1876_v14 = vpop.permute.xlu0 %1875  ;;  %v2011_v56 = vsel %vm1991_vm4, %v7327_v31, %v7326_v46 }
 0x1d5   : > { %2336 = vst.msk [vmem:[%s6512_s8 + $0x1c] sm:$0xf] %vm2328_vm7, %v4763_v28  ;;  %5366 = vrcp.f32 %v2178_v16  ;;  %v6590_v15 = vadd.f32 %v6384_v26, %v2076_v37  ;;  %v1878_v43 = vpop.permute.xlu1 %1877 }
 0x1d6   : > { %5368 = vrcp.f32 %v2179_v0  ;;  %v4582_v55 = vmul.f32 -1.442695, %v6585_v57  ;;  %3441 = vrot.lane.b32.xlu0 %v6322_v52, %s5648_s21  ;;  %v2025_v52 = vsel %vm2012_vm5, %v2004_v62, %v1876_v14  ;;  %v2026_v22 = vsel %vm2012_vm5, %v2005_v58, %v1878_v43  ;;  %v7329_v58 = vld [vmem:[#allocation43_spill] sm:$0xff] }
 0x1d7   : > { %v5359_v13 = vpop.eup %5358  ;;  %v4583_v2 = vmul.f32 -1.442695, %v6590_v15  ;;  %3443 = vrot.lane.b32.xlu1 %v6330_v54, %s5648_s21 }
 0x1d8   : > { %v5361_v35 = vpop.eup %5360  ;;  %v2232_v40 = vmul.f32 %v5359_v13, %v6480_v10  ;;  %5370 = vpow2.f32 %v4582_v55  ;;  %v1956_v3 = vpop.permute.xlu0 %1955 }
 0x1d9   : > { %v2233_v48 = vmul.f32 %v5361_v35, %v6485_v33  ;;  %5372 = vpow2.f32 %v4583_v2  ;;  %v2046_v32 = vsel %vm2033_vm6, %v2025_v52, %v1956_v3  ;;  %v1958_v54 = vpop.permute.xlu1 %1957 }
 0x1da   : > { %v5363_v12 = vpop.eup %5362  ;;  %v4760_v18 = vpack.c.bf16 %v2232_v40, %v2232_v40  ;;  %v2073_v47 = vmul.f32 %v6374_v49, %v2046_v32  ;;  %v2047_v10 = vsel %vm2033_vm6, %v2026_v22, %v1958_v54  ;;  %3357 = vrot.lane.b32.xlu0 %v7320_v50, %s5647_s0  ;;  %v7330_v40 = vld [vmem:[#allocation9_spill] sm:$0xff]  ;;  %v7333_v54 = vld [vmem:[#allocation11_spill] sm:$0xff] }
 0x1db   : > { %v5365_v59 = vpop.eup %5364  ;;  %v4761_v45 = vpack.c.bf16 %v2233_v48, %v2233_v48  ;;  %v2176_v39 = vadd.f32 1.0, %v5363_v12  ;;  %v2074_v33 = vmul.f32 %v6374_v49, %v2047_v10  ;;  %3359 = vrot.lane.b32.xlu1 %v7321_v60, %s5647_s0  ;;  %v2008_v52 = vsel %vm1991_vm4, %v7330_v40, %v7329_v58  ;;  %v7331_v48 = vld [vmem:[#allocation46_spill] sm:$0xff]  ;;  %v7332_v32 = vld [vmem:[#allocation45_spill] sm:$0xff] }
 0x1dc   : > { %2333 = vst.msk [vmem:[%s6512_s8 + $0x10] sm:$0xf] %vm2328_vm7, %v4760_v18  ;;  %v2177_v19 = vadd.f32 1.0, %v5365_v59  ;;  %v6619_v34 = vadd.f32 %v6384_v26, %v2073_v47  ;;  %v1888_v6 = vpop.permute.xlu0 %1887  ;;  %v2009_v12 = vsel %vm1991_vm4, %v7333_v54, %v7332_v32 }
 0x1dd   : > { %2334 = vst.msk [vmem:[%s6512_s8 + $0x14] sm:$0xf] %vm2328_vm7, %v4761_v45  ;;  %5374 = vrcp.f32 %v2176_v39  ;;  %v6624_v8 = vadd.f32 %v6384_v26, %v2074_v33  ;;  %v1890_v1 = vpop.permute.xlu1 %1889  ;;  %v2031_v17 = vsel %vm2012_vm5, %v2010_v9, %v1888_v6  ;;  %v7334_v6 = vld [vmem:[#allocation48_spill] sm:$0xff] }
 0x1de   : > { %5376 = vrcp.f32 %v2177_v19  ;;  %v4580_v4 = vmul.f32 -1.442695, %v6619_v34  ;;  %3437 = vrot.lane.b32.xlu0 %v7322_v42, %s5648_s21  ;;  %v2032_v28 = vsel %vm2012_vm5, %v2011_v56, %v1890_v1  ;;  %v7337_v56 = vld [vmem:[#allocation49_spill] sm:$0xff] }
 0x1df   : > { %v5367_v5 = vpop.eup %5366  ;;  %v4581_v63 = vmul.f32 -1.442695, %v6624_v8  ;;  %3439 = vrot.lane.b32.xlu1 %v7325_v29, %s5648_s21 }
 0x1e0   : > { %v5369_v53 = vpop.eup %5368  ;;  %v2238_v41 = vmul.f32 %v5367_v5, %v6517_v20  ;;  %5378 = vpow2.f32 %v4580_v4  ;;  %v1968_v25 = vpop.permute.xlu0 %1967  ;;  %v7335_v5 = vld [vmem:[#allocation50_spill] sm:$0xff] }
 0x1e1   : > { %v2239_v61 = vmul.f32 %v5369_v53, %v6522_v7  ;;  %5380 = vpow2.f32 %v4581_v63  ;;  %v2052_v16 = vsel %vm2033_vm6, %v2031_v17, %v1968_v25  ;;  %v1970_v37 = vpop.permute.xlu1 %1969  ;;  %v7336_v53 = vld [vmem:[#allocation47_spill] sm:$0xff] }
 0x1e2   : > { %v5371_v0 = vpop.eup %5370  ;;  %v4766_v14 = vpack.c.bf16 %v2238_v41, %v2238_v41  ;;  %v2079_v43 = vmul.f32 %v6374_v49, %v2052_v16  ;;  %v2053_v20 = vsel %vm2033_vm6, %v2032_v28, %v1970_v37  ;;  %3369 = vrot.lane.b32.xlu0 %v6340_v23, %s5647_s0 }
 0x1e3   : > { %v5373_v55 = vpop.eup %5372  ;;  %v4767_v13 = vpack.c.bf16 %v2239_v61, %v2239_v61  ;;  %v2182_v30 = vadd.f32 1.0, %v5371_v0  ;;  %v2080_v7 = vmul.f32 %v6374_v49, %v2053_v20  ;;  %3371 = vrot.lane.b32.xlu1 %v6348_v21, %s5647_s0 }
 0x1e4   : > { %2339 = vst.msk [vmem:[%s6512_s8 + $0x28] sm:$0xf] %vm2328_vm7, %v4766_v14  ;;  %v2183_v36 = vadd.f32 1.0, %v5373_v55  ;;  %v6653_v62 = vadd.f32 %v6384_v26, %v2079_v43  ;;  %v1884_v2 = vpop.permute.xlu0 %1883 }
 0x1e5   : > { %2340 = vst.msk [vmem:[%s6512_s8 + $0x2c] sm:$0xf] %vm2328_vm7, %v4767_v13  ;;  %5382 = vrcp.f32 %v2182_v30  ;;  %v6658_v23 = vadd.f32 %v6384_v26, %v2080_v7  ;;  %v1886_v35 = vpop.permute.xlu1 %1885  ;;  %v2029_v47 = vsel %vm2012_vm5, %v2008_v52, %v1884_v2 }
 0x1e6   : > { %5384 = vrcp.f32 %v2183_v36  ;;  %v4586_v44 = vmul.f32 -1.442695, %v6653_v62  ;;  %3365 = vrot.lane.b32.xlu0 %v7328_v27, %s5647_s0  ;;  %v2030_v59 = vsel %vm2012_vm5, %v2009_v12, %v1886_v35 }
 0x1e7   : > { %v5375_v21 = vpop.eup %5374  ;;  %v4587_v3 = vmul.f32 -1.442695, %v6658_v23  ;;  %3367 = vrot.lane.b32.xlu1 %v7331_v48, %s5647_s0 }
 0x1e8   : > { %v5377_v22 = vpop.eup %5376  ;;  %v2236_v18 = vmul.f32 %v5375_v21, %v6551_v51  ;;  %5386 = vpow2.f32 %v4586_v44  ;;  %v1964_v10 = vpop.permute.xlu0 %1963 }
 0x1e9   : > { %v2237_v50 = vmul.f32 %v5377_v22, %v6556_v11  ;;  %5388 = vpow2.f32 %v4587_v3  ;;  %v2050_v45 = vsel %vm2033_vm6, %v2029_v47, %v1964_v10  ;;  %v1966_v39 = vpop.permute.xlu1 %1965  ;;  %v7338_v47 = vld [vmem:[#allocation24_spill] sm:$0xff] }
 0x1ea   : > { %v5379_v33 = vpop.eup %5378  ;;  %v4764_v60 = vpack.c.bf16 %v2236_v18, %v2236_v18  ;;  %v2077_v19 = vmul.f32 %v6374_v49, %v2050_v45  ;;  %v2051_v51 = vsel %vm2033_vm6, %v2030_v59, %v1966_v39  ;;  %3445 = vrot.lane.b32.xlu0 %v7334_v6, %s5648_s21 }
 0x1eb   : > { %v5381_v1 = vpop.eup %5380  ;;  %v4765_v4 = vpack.c.bf16 %v2237_v50, %v2237_v50  ;;  %v2180_v42 = vadd.f32 1.0, %v5379_v33  ;;  %v2078_v11 = vmul.f32 %v6374_v49, %v2051_v51  ;;  %3447 = vrot.lane.b32.xlu1 %v7335_v5, %s5648_s21  ;;  %v7339_v50 = vld [vmem:[#allocation26_spill] sm:$0xff] }
 0x1ec   : > { %2337 = vst.msk [vmem:[%s6512_s8 + $0x20] sm:$0xf] %vm2328_vm7, %v4764_v60  ;;  %v2181_v38 = vadd.f32 1.0, %v5381_v1  ;;  %v6687_v24 = vadd.f32 %v6384_v26, %v2077_v19  ;;  %v6689_v9 = vpop.permute.xlu0 %3257  ;;  %v7340_v19 = vld [vmem:[#allocation25_spill] sm:$0xff] }
 0x1ed   : > { %2338 = vst.msk [vmem:[%s6512_s8 + $0x24] sm:$0xf] %vm2328_vm7, %v4765_v4  ;;  %5390 = vrcp.f32 %v2180_v42  ;;  %v6694_v63 = vadd.f32 %v6384_v26, %v2078_v11  ;;  %v6696_v29 = vpop.permute.xlu1 %3259  ;;  %v7341_v4 = vld [vmem:[#allocation27_spill] sm:$0xff] }
 0x1ee   : > { %5392 = vrcp.f32 %v2181_v38  ;;  %v4584_v49 = vmul.f32 -1.442695, %v6687_v24  ;;  %3449 = vrot.lane.b32.xlu0 %v7336_v53, %s5648_s21  ;;  %v7342_v38 = vld [vmem:[#allocation28_spill] sm:$0xff] }
 0x1ef   : > { %v5383_v46 = vpop.eup %5382  ;;  %v4585_v31 = vmul.f32 -1.442695, %v6694_v63  ;;  %3451 = vrot.lane.b32.xlu1 %v7337_v56, %s5648_s21  ;;  %s6885_s21 = scalar_lea.vmem [#allocation3], %s6482_s24  }
 0x1f0   : > { %v5385_v41 = vpop.eup %5384  ;;  %v2242_v26 = vmul.f32 %v5383_v46, %v6585_v57  ;;  %5394 = vpow2.f32 %v4584_v49  ;;  %v6705_v17 = vpop.permute.xlu0 %3253  ;;  %v7343_v49 = vld [vmem:[#allocation30_spill] sm:$0xff] }
 0x1f1   : > { %v2243_v25 = vmul.f32 %v5385_v41, %v6590_v15  ;;  %5396 = vpow2.f32 %v4585_v31  ;;  %v6708_v61 = vpop.permute.xlu1 %3255  ;;  %v7344_v31 = vld [vmem:[#allocation29_spill] sm:$0xff] }
 0x1f2   : > { %v5387_v28 = vpop.eup %5386  ;;  %v4770_v16 = vpack.c.bf16 %v2242_v26, %v2242_v26  ;;  %v7345_v26 = vld [vmem:[#allocation31_spill] sm:$0xff] }
 0x1f3   : > { %v5389_v37 = vpop.eup %5388  ;;  %v4771_v0 = vpack.c.bf16 %v2243_v25, %v2243_v25  ;;  %v2186_v14 = vadd.f32 1.0, %v5387_v28 }
 0x1f4   : > { %2343 = vst.msk [vmem:[%s6512_s8 + $0x38] sm:$0xf] %vm2328_vm7, %v4770_v16  ;;  %v2187_v43 = vadd.f32 1.0, %v5389_v37  ;;  %v6712_v20 = vpop.permute.xlu0 %3265  ;;  %v7346_v37 = vld [vmem:[#allocation12_spill] sm:$0xff] }
 0x1f5   : > { %2344 = vst.msk [vmem:[%s6512_s8 + $0x3c] sm:$0xf] %vm2328_vm7, %v4771_v0  ;;  %5398 = vrcp.f32 %v2186_v14  ;;  %v6716_v57 = vpop.permute.xlu1 %3267  ;;  %v3475_v0 = vsel %vm1991_vm4, %v7346_v37, %v6689_v9  ;;  %v6786_v14 = vld [vmem:[%s7237_s14] ss:$0 sm:$0xff] }
 0x1f6   : > { %5400 = vrcp.f32 %v2187_v43  ;;  %v7347_v43 = vld [vmem:[#allocation14_spill] sm:$0xff] }
 0x1f7   : > { %v5391_v15 = vpop.eup %5390 }
 0x1f8   : > { %v5393_v55 = vpop.eup %5392  ;;  %v2240_v13 = vmul.f32 %v5391_v15, %v6619_v34  ;;  %v6719_v30 = vpop.permute.xlu0 %3261  ;;  %v3476_v15 = vsel %vm1991_vm4, %v7347_v43, %v6696_v29 }
 0x1f9   : > { %v2241_v7 = vmul.f32 %v5393_v55, %v6624_v8  ;;  %v6722_v36 = vpop.permute.xlu1 %3263 }
 0x1fa   : > { %v5395_v2 = vpop.eup %5394  ;;  %v4768_v35 = vpack.c.bf16 %v2240_v13, %v2240_v13 }
 0x1fb   : > { %v5397_v44 = vpop.eup %5396  ;;  %v4769_v27 = vpack.c.bf16 %v2241_v7, %v2241_v7  ;;  %v2184_v21 = vadd.f32 1.0, %v5395_v2  ;;  %v6796_v2 = vld [vmem:[%s7238_s15] ss:$0 sm:$0xff] }
 0x1fc   : > { %2341 = vst.msk [vmem:[%s6512_s8 + $0x30] sm:$0xf] %vm2328_vm7, %v4768_v35  ;;  %v2185_v58 = vadd.f32 1.0, %v5397_v44  ;;  %v6726_v40 = vpop.permute.xlu0 %3273 }
 0x1fd   : > { %2342 = vst.msk [vmem:[%s6512_s8 + $0x34] sm:$0xf] %vm2328_vm7, %v4769_v27  ;;  %5402 = vrcp.f32 %v2184_v21  ;;  %v6730_v34 = vpop.permute.xlu1 %3275 }
 0x1fe   : > { %5404 = vrcp.f32 %v2185_v58 }
 0x1ff   : > { %v5399_v8 = vpop.eup %5398 }
 0x200   : > { %v5401_v52 = vpop.eup %5400  ;;  %v2246_v3 = vmul.f32 %v5399_v8, %v6653_v62  ;;  %v6733_v48 = vpop.permute.xlu0 %3269 }
 0x201   : > { %v2247_v22 = vmul.f32 %v5401_v52, %v6658_v23  ;;  %v6736_v32 = vpop.permute.xlu1 %3271 }
 0x202   : > { %v4774_v54 = vpack.c.bf16 %v2246_v3, %v2246_v3 }
 0x203   : > { %v4775_v12 = vpack.c.bf16 %v2247_v22, %v2247_v22  ;;  %v7348_v22 = vld [vmem:[#allocation13_spill] sm:$0xff] }
 0x204   : > { %2347 = vst.msk [vmem:[%s6512_s8 + $0x48] sm:$0xf] %vm2328_vm7, %v4774_v54  ;;  %v3282_v18 = vpop.permute.xlu0 %3281  ;;  %v3473_v54 = vsel %vm1991_vm4, %v7348_v22, %v6705_v17 }
 0x205   : > { %2348 = vst.msk [vmem:[%s6512_s8 + $0x4c] sm:$0xf] %vm2328_vm7, %v4775_v12  ;;  %v6744_v10 = vsel %vm1991_vm4, %v7338_v47, %v3282_v18  ;;  %v3284_v62 = vpop.permute.xlu1 %3283  ;;  %v7349_v18 = vld [vmem:[#allocation15_spill] sm:$0xff] }
 0x206   : > { %v6748_v59 = vsel %vm1991_vm4, %v7339_v50, %v3284_v62  ;;  %v3474_v47 = vsel %vm1991_vm4, %v7349_v18, %v6708_v61 }
 0x207   : > { %v5403_v23 = vpop.eup %5402 }
 0x208   : > { %v5405_v45 = vpop.eup %5404  ;;  %v2244_v39 = vmul.f32 %v5403_v23, %v6687_v24  ;;  %v3278_v33 = vpop.permute.xlu0 %3277 }
 0x209   : > { %v2245_v60 = vmul.f32 %v5405_v45, %v6694_v63  ;;  %v6754_v51 = vsel %vm1991_vm4, %v7340_v19, %v3278_v33  ;;  %v3280_v6 = vpop.permute.xlu1 %3279 }
 0x20a   : > { %v4772_v1 = vpack.c.bf16 %v2244_v39, %v2244_v39  ;;  %v6758_v42 = vsel %vm1991_vm4, %v7341_v4, %v3280_v6 }
 0x20b   : > { %v4773_v11 = vpack.c.bf16 %v2245_v60, %v2245_v60 }
 0x20c   : > { %2345 = vst.msk [vmem:[%s6512_s8 + $0x40] sm:$0xf] %vm2328_vm7, %v4772_v1  ;;  %v3290_v5 = vpop.permute.xlu0 %3289 }
 0x20d   : > { %2346 = vst.msk [vmem:[%s6512_s8 + $0x44] sm:$0xf] %vm2328_vm7, %v4773_v11  ;;  %v6766_v24 = vsel %vm1991_vm4, %v7342_v38, %v3290_v5  ;;  %v3292_v63 = vpop.permute.xlu1 %3291  ;;  %v7350_v11 = vld [vmem:[#allocation16_spill] sm:$0xff] }
 0x20e   : > { %v6770_v53 = vsel %vm1991_vm4, %v7343_v49, %v3292_v63  ;;  %v3479_v5 = vsel %vm1991_vm4, %v7350_v11, %v6712_v20  ;;  %v7351_v63 = vld [vmem:[#allocation18_spill] sm:$0xff] }
 0x20f   : > { %v3480_v49 = vsel %vm1991_vm4, %v7351_v63, %v6716_v57  ;;  %v7355_v63 = vld [vmem:[#allocation22_spill] sm:$0xff] }
 0x210   : > { %v3286_v46 = vpop.permute.xlu0 %3285 }
 0x211   : > { %v6774_v56 = vsel %vm1991_vm4, %v7344_v31, %v3286_v46  ;;  %v3288_v41 = vpop.permute.xlu1 %3287 }
 0x212   : > { %v6778_v25 = vsel %vm1991_vm4, %v7345_v26, %v3288_v41 }
 0x214   : > { %v3338_v28 = vpop.permute.xlu0 %3337 }
 0x215   : > { %v3340_v16 = vpop.permute.xlu1 %3339  ;;  %v3495_v55 = vsel %vm2012_vm5, %v3475_v0, %v3338_v28 }
 0x216   : > { %v3496_v7 = vsel %vm2012_vm5, %v3476_v15, %v3340_v16 }
 0x218   : > { %v3418_v13 = vpop.permute.xlu0 %3417 }
 0x219   : > { %v3515_v9 = vsel %vm2033_vm6, %v3495_v55, %v3418_v13  ;;  %v3420_v35 = vpop.permute.xlu1 %3419 }
 0x21a   : > { %v3542_v44 = vmul.f32 %v6786_v14, %v3515_v9  ;;  %v3516_v27 = vsel %vm2033_vm6, %v3496_v7, %v3420_v35 }
 0x21b   : > { %v3543_v21 = vmul.f32 %v6786_v14, %v3516_v27 }
 0x21c   : > { %v6803_v29 = vadd.f32 %v6796_v2, %v3542_v44  ;;  %v3334_v58 = vpop.permute.xlu0 %3333  ;;  %v7352_v44 = vld [vmem:[#allocation17_spill] sm:$0xff] }
 0x21d   : > { %v6806_v8 = vadd.f32 %v6796_v2, %v3543_v21  ;;  %v3336_v52 = vpop.permute.xlu1 %3335  ;;  %v3493_v62 = vsel %vm2012_vm5, %v3473_v54, %v3334_v58  ;;  %v3477_v27 = vsel %vm1991_vm4, %v7352_v44, %v6719_v30  ;;  %v7353_v58 = vld [vmem:[#allocation19_spill] sm:$0xff] }
 0x21e   : > { %v4696_v3 = vmul.f32 -1.442695, %v6803_v29  ;;  %v3494_v23 = vsel %vm2012_vm5, %v3474_v47, %v3336_v52  ;;  %v3478_v52 = vsel %vm1991_vm4, %v7353_v58, %v6722_v36  ;;  %v7356_v58 = vld [vmem:[#allocation21_spill] sm:$0xff] }
 0x21f   : > { %v4697_v12 = vmul.f32 -1.442695, %v6806_v8 }
 0x220   : > { %5406 = vpow2.f32 %v4696_v3  ;;  %v3414_v50 = vpop.permute.xlu0 %3413 }
 0x221   : > { %5408 = vpow2.f32 %v4697_v12  ;;  %v3513_v45 = vsel %vm2033_vm6, %v3493_v62, %v3414_v50  ;;  %v3416_v39 = vpop.permute.xlu1 %3415 }
 0x222   : > { %v3540_v33 = vmul.f32 %v6786_v14, %v3513_v45  ;;  %v3514_v17 = vsel %vm2033_vm6, %v3494_v23, %v3416_v39 }
 0x223   : > { %v3541_v60 = vmul.f32 %v6786_v14, %v3514_v17 }
 0x224   : > { %v6823_v19 = vadd.f32 %v6796_v2, %v3540_v33  ;;  %v3346_v61 = vpop.permute.xlu0 %3345 }
 0x225   : > { %v6826_v6 = vadd.f32 %v6796_v2, %v3541_v60  ;;  %v3348_v1 = vpop.permute.xlu1 %3347  ;;  %v3499_v46 = vsel %vm2012_vm5, %v3479_v5, %v3346_v61 }
 0x226   : > { %v4694_v4 = vmul.f32 -1.442695, %v6823_v19  ;;  %v3500_v41 = vsel %vm2012_vm5, %v3480_v49, %v3348_v1  ;;  %v3484_v49 = vsel %vm1991_vm4, %v7355_v63, %v6730_v34 }
 0x227   : > { %v4695_v38 = vmul.f32 -1.442695, %v6826_v6 }
 0x228   : > { %5410 = vpow2.f32 %v4694_v4  ;;  %v3426_v31 = vpop.permute.xlu0 %3425  ;;  %v7354_v4 = vld [vmem:[#allocation20_spill] sm:$0xff] }
 0x229   : > { %5412 = vpow2.f32 %v4695_v38  ;;  %v3519_v26 = vsel %vm2033_vm6, %v3499_v46, %v3426_v31  ;;  %v3428_v28 = vpop.permute.xlu1 %3427  ;;  %v3483_v11 = vsel %vm1991_vm4, %v7354_v4, %v6726_v40 }
 0x22a   : > { %v5407_v16 = vpop.eup %5406  ;;  %v3546_v37 = vmul.f32 %v6786_v14, %v3519_v26  ;;  %v3520_v20 = vsel %vm2033_vm6, %v3500_v41, %v3428_v28 }
 0x22b   : > { %v5409_v0 = vpop.eup %5408  ;;  %v3649_v43 = vadd.f32 1.0, %v5407_v16  ;;  %v3547_v15 = vmul.f32 %v6786_v14, %v3520_v20 }
 0x22c   : > { %v3650_v57 = vadd.f32 1.0, %v5409_v0  ;;  %v6843_v55 = vadd.f32 %v6796_v2, %v3546_v37  ;;  %v3342_v13 = vpop.permute.xlu0 %3341 }
 0x22d   : > { %5414 = vrcp.f32 %v3649_v43  ;;  %v6846_v7 = vadd.f32 %v6796_v2, %v3547_v15  ;;  %v3344_v9 = vpop.permute.xlu1 %3343  ;;  %v3497_v3 = vsel %vm2012_vm5, %v3477_v27, %v3342_v13 }
 0x22e   : > { %5416 = vrcp.f32 %v3650_v57  ;;  %v4700_v35 = vmul.f32 -1.442695, %v6843_v55  ;;  %v3498_v54 = vsel %vm2012_vm5, %v3478_v52, %v3344_v9  ;;  %v3481_v52 = vsel %vm1991_vm4, %v7356_v58, %v6733_v48 }
 0x22f   : > { %v4701_v21 = vmul.f32 -1.442695, %v6846_v7 }
 0x230   : > { %5418 = vpow2.f32 %v4700_v35  ;;  %v3422_v22 = vpop.permute.xlu0 %3421 }
 0x231   : > { %5420 = vpow2.f32 %v4701_v21  ;;  %v3517_v12 = vsel %vm2033_vm6, %v3497_v3, %v3422_v22  ;;  %v3424_v18 = vpop.permute.xlu1 %3423 }
 0x232   : > { %v5411_v47 = vpop.eup %5410  ;;  %v3544_v62 = vmul.f32 %v6786_v14, %v3517_v12  ;;  %v3518_v30 = vsel %vm2033_vm6, %v3498_v54, %v3424_v18  ;;  %v7357_v54 = vld [vmem:[#allocation23_spill] sm:$0xff] }
 0x233   : > { %v5413_v50 = vpop.eup %5412  ;;  %v3647_v23 = vadd.f32 1.0, %v5411_v47  ;;  %v3545_v45 = vmul.f32 %v6786_v14, %v3518_v30  ;;  %v3482_v12 = vsel %vm1991_vm4, %v7357_v54, %v6736_v32 }
 0x234   : > { %v3648_v36 = vadd.f32 1.0, %v5413_v50  ;;  %v6863_v39 = vadd.f32 %v6796_v2, %v3544_v62  ;;  %v3354_v33 = vpop.permute.xlu0 %3353 }
 0x235   : > { %5422 = vrcp.f32 %v3647_v23  ;;  %v6866_v17 = vadd.f32 %v6796_v2, %v3545_v45  ;;  %v3356_v60 = vpop.permute.xlu1 %3355  ;;  %v3503_v31 = vsel %vm2012_vm5, %v3483_v11, %v3354_v33 }
 0x236   : > { %5424 = vrcp.f32 %v3648_v36  ;;  %v4698_v61 = vmul.f32 -1.442695, %v6863_v39  ;;  %v3504_v28 = vsel %vm2012_vm5, %v3484_v49, %v3356_v60 }
 0x237   : > { %v5415_v1 = vpop.eup %5414  ;;  %v4699_v5 = vmul.f32 -1.442695, %v6866_v17 }
 0x238   : > { %v5417_v38 = vpop.eup %5416  ;;  %v3709_v46 = vmul.f32 %v5415_v1, %v6803_v29  ;;  %5426 = vpow2.f32 %v4698_v61  ;;  %v3434_v41 = vpop.permute.xlu0 %3433 }
 0x239   : > { %v3710_v26 = vmul.f32 %v5417_v38, %v6806_v8  ;;  %5428 = vpow2.f32 %v4699_v5  ;;  %v3523_v40 = vsel %vm2033_vm6, %v3503_v31, %v3434_v41  ;;  %v3436_v16 = vpop.permute.xlu1 %3435 }
 0x23a   : > { %v5419_v37 = vpop.eup %5418  ;;  %v4778_v20 = vpack.c.bf16 %v3709_v46, %v3709_v46  ;;  %v3550_v0 = vmul.f32 %v6786_v14, %v3523_v40  ;;  %v3524_v34 = vsel %vm2033_vm6, %v3504_v28, %v3436_v16 }
 0x23b   : > { %v5421_v29 = vpop.eup %5420  ;;  %v4779_v43 = vpack.c.bf16 %v3710_v26, %v3710_v26  ;;  %v3653_v15 = vadd.f32 1.0, %v5419_v37  ;;  %v3551_v57 = vmul.f32 %v6786_v14, %v3524_v34 }
 0x23c   : > { %3809 = vst.msk [vmem:[%s6885_s21 + $0x8] sm:$0xf] %vm2328_vm7, %v4778_v20  ;;  %v3654_v8 = vadd.f32 1.0, %v5421_v29  ;;  %v6890_v13 = vadd.f32 %v6796_v2, %v3550_v0  ;;  %v3350_v9 = vpop.permute.xlu0 %3349 }
 0x23d   : > { %3810 = vst.msk [vmem:[%s6885_s21 + $0xc] sm:$0xf] %vm2328_vm7, %v4779_v43  ;;  %5430 = vrcp.f32 %v3653_v15  ;;  %v6895_v35 = vadd.f32 %v6796_v2, %v3551_v57  ;;  %v3352_v44 = vpop.permute.xlu1 %3351  ;;  %v3501_v47 = vsel %vm2012_vm5, %v3481_v52, %v3350_v9 }
 0x23e   : > { %5432 = vrcp.f32 %v3654_v8  ;;  %v4704_v27 = vmul.f32 -1.442695, %v6890_v13  ;;  %v3502_v48 = vsel %vm2012_vm5, %v3482_v12, %v3352_v44 }
 0x23f   : > { %v5423_v21 = vpop.eup %5422  ;;  %v4705_v3 = vmul.f32 -1.442695, %v6895_v35 }
 0x240   : > { %v5425_v22 = vpop.eup %5424  ;;  %v3707_v18 = vmul.f32 %v5423_v21, %v6823_v19  ;;  %5434 = vpow2.f32 %v4704_v27  ;;  %v3430_v62 = vpop.permute.xlu0 %3429 }
 0x241   : > { %v3708_v30 = vmul.f32 %v5425_v22, %v6826_v6  ;;  %5436 = vpow2.f32 %v4705_v3  ;;  %v3521_v50 = vsel %vm2033_vm6, %v3501_v47, %v3430_v62  ;;  %v3432_v23 = vpop.permute.xlu1 %3431 }
 0x242   : > { %v5427_v45 = vpop.eup %5426  ;;  %v4776_v36 = vpack.c.bf16 %v3707_v18, %v3707_v18  ;;  %v3548_v32 = vmul.f32 %v6786_v14, %v3521_v50  ;;  %v3522_v19 = vsel %vm2033_vm6, %v3502_v48, %v3432_v23 }
 0x243   : > { %v5429_v33 = vpop.eup %5428  ;;  %v4777_v60 = vpack.c.bf16 %v3708_v30, %v3708_v30  ;;  %v3651_v61 = vadd.f32 1.0, %v5427_v45  ;;  %v3549_v1 = vmul.f32 %v6786_v14, %v3522_v19 }
 0x244   : > { %3807 = vst.msk [vmem:[%s6885_s21] sm:$0xf] %vm2328_vm7, %v4776_v36  ;;  %v3652_v6 = vadd.f32 1.0, %v5429_v33  ;;  %v6916_v4 = vadd.f32 %v6796_v2, %v3548_v32  ;;  %v3362_v11 = vpop.permute.xlu0 %3361 }
 0x245   : > { %3808 = vst.msk [vmem:[%s6885_s21 + $0x4] sm:$0xf] %vm2328_vm7, %v4777_v60  ;;  %5438 = vrcp.f32 %v3651_v61  ;;  %v6921_v5 = vadd.f32 %v6796_v2, %v3549_v1  ;;  %v3364_v38 = vpop.permute.xlu1 %3363  ;;  %v3507_v26 = vsel %vm2012_vm5, %v6744_v10, %v3362_v11 }
 0x246   : > { %5440 = vrcp.f32 %v3652_v6  ;;  %v4702_v63 = vmul.f32 -1.442695, %v6916_v4  ;;  %v3508_v16 = vsel %vm2012_vm5, %v6748_v59, %v3364_v38 }
 0x247   : > { %v5431_v49 = vpop.eup %5430  ;;  %v4703_v46 = vmul.f32 -1.442695, %v6921_v5 }
 0x248   : > { %v5433_v31 = vpop.eup %5432  ;;  %v3713_v41 = vmul.f32 %v5431_v49, %v6843_v55  ;;  %5442 = vpow2.f32 %v4702_v63  ;;  %v3442_v28 = vpop.permute.xlu0 %3441 }
 0x249   : > { %v3714_v40 = vmul.f32 %v5433_v31, %v6846_v7  ;;  %5444 = vpow2.f32 %v4703_v46  ;;  %v3527_v37 = vsel %vm2033_vm6, %v3507_v26, %v3442_v28  ;;  %v3444_v20 = vpop.permute.xlu1 %3443 }
 0x24a   : > { %v5435_v0 = vpop.eup %5434  ;;  %v4782_v34 = vpack.c.bf16 %v3713_v41, %v3713_v41  ;;  %v3554_v55 = vmul.f32 %v6786_v14, %v3527_v37  ;;  %v3528_v29 = vsel %vm2033_vm6, %v3508_v16, %v3444_v20 }
 0x24b   : > { %v5437_v43 = vpop.eup %5436  ;;  %v4783_v15 = vpack.c.bf16 %v3714_v40, %v3714_v40  ;;  %v3657_v10 = vadd.f32 1.0, %v5435_v0  ;;  %v3555_v57 = vmul.f32 %v6786_v14, %v3528_v29 }
 0x24c   : > { %3813 = vst.msk [vmem:[%s6885_s21 + $0x18] sm:$0xf] %vm2328_vm7, %v4782_v34  ;;  %v3658_v7 = vadd.f32 1.0, %v5437_v43  ;;  %v6938_v8 = vadd.f32 %v6796_v2, %v3554_v55  ;;  %v3358_v59 = vpop.permute.xlu0 %3357 }
 0x24d   : > { %3814 = vst.msk [vmem:[%s6885_s21 + $0x1c] sm:$0xf] %vm2328_vm7, %v4783_v15  ;;  %5446 = vrcp.f32 %v3657_v10  ;;  %v6943_v9 = vadd.f32 %v6796_v2, %v3555_v57  ;;  %v3360_v44 = vpop.permute.xlu1 %3359  ;;  %v3505_v22 = vsel %vm2012_vm5, %v6754_v51, %v3358_v59 }
 0x24e   : > { %5448 = vrcp.f32 %v3658_v7  ;;  %v4708_v27 = vmul.f32 -1.442695, %v6938_v8  ;;  %v3506_v18 = vsel %vm2012_vm5, %v6758_v42, %v3360_v44 }
 0x24f   : > { %v5439_v21 = vpop.eup %5438  ;;  %v4709_v58 = vmul.f32 -1.442695, %v6943_v9 }
 0x250   : > { %v5441_v52 = vpop.eup %5440  ;;  %v3711_v3 = vmul.f32 %v5439_v21, %v6863_v39  ;;  %5450 = vpow2.f32 %v4708_v27  ;;  %v3438_v54 = vpop.permute.xlu0 %3437 }
 0x251   : > { %v3712_v12 = vmul.f32 %v5441_v52, %v6866_v17  ;;  %5452 = vpow2.f32 %v4709_v58  ;;  %v3525_v47 = vsel %vm2033_vm6, %v3505_v22, %v3438_v54  ;;  %v3440_v62 = vpop.permute.xlu1 %3439 }
 0x252   : > { %v5443_v30 = vpop.eup %5442  ;;  %v4780_v48 = vpack.c.bf16 %v3711_v3, %v3711_v3  ;;  %v3552_v39 = vmul.f32 %v6786_v14, %v3525_v47  ;;  %v3526_v50 = vsel %vm2033_vm6, %v3506_v18, %v3440_v62 }
 0x253   : > { %v5445_v23 = vpop.eup %5444  ;;  %v4781_v45 = vpack.c.bf16 %v3712_v12, %v3712_v12  ;;  %v3655_v51 = vadd.f32 1.0, %v5443_v30  ;;  %v3553_v36 = vmul.f32 %v6786_v14, %v3526_v50 }
 0x254   : > { %3811 = vst.msk [vmem:[%s6885_s21 + $0x10] sm:$0xf] %vm2328_vm7, %v4780_v48  ;;  %v3656_v17 = vadd.f32 1.0, %v5445_v23  ;;  %v6960_v32 = vadd.f32 %v6796_v2, %v3552_v39  ;;  %v3370_v42 = vpop.permute.xlu0 %3369 }
 0x255   : > { %3812 = vst.msk [vmem:[%s6885_s21 + $0x14] sm:$0xf] %vm2328_vm7, %v4781_v45  ;;  %5454 = vrcp.f32 %v3655_v51  ;;  %v6965_v19 = vadd.f32 %v6796_v2, %v3553_v36  ;;  %v3372_v33 = vpop.permute.xlu1 %3371  ;;  %v3511_v15 = vsel %vm2012_vm5, %v6766_v24, %v3370_v42 }
 0x256   : > { %5456 = vrcp.f32 %v3656_v17  ;;  %v4706_v60 = vmul.f32 -1.442695, %v6960_v32  ;;  %v3512_v7 = vsel %vm2012_vm5, %v6770_v53, %v3372_v33 }
 0x257   : > { %v5447_v61 = vpop.eup %5446  ;;  %v4707_v1 = vmul.f32 -1.442695, %v6965_v19 }
 0x258   : > { %v5449_v6 = vpop.eup %5448  ;;  %v3717_v11 = vmul.f32 %v5447_v61, %v6890_v13  ;;  %5458 = vpow2.f32 %v4706_v60  ;;  %v3366_v38 = vpop.permute.xlu0 %3365 }
 0x259   : > { %v3718_v63 = vmul.f32 %v5449_v6, %v6895_v35  ;;  %5460 = vpow2.f32 %v4707_v1  ;;  %v3368_v49 = vpop.permute.xlu1 %3367  ;;  %v3509_v16 = vsel %vm2012_vm5, %v6774_v56, %v3366_v38 }
 0x25a   : > { %v5451_v46 = vpop.eup %5450  ;;  %v4786_v31 = vpack.c.bf16 %v3717_v11, %v3717_v11  ;;  %v3510_v13 = vsel %vm2012_vm5, %v6778_v25, %v3368_v49 }
 0x25b   : > { %v5453_v41 = vpop.eup %5452  ;;  %v4787_v26 = vpack.c.bf16 %v3718_v63, %v3718_v63  ;;  %v3661_v28 = vadd.f32 1.0, %v5451_v46 }
 0x25c   : > { %3817 = vst.msk [vmem:[%s6885_s21 + $0x28] sm:$0xf] %vm2328_vm7, %v4786_v31  ;;  %v3662_v40 = vadd.f32 1.0, %v5453_v41  ;;  %v3446_v37 = vpop.permute.xlu0 %3445 }
 0x25d   : > { %3818 = vst.msk [vmem:[%s6885_s21 + $0x2c] sm:$0xf] %vm2328_vm7, %v4787_v26  ;;  %5462 = vrcp.f32 %v3661_v28  ;;  %v3529_v35 = vsel %vm2033_vm6, %v3509_v16, %v3446_v37  ;;  %v3448_v20 = vpop.permute.xlu1 %3447 }
 0x25e   : > { %5464 = vrcp.f32 %v3662_v40  ;;  %v3556_v0 = vmul.f32 %v6786_v14, %v3529_v35  ;;  %v3530_v34 = vsel %vm2033_vm6, %v3510_v13, %v3448_v20 }
 0x25f   : > { %v5455_v55 = vpop.eup %5454  ;;  %v3557_v29 = vmul.f32 %v6786_v14, %v3530_v34 }
 0x260   : > { %v5457_v43 = vpop.eup %5456  ;;  %v3715_v56 = vmul.f32 %v5455_v55, %v6916_v4  ;;  %v3583_v10 = vadd.f32 %v6796_v2, %v3556_v0  ;;  %v3450_v25 = vpop.permute.xlu0 %3449 }
 0x261   : > { %v3716_v57 = vmul.f32 %v5457_v43, %v6921_v5  ;;  %v3584_v59 = vadd.f32 %v6796_v2, %v3557_v29  ;;  %v3531_v44 = vsel %vm2033_vm6, %v3511_v15, %v3450_v25  ;;  %v3452_v27 = vpop.permute.xlu1 %3451 }
 0x262   : > { %v5459_v21 = vpop.eup %5458  ;;  %v4784_v4 = vpack.c.bf16 %v3715_v56, %v3715_v56  ;;  %v4710_v58 = vmul.f32 -1.442695, %v3583_v10  ;;  %v3558_v24 = vmul.f32 %v6786_v14, %v3531_v44  ;;  %v3532_v52 = vsel %vm2033_vm6, %v3512_v7, %v3452_v27 }
 0x263   : > { %v5461_v3 = vpop.eup %5460  ;;  %v4785_v22 = vpack.c.bf16 %v3716_v57, %v3716_v57  ;;  %v3659_v54 = vadd.f32 1.0, %v5459_v21  ;;  %v4711_v5 = vmul.f32 -1.442695, %v3584_v59  ;;  %v3559_v12 = vmul.f32 %v6786_v14, %v3532_v52 }
 0x264   : > { %3815 = vst.msk [vmem:[%s6885_s21 + $0x20] sm:$0xf] %vm2328_vm7, %v4784_v4  ;;  %v3660_v53 = vadd.f32 1.0, %v5461_v3  ;;  %5466 = vpow2.f32 %v4710_v58  ;;  %v3585_v18 = vadd.f32 %v6796_v2, %v3558_v24 }
 0x265   : > { %3816 = vst.msk [vmem:[%s6885_s21 + $0x24] sm:$0xf] %vm2328_vm7, %v4785_v22  ;;  %5468 = vrcp.f32 %v3659_v54  ;;  %v3586_v47 = vadd.f32 %v6796_v2, %v3559_v12 }
 0x266   : > { %5470 = vrcp.f32 %v3660_v53  ;;  %v4712_v62 = vmul.f32 -1.442695, %v3585_v18 }
 0x267   : > { %v5463_v30 = vpop.eup %5462  ;;  %5472 = vpow2.f32 %v4711_v5  ;;  %v4713_v48 = vmul.f32 -1.442695, %v3586_v47 }
 0x268   : > { %v5465_v39 = vpop.eup %5464  ;;  %v3721_v14 = vmul.f32 %v5463_v30, %v6938_v8  ;;  %5474 = vpow2.f32 %v4712_v62 }
 0x269   : > { %v3722_v50 = vmul.f32 %v5465_v39, %v6943_v9  ;;  %5476 = vpow2.f32 %v4713_v48 }
 0x26a   : > { %v4790_v23 = vpack.c.bf16 %v3721_v14, %v3721_v14 }
 0x26b   : > { %v4791_v45 = vpack.c.bf16 %v3722_v50, %v3722_v50 }
 0x26c   : > { %3821 = vst.msk [vmem:[%s6885_s21 + $0x38] sm:$0xf] %vm2328_vm7, %v4790_v23 }
 0x26d   : > { %3822 = vst.msk [vmem:[%s6885_s21 + $0x3c] sm:$0xf] %vm2328_vm7, %v4791_v45 }
 0x26e   : > { %v5467_v2 = vpop.eup %5466 }
 0x26f   : > { %v5469_v51 = vpop.eup %5468  ;;  %v3663_v36 = vadd.f32 1.0, %v5467_v2 }
 0x270   : > { %v5471_v17 = vpop.eup %5470  ;;  %v3719_v42 = vmul.f32 %v5469_v51, %v6960_v32 }
 0x271   : > { %v5473_v33 = vpop.eup %5472  ;;  %v3720_v8 = vmul.f32 %v5471_v17, %v6965_v19  ;;  %5478 = vrcp.f32 %v3663_v36 }
 0x272   : > { %v5475_v9 = vpop.eup %5474  ;;  %v4788_v60 = vpack.c.bf16 %v3719_v42, %v3719_v42  ;;  %v3664_v61 = vadd.f32 1.0, %v5473_v33 }
 0x273   : > { %v5477_v1 = vpop.eup %5476  ;;  %v4789_v6 = vpack.c.bf16 %v3720_v8, %v3720_v8  ;;  %v3665_v11 = vadd.f32 1.0, %v5475_v9 }
 0x274   : > { %3819 = vst.msk [vmem:[%s6885_s21 + $0x30] sm:$0xf] %vm2328_vm7, %v4788_v60  ;;  %5480 = vrcp.f32 %v3664_v61  ;;  %v3666_v38 = vadd.f32 1.0, %v5477_v1 }
 0x275   : > { %3820 = vst.msk [vmem:[%s6885_s21 + $0x34] sm:$0xf] %vm2328_vm7, %v4789_v6  ;;  %5482 = vrcp.f32 %v3665_v11 }
 0x276   : > { %5484 = vrcp.f32 %v3666_v38 }
 0x27b   : > { %v5479_v32 = vpop.eup %5478 }
 0x27c   : > { %v3723_v19 = vmul.f32 %v5479_v32, %v3583_v10 }
 0x27e   : > { %v5481_v63 = vpop.eup %5480  ;;  %v4792_v49 = vpack.c.bf16 %v3723_v19, %v3723_v19 }
 0x27f   : > { %v5483_v46 = vpop.eup %5482  ;;  %v3724_v31 = vmul.f32 %v5481_v63, %v3584_v59  ;;  %3837 = sbr.rel (!%p5764_p4) target bundleno = 721 (0x2d1), region = 88 }
 0x280   : > { %v5485_v41 = vpop.eup %5484  ;;  %3823 = vst.msk [vmem:[%s6885_s21 + $0x40] sm:$0xf] %vm2328_vm7, %v4792_v49  ;;  %v3725_v26 = vmul.f32 %v5483_v46, %v3585_v18 }
 0x281   : > { %v4793_v28 = vpack.c.bf16 %v3724_v31, %v3724_v31  ;;  %v3726_v40 = vmul.f32 %v5485_v41, %v3586_v47 }
 0x282   : > { %v4794_v16 = vpack.c.bf16 %v3725_v26, %v3725_v26 }
 0x283   : > { %3824 = vst.msk [vmem:[%s6885_s21 + $0x44] sm:$0xf] %vm2328_vm7, %v4793_v28  ;;  %v4795_v37 = vpack.c.bf16 %v3726_v40, %v3726_v40 }
 0x284   : > { %3825 = vst.msk [vmem:[%s6885_s21 + $0x48] sm:$0xf] %vm2328_vm7, %v4794_v16 }
 0x285   : > { %3826 = vst.msk [vmem:[%s6885_s21 + $0x4c] sm:$0xf] %vm2328_vm7, %v4795_v37 }
 0x286   : > { %s7368_s2 = smov (!%p3840_p8, %s3839_s2), 20 }
 0x287   : > { %s4734_s24 = sshll.u32 %s7368_s2, 6 }
 0x288   : > { %p4737_p9 = scmp.eq.s32.totalorder %s4734_s24, 0 }
 0x289   : > { %5486 = sdivrem.u32 (!%p4737_p9), %s7368_s2, 20 }
 0x28a   : > { %3848 = sbr.rel (%p4737_p9) target bundleno = 721 (0x2d1), region = 92 }
 0x292   : > { %s7034_s26 = spop.drf %5486 }
 0x293   : > { %p4738_p10 = scmp.le.s32.totalorder %s7034_s26, 0 }
 0x294   : > { %s7358_s19 = smov (!%p4738_p10), %s7028_s29  ;;  %s7359_s23 = smov (!%p4738_p10), %s6512_s8 }
 0x295   : > { %4349 = sbr.rel (%p4738_p10) target bundleno = 692 (0x2b4), region = 253  ;;  %s7043_s0 = smov (!%p4738_p10), 0  }
 0x296   : > { %s7045_s1 = smov (!%p4738_p10), 0  }
 0x29c LB: >> { %v3865_v13 = vld [vmem:[%s5588_s23] sm:$0xf]  ;;  %v3867_v35 = vld [vmem:[%s5588_s23 + $0x4] sm:$0xf]  ;;  %v3869_v20 = vld [vmem:[%s5588_s23 + $0x8] sm:$0xf]  ;;  %s5596_s1 = sphi %s7045_s1, %s3859_s1   ;;  %s5592_s0 = sphi %s7043_s0, %s7360_s0   ;;  %s5588_s23 = sphi %s7359_s23, %s3910_s23   ;;  %s5584_s19 = sphi %s7358_s19, %s3911_s19  }
 0x29d   : >> { %3866 = vst [vmem:[%s5584_s19] sm:$0xf] %v3865_v13  ;;  %3868 = vst [vmem:[%s5584_s19 + $0x4] sm:$0xf] %v3867_v35  ;;  %v3871_v0 = vld [vmem:[%s5588_s23 + $0xc] sm:$0xf]  ;;  %s3905_s9 = sadd.s32 1, %s5592_s0 }
 0x29e   : >> { %3870 = vst [vmem:[%s5584_s19 + $0x8] sm:$0xf] %v3869_v20  ;;  %v3873_v34 = vld [vmem:[%s5588_s23 + $0x10] sm:$0xf]  ;;  %v3875_v55 = vld [vmem:[%s5588_s23 + $0x14] sm:$0xf]  ;;  %p3906_p11 = scmp.ge.s32.totalorder %s3905_s9, %s7034_s26 }
 0x29f   : >> { %3872 = vst [vmem:[%s5584_s19 + $0xc] sm:$0xf] %v3871_v0  ;;  %3874 = vst [vmem:[%s5584_s19 + $0x10] sm:$0xf] %v3873_v34  ;;  %v3877_v29 = vld [vmem:[%s5588_s23 + $0x18] sm:$0xf] }
 0x2a0   : >> { %3876 = vst [vmem:[%s5584_s19 + $0x14] sm:$0xf] %v3875_v55  ;;  %v3879_v43 = vld [vmem:[%s5588_s23 + $0x1c] sm:$0xf]  ;;  %v3881_v56 = vld [vmem:[%s5588_s23 + $0x20] sm:$0xf] }
 0x2a1   : >> { %3878 = vst [vmem:[%s5584_s19 + $0x18] sm:$0xf] %v3877_v29  ;;  %3880 = vst [vmem:[%s5584_s19 + $0x1c] sm:$0xf] %v3879_v43  ;;  %v3883_v15 = vld [vmem:[%s5588_s23 + $0x24] sm:$0xf] }
 0x2a2   : >> { %3882 = vst [vmem:[%s5584_s19 + $0x20] sm:$0xf] %v3881_v56  ;;  %v3885_v10 = vld [vmem:[%s5588_s23 + $0x28] sm:$0xf]  ;;  %v3887_v25 = vld [vmem:[%s5588_s23 + $0x2c] sm:$0xf] }
 0x2a3   : >> { %3884 = vst [vmem:[%s5584_s19 + $0x24] sm:$0xf] %v3883_v15  ;;  %3886 = vst [vmem:[%s5584_s19 + $0x28] sm:$0xf] %v3885_v10  ;;  %v3889_v57 = vld [vmem:[%s5588_s23 + $0x30] sm:$0xf] }
 0x2a4   : >> { %3888 = vst [vmem:[%s5584_s19 + $0x2c] sm:$0xf] %v3887_v25  ;;  %v3891_v7 = vld [vmem:[%s5588_s23 + $0x34] sm:$0xf]  ;;  %v3893_v59 = vld [vmem:[%s5588_s23 + $0x38] sm:$0xf] }
 0x2a5   : >> { %3890 = vst [vmem:[%s5584_s19 + $0x30] sm:$0xf] %v3889_v57  ;;  %3892 = vst [vmem:[%s5584_s19 + $0x34] sm:$0xf] %v3891_v7  ;;  %v3895_v44 = vld [vmem:[%s5588_s23 + $0x3c] sm:$0xf] }
 0x2a6   : >> { %3894 = vst [vmem:[%s5584_s19 + $0x38] sm:$0xf] %v3893_v59  ;;  %v3897_v27 = vld [vmem:[%s5588_s23 + $0x40] sm:$0xf]  ;;  %v3899_v21 = vld [vmem:[%s5588_s23 + $0x44] sm:$0xf] }
 0x2a7   : >> { %3896 = vst [vmem:[%s5584_s19 + $0x3c] sm:$0xf] %v3895_v44  ;;  %3898 = vst [vmem:[%s5584_s19 + $0x40] sm:$0xf] %v3897_v27  ;;  %v3901_v4 = vld [vmem:[%s5588_s23 + $0x48] sm:$0xf] }
 0x2a8   : >> { %3900 = vst [vmem:[%s5584_s19 + $0x44] sm:$0xf] %v3899_v21  ;;  %v3903_v58 = vld [vmem:[%s5588_s23 + $0x4c] sm:$0xf]  ;;  %3902 = vst [vmem:[%s5584_s19 + $0x48] sm:$0xf] %v3901_v4 }
 0x2a9   : >> { %3904 = vst [vmem:[%s5584_s19 + $0x4c] sm:$0xf] %v3903_v58  ;;  %s7370_s9 = smov (%p3906_p11, %s3905_s9), 0  ;;  %s3859_s1 = sadd.s32 1, %s5596_s1  }
 0x2aa   : >> { %s3908_s22 = smul.u32 80, %s7370_s9  ;;  %p3858_p12 = scmp.ge.s32.totalorder %s3859_s1, %s7034_s26 }
 0x2ab   : >> { %s7360_s0 = smov %s7370_s9 }
 0x2ac   : >> { %s3910_s23 = scalar_lea.vmem %s6512_s8, %s3908_s22 [#allocation2]   ;;  %s3911_s19 = scalar_lea.vmem %s7028_s29, %s3908_s22  }
 0x2ad   : > { %3861 = sbr.rel (!%p3858_p12) target bundleno = 668 (0x29c), region = 259 }
 0x2b4 PF: > { %5488 = sdivrem.u32 %s7368_s2, 20 }
 0x2b5   : > { %s4739_s24 = smul.u32 80, %s7034_s26 }
 0x2b7   : > { %s3916_s22 = scalar_lea.vmem %s6512_s8, %s4739_s24 [#allocation2]   ;;  %s3918_s3 = scalar_lea.vmem %s7028_s29, %s4739_s24  }
 0x2bd   : > { %s5489_s4 = spop.drf %5488 }
 0x2be   : > { %p4741_p13 = scmp.le.s32.totalorder %s5489_s4, 0 }
 0x2bf   : > { %s5598_s5 = smov (!%p4741_p13), %s3918_s3   ;;  %s5602_s6 = smov (!%p4741_p13), %s3916_s22  }
 0x2c0   : > { %4363 = sbr.rel (%p4741_p13) target bundleno = 721 (0x2d1), region = 264  ;;  %s5606_s7 = smov (!%p4741_p13), 0  }
 0x2c1   : > { %s5610_s10 = smov (!%p4741_p13), 0  }
 0x2c7 LB: >> { %v3928_v24 = vld [vmem:[%s5604_s6] sm:$0xf]  ;;  %s3930_s19 = sadd.s32 1, %s5608_s7  ;;  %s3922_s10 = sadd.s32 1, %s5612_s10   ;;  %s5612_s10 = sphi %s5610_s10, %s3922_s10   ;;  %s5608_s7 = sphi %s5606_s7, %s5607_s7   ;;  %s5604_s6 = sphi %s5602_s6, %s3935_s6   ;;  %s5600_s5 = sphi %s5598_s5, %s3936_s5  }
 0x2c8   : >> { %3929 = vst [vmem:[%s5600_s5] sm:$0xf] %v3928_v24  ;;  %p3931_p0 = scmp.ge.s32.totalorder %s3930_s19, %s5489_s4  ;;  %p3921_p1 = scmp.ge.s32.totalorder %s3922_s10, %s5489_s4 }
 0x2ca   : >> { %s7372_s19 = smov (%p3931_p0, %s3930_s19), 0  ;;  %3924 = sbr.rel (!%p3921_p1) target bundleno = 711 (0x2c7), region = 270 }
 0x2cb   : >> { %s4742_s8 = sshll.u32 %s7372_s19, 2  ;;  %s5607_s7 = smov %s7372_s19  }
 0x2cc   : >> { %s3935_s6 = scalar_lea.vmem %s3916_s22, %s4742_s8 [#allocation2]   ;;  %s3936_s5 = scalar_lea.vmem %s3918_s3, %s4742_s8  }
 0x2d1 PF: > { %4026 = sbr.rel (!%p5764_p4) target bundleno = 803 (0x323), region = 136  ;;  %s4028_s7 = ssub.s32 (%p5764_p4), 73, %s5772_s20 }
 0x2d2   : > { %s4797_s2 = smul.u32 (%p5764_p4), 80, %s5752_s27  ;;  %p4029_p2 = scmp.lt.s32.totalorder (%p5764_p4), %s4028_s7, 20 }
 0x2d4   : > { %s7124_s23 = scalar_lea.vmem (%p5764_p4), %s7240_s17, %s4797_s2  }
 0x2d8   : > { %s7374_s7 = smov (!%p4029_p2, %s4028_s7), 20 }
 0x2d9   : > { %s4744_s5 = sshll.u32 %s7374_s7, 6 }
 0x2da   : > { %p4747_p3 = scmp.eq.s32.totalorder %s4744_s5, 0 }
 0x2db   : > { %5490 = sdivrem.u32 (!%p4747_p3), %s7374_s7, 20 }
 0x2dc   : > { %4037 = sbr.rel (%p4747_p3) target bundleno = 803 (0x323), region = 140 }
 0x2e4   : > { %s7130_s3 = spop.drf %5490 }
 0x2e5   : > { %p4748_p4 = scmp.le.s32.totalorder %s7130_s3, 0 }
 0x2e6   : > { %s7361_s4 = smov (!%p4748_p4), %s7124_s23  ;;  %s7362_s6 = smov (!%p4748_p4), %s6885_s21 }
 0x2e7   : > { %4377 = sbr.rel (%p4748_p4) target bundleno = 774 (0x306), region = 275  ;;  %s7139_s10 = smov (!%p4748_p4), 0  }
 0x2e8   : > { %s7141_s27 = smov (!%p4748_p4), 0  }
 0x2ee LB: >> { %v4054_v52 = vld [vmem:[%s5620_s6] sm:$0xf]  ;;  %v4056_v3 = vld [vmem:[%s5620_s6 + $0x4] sm:$0xf]  ;;  %v4058_v22 = vld [vmem:[%s5620_s6 + $0x8] sm:$0xf]  ;;  %s5628_s27 = sphi %s7141_s27, %s4048_s27   ;;  %s5624_s10 = sphi %s7139_s10, %s7363_s10   ;;  %s5620_s6 = sphi %s7362_s6, %s4099_s6   ;;  %s5616_s4 = sphi %s7361_s4, %s4100_s4  }
 0x2ef   : >> { %4055 = vst [vmem:[%s5616_s4] sm:$0xf] %v4054_v52  ;;  %4057 = vst [vmem:[%s5616_s4 + $0x4] sm:$0xf] %v4056_v3  ;;  %v4060_v54 = vld [vmem:[%s5620_s6 + $0xc] sm:$0xf]  ;;  %s4094_s18 = sadd.s32 1, %s5624_s10 }
 0x2f0   : >> { %4059 = vst [vmem:[%s5616_s4 + $0x8] sm:$0xf] %v4058_v22  ;;  %v4062_v5 = vld [vmem:[%s5620_s6 + $0x10] sm:$0xf]  ;;  %v4064_v12 = vld [vmem:[%s5620_s6 + $0x14] sm:$0xf]  ;;  %p4095_p5 = scmp.ge.s32.totalorder %s4094_s18, %s7130_s3 }
 0x2f1   : >> { %4061 = vst [vmem:[%s5616_s4 + $0xc] sm:$0xf] %v4060_v54  ;;  %4063 = vst [vmem:[%s5616_s4 + $0x10] sm:$0xf] %v4062_v5  ;;  %v4066_v53 = vld [vmem:[%s5620_s6 + $0x18] sm:$0xf] }
 0x2f2   : >> { %4065 = vst [vmem:[%s5616_s4 + $0x14] sm:$0xf] %v4064_v12  ;;  %v4068_v18 = vld [vmem:[%s5620_s6 + $0x1c] sm:$0xf]  ;;  %v4070_v47 = vld [vmem:[%s5620_s6 + $0x20] sm:$0xf] }
 0x2f3   : >> { %4067 = vst [vmem:[%s5616_s4 + $0x18] sm:$0xf] %v4066_v53  ;;  %4069 = vst [vmem:[%s5616_s4 + $0x1c] sm:$0xf] %v4068_v18  ;;  %v4072_v62 = vld [vmem:[%s5620_s6 + $0x24] sm:$0xf] }
 0x2f4   : >> { %4071 = vst [vmem:[%s5616_s4 + $0x20] sm:$0xf] %v4070_v47  ;;  %v4074_v30 = vld [vmem:[%s5620_s6 + $0x28] sm:$0xf]  ;;  %v4076_v48 = vld [vmem:[%s5620_s6 + $0x2c] sm:$0xf] }
 0x2f5   : >> { %4073 = vst [vmem:[%s5616_s4 + $0x24] sm:$0xf] %v4072_v62  ;;  %4075 = vst [vmem:[%s5616_s4 + $0x28] sm:$0xf] %v4074_v30  ;;  %v4078_v39 = vld [vmem:[%s5620_s6 + $0x30] sm:$0xf] }
 0x2f6   : >> { %4077 = vst [vmem:[%s5616_s4 + $0x2c] sm:$0xf] %v4076_v48  ;;  %v4080_v14 = vld [vmem:[%s5620_s6 + $0x34] sm:$0xf]  ;;  %v4082_v50 = vld [vmem:[%s5620_s6 + $0x38] sm:$0xf] }
 0x2f7   : >> { %4079 = vst [vmem:[%s5616_s4 + $0x30] sm:$0xf] %v4078_v39  ;;  %4081 = vst [vmem:[%s5616_s4 + $0x34] sm:$0xf] %v4080_v14  ;;  %v4084_v23 = vld [vmem:[%s5620_s6 + $0x3c] sm:$0xf] }
 0x2f8   : >> { %4083 = vst [vmem:[%s5616_s4 + $0x38] sm:$0xf] %v4082_v50  ;;  %v4086_v45 = vld [vmem:[%s5620_s6 + $0x40] sm:$0xf]  ;;  %v4088_v2 = vld [vmem:[%s5620_s6 + $0x44] sm:$0xf] }
 0x2f9   : >> { %4085 = vst [vmem:[%s5616_s4 + $0x3c] sm:$0xf] %v4084_v23  ;;  %4087 = vst [vmem:[%s5616_s4 + $0x40] sm:$0xf] %v4086_v45  ;;  %v4090_v51 = vld [vmem:[%s5620_s6 + $0x48] sm:$0xf] }
 0x2fa   : >> { %4089 = vst [vmem:[%s5616_s4 + $0x44] sm:$0xf] %v4088_v2  ;;  %v4092_v36 = vld [vmem:[%s5620_s6 + $0x4c] sm:$0xf]  ;;  %4091 = vst [vmem:[%s5616_s4 + $0x48] sm:$0xf] %v4090_v51 }
 0x2fb   : >> { %4093 = vst [vmem:[%s5616_s4 + $0x4c] sm:$0xf] %v4092_v36  ;;  %s7376_s18 = smov (%p4095_p5, %s4094_s18), 0  ;;  %s4048_s27 = sadd.s32 1, %s5628_s27  }
 0x2fc   : >> { %s4097_s20 = smul.u32 80, %s7376_s18  ;;  %p4047_p6 = scmp.ge.s32.totalorder %s4048_s27, %s7130_s3 }
 0x2fd   : >> { %s7363_s10 = smov %s7376_s18 }
 0x2fe   : >> { %s4099_s6 = scalar_lea.vmem %s6885_s21, %s4097_s20 [#allocation3]   ;;  %s4100_s4 = scalar_lea.vmem %s7124_s23, %s4097_s20  }
 0x2ff   : > { %4050 = sbr.rel (!%p4047_p6) target bundleno = 750 (0x2ee), region = 281 }
 0x306 PF: > { %5492 = sdivrem.u32 %s7374_s7, 20 }
 0x307   : > { %s4749_s0 = smul.u32 80, %s7130_s3 }
 0x309   : > { %s4105_s1 = scalar_lea.vmem %s6885_s21, %s4749_s0 [#allocation3]   ;;  %s4107_s9 = scalar_lea.vmem %s7124_s23, %s4749_s0  }
 0x30f   : > { %s5493_s24 = spop.drf %5492 }
 0x310   : > { %p4751_p7 = scmp.le.s32.totalorder %s5493_s24, 0 }
 0x311   : > { %s5630_s22 = smov (!%p4751_p7), %s4107_s9   ;;  %s5634_s19 = smov (!%p4751_p7), %s4105_s1  }
 0x312   : > { %4391 = sbr.rel (%p4751_p7) target bundleno = 803 (0x323), region = 286  ;;  %s5638_s8 = smov (!%p4751_p7), 0  }
 0x313   : > { %s5642_s2 = smov (!%p4751_p7), 0  }
 0x319 LB: >> { %v4117_v17 = vld [vmem:[%s5636_s19] sm:$0xf]  ;;  %s4119_s29 = sadd.s32 1, %s5640_s8  ;;  %s4111_s2 = sadd.s32 1, %s5644_s2   ;;  %s5644_s2 = sphi %s5642_s2, %s4111_s2   ;;  %s5640_s8 = sphi %s5638_s8, %s5639_s8   ;;  %s5636_s19 = sphi %s5634_s19, %s4124_s19   ;;  %s5632_s22 = sphi %s5630_s22, %s4125_s22  }
 0x31a   : >> { %4118 = vst [vmem:[%s5632_s22] sm:$0xf] %v4117_v17  ;;  %p4120_p8 = scmp.ge.s32.totalorder %s4119_s29, %s5493_s24  ;;  %p4110_p9 = scmp.ge.s32.totalorder %s4111_s2, %s5493_s24 }
 0x31c   : >> { %s7378_s29 = smov (%p4120_p8, %s4119_s29), 0  ;;  %4113 = sbr.rel (!%p4110_p9) target bundleno = 793 (0x319), region = 292 }
 0x31d   : >> { %s4752_s21 = sshll.u32 %s7378_s29, 2  ;;  %s5639_s8 = smov %s7378_s29  }
 0x31e   : >> { %s4124_s19 = scalar_lea.vmem %s4105_s1, %s4752_s21 [#allocation3]   ;;  %s4125_s22 = scalar_lea.vmem %s4107_s9, %s4752_s21  }
 0x323 PF: > { %p25_p10 = scmp.ge.s32.totalorder %s5754_s28, 6   ;;  %s7364_s24 = smov %s5576_s25 }
 0x324   : > { %s7365_s25 = smov %s5762_s30  ;;  %s7366_s26 = smov %s5754_s28 }
 0x325   :  { %27 = sbr.rel (!%p25_p10) target bundleno = 14 (0xe), region = 303 }

// kernel: ppconv_forward.3
= control target key start
LH: loop header
LB: loop body
LE: loop exit
PB: predicated region body
PF: predicated region fallthrough
CT: control target
= control target key end

     0   :  { %s3298_s17 = smov 0   ;;  %s3778_s0 = inlined_call_operand.vmem [shape: bf16[512,8], index: 0, kind: input, shape index: {}]   ;;  %s3779_s1 = inlined_call_operand.vmem [shape: bf16[512,8], index: 1, kind: input, shape index: {}]   ;;  %s3780_s2 = inlined_call_operand.vmem [shape: bf16[512,8], index: 2, kind: input, shape index: {}]   ;;  %s3781_s3 = inlined_call_operand.vmem [shape: bf16[512,8], index: 3, kind: input, shape index: {}]   ;;  %s3782_s4 = inlined_call_operand.vmem [shape: bf16[512,8], index: 4, kind: input, shape index: {}]   ;;  %s3783_s5 = inlined_call_operand.vmem [shape: bf16[512,8], index: 5, kind: input, shape index: {}]   ;;  %s3784_s6 = inlined_call_operand.vmem [shape: bf16[512,8], index: 6, kind: input, shape index: {}]   ;;  %s3785_s7 = inlined_call_operand.vmem [shape: bf16[512,8], index: 7, kind: input, shape index: {}]   ;;  %s3786_s8 = inlined_call_operand.vmem [shape: bf16[4,8,8], index: 8, kind: input, shape index: {}]   ;;  %s3787_s9 = inlined_call_operand.vmem [shape: f32[1,8], index: 9, kind: input, shape index: {}]   ;;  %s3788_s10 = inlined_call_operand.vmem [shape: f32[1,8], index: 10, kind: input, shape index: {}]   ;;  %s3789_s11 = inlined_call_operand.vmem [shape: f32[512,8], index: 11, kind: output, shape index: {}]  }
   0x1 LB: > { %s2520_s18 = sadd.s32 4294967295, %s3236_s17   ;;  %p2524_p0 = scmp.ge.s32.totalorder %s3236_s17, 1  ;;  %s3236_s17 = sphi %s3298_s17, %s21_s17  }
   0x2   : > { %p415_p1 = scmp.lt.s32.totalorder %s3236_s17, 5 }
   0x4   : > { %p416_p2 = pnand %p2524_p0, %p415_p1 }
   0x5   : > { %v2543_v0 = vld [vmem:[%s3786_s8 + $0x4] sm:$0xf] (!%p416_p2)  ;;  %vm645_vm0 = vcmask (!%p416_p2), 1043456   ;;  %s2525_s21 = sshll.u32 (!%p416_p2), %s2520_s18, 4  ;;  %v561_v2 = vld [vmem:[%s3786_s8] sm:$0xf] (!%p416_p2) }
   0x6   : > { %419 = sbr.rel (%p416_p2) target bundleno = 420 (0x1a4), region = 64  ;;  %3022 = vmatprep.subr.msk.bf16.mxu0 (!%p416_p2), %vm645_vm0, %v2543_v0  ;;  %3026 = vmatprep.subr.msk.bf16.mxu1 (!%p416_p2), %vm645_vm0, %v2543_v0  ;;  %v647_v1 = vsel (!%p416_p2), %vm645_vm0, %v2543_v0, 0  ;;  %p491_p3 = scmp.lt.s32.totalorder (!%p416_p2), %s2525_s21, 63  ;;  %vm620_vm1 = vcmask (!%p416_p2), 64512   ;;  %v811_v6 = vsel (!%p416_p2), %vm645_vm0, %v561_v2, 0 }
   0x7   : > { %2783 = vmatpush3.bf16.msra.mxu0 (!%p416_p2), %v647_v1  ;;  %2855 = vmatpush3.bf16.msra.mxu1 (!%p416_p2), %v647_v1  ;;  %v2576_v7 = vld [vmem:[%s3786_s8 + $0x8] sm:$0xf] (!%p416_p2)  ;;  %v2593_v28 = vld [vmem:[%s3786_s8 + $0xc] sm:$0xf] (!%p416_p2) }
   0x8   : > { %3023 = vmatprep.subr.msk.bf16.mxu0 (!%p416_p2), %vm645_vm0, %v561_v2  ;;  %3027 = vmatprep.subr.msk.bf16.mxu1 (!%p416_p2), %vm645_vm0, %v561_v2  ;;  %v993_v25 = vsel (!%p416_p2), %vm645_vm0, %v2576_v7, 0  ;;  %v1191_v43 = vsel (!%p416_p2), %vm645_vm0, %v2593_v28, 0 }
   0xd   : > { %s3791_s21 = smov (!%p491_p3, %s2525_s21), 63 }
   0xe   : > { %s3320_s24 = sshll.u32 %s3791_s21, 2  ;;  %s2542_s23 = sshll.u32 %s3791_s21, 3 }
   0xf   : > { %s3326_s27 = scalar_lea.vmem %s3779_s1, %s3320_s24  ;;  %s3332_s30 = scalar_lea.vmem %s3783_s5, %s3320_s24 }
  0x10   : > { %v3038_v3 = vld [vmem:[%s3326_s27] sm:$0xff]   ;;  %v3040_v5 = vld [vmem:[%s3326_s27 + $0x8] sm:$0xff]   ;;  %v3042_v9 = vld [vmem:[%s3326_s27 + $0x10] sm:$0xff]   ;;  %s3365_s16 = scalar_lea.vmem %s3778_s0, %s3320_s24  ;;  %s3372_s20 = scalar_lea.vmem %s3782_s4, %s3320_s24 }
  0x11   : > { %v3039_v4 = vld [vmem:[%s3332_s30] sm:$0xff]   ;;  %2784 = vmatprep.mubr.msk.bf16.mxu0 %vm620_vm1, %v3038_v3  ;;  %v3041_v8 = vld [vmem:[%s3332_s30 + $0x8] sm:$0xff]   ;;  %v3043_v10 = vld [vmem:[%s3332_s30 + $0x10] sm:$0xff]   ;;  %s3392_s25 = scalar_lea.vmem %s3780_s2, %s3320_s24  ;;  %s3399_s28 = scalar_lea.vmem %s3784_s6, %s3320_s24 }
  0x12   : > { %2856 = vmatprep.mubr.msk.bf16.mxu1 %vm620_vm1, %v3039_v4  ;;  %2785 = vmatmul.mubr.msk.bf16.vlgmr.msra.gmra.mrb[0].mxu0 %vm620_vm1, %v3040_v5  ;;  %v3044_v11 = vld [vmem:[%s3326_s27 + $0x18] sm:$0xff]   ;;  %v3046_v13 = vld [vmem:[%s3326_s27 + $0x20] sm:$0xff]   ;;  %v3048_v15 = vld [vmem:[%s3326_s27 + $0x28] sm:$0xff]   ;;  %s3427_s14 = scalar_lea.vmem %s3781_s3, %s3320_s24  ;;  %s3434_s19 = scalar_lea.vmem %s3785_s7, %s3320_s24 }
  0x13   : > { %2801 = vmatpush3.bf16.msra.mxu0 %v811_v6  ;;  %2857 = vmatmul.mubr.msk.bf16.vlgmr.msra.gmra.mrb[0].mxu1 %vm620_vm1, %v3041_v8  ;;  %v3045_v12 = vld [vmem:[%s3332_s30 + $0x18] sm:$0xff]   ;;  %v3047_v14 = vld [vmem:[%s3332_s30 + $0x20] sm:$0xff]   ;;  %v3049_v16 = vld [vmem:[%s3332_s30 + $0x28] sm:$0xff]   ;;  %s3653_s26 = scalar_lea.vmem %s3789_s11, %s2542_s23 }
  0x14   : > { %2873 = vmatpush3.bf16.msra.mxu1 %v811_v6  ;;  %2788 = vmatprep.mubr.msk.bf16.mxu0 %vm620_vm1, %v3042_v9  ;;  %v3050_v17 = vld [vmem:[%s3326_s27 + $0x30] sm:$0xff]   ;;  %v3052_v19 = vld [vmem:[%s3326_s27 + $0x38] sm:$0xff]   ;;  %v3054_v21 = vld [vmem:[%s3365_s16] sm:$0xff]  }
  0x15   : > { %2860 = vmatprep.mubr.msk.bf16.mxu1 %vm620_vm1, %v3043_v10  ;;  %3024 = vmatprep.subr.msk.bf16.mxu0 %vm645_vm0, %v2576_v7  ;;  %v3051_v18 = vld [vmem:[%s3332_s30 + $0x30] sm:$0xff]   ;;  %v3053_v20 = vld [vmem:[%s3332_s30 + $0x38] sm:$0xff]   ;;  %v3055_v22 = vld [vmem:[%s3372_s20] sm:$0xff]  }
  0x16   : > { %3028 = vmatprep.subr.msk.bf16.mxu1 %vm645_vm0, %v2576_v7  ;;  %v3056_v23 = vld [vmem:[%s3365_s16 + $0x8] sm:$0xff]   ;;  %v3058_v26 = vld [vmem:[%s3365_s16 + $0x10] sm:$0xff]   ;;  %v3060_v29 = vld [vmem:[%s3365_s16 + $0x18] sm:$0xff]  }
  0x17   : > { %v3057_v24 = vld [vmem:[%s3372_s20 + $0x8] sm:$0xff]   ;;  %v3059_v27 = vld [vmem:[%s3372_s20 + $0x10] sm:$0xff]   ;;  %v3061_v30 = vld [vmem:[%s3372_s20 + $0x18] sm:$0xff]  }
  0x18   : > { %v3062_v31 = vld [vmem:[%s3365_s16 + $0x20] sm:$0xff]   ;;  %v3064_v33 = vld [vmem:[%s3365_s16 + $0x28] sm:$0xff]   ;;  %v3066_v35 = vld [vmem:[%s3365_s16 + $0x30] sm:$0xff]  }
  0x19   : > { %v3063_v32 = vld [vmem:[%s3372_s20 + $0x20] sm:$0xff]   ;;  %v3065_v34 = vld [vmem:[%s3372_s20 + $0x28] sm:$0xff]   ;;  %v3067_v36 = vld [vmem:[%s3372_s20 + $0x30] sm:$0xff]  }
  0x1a   : > { %2789 = vmatmul.mubr.msk.bf16.gmra.mrb[4].mxu0 %vm620_vm1, %v3044_v11  ;;  %v3068_v37 = vld [vmem:[%s3365_s16 + $0x38] sm:$0xff]   ;;  %v3070_v39 = vld [vmem:[%s3392_s25] sm:$0xff]   ;;  %v3072_v41 = vld [vmem:[%s3392_s25 + $0x8] sm:$0xff]  }
  0x1b   : > { %2861 = vmatmul.mubr.msk.bf16.gmra.mrb[4].mxu1 %vm620_vm1, %v3045_v12  ;;  %2792 = vmatprep.mubr.msk.bf16.mxu0 %vm620_vm1, %v3046_v13  ;;  %v3069_v38 = vld [vmem:[%s3372_s20 + $0x38] sm:$0xff]   ;;  %v3071_v40 = vld [vmem:[%s3399_s28] sm:$0xff]   ;;  %v3073_v42 = vld [vmem:[%s3399_s28 + $0x8] sm:$0xff]  }
  0x1c   : > { %2864 = vmatprep.mubr.msk.bf16.mxu1 %vm620_vm1, %v3047_v14  ;;  %v3074_v44 = vld [vmem:[%s3392_s25 + $0x10] sm:$0xff]   ;;  %v3076_v46 = vld [vmem:[%s3392_s25 + $0x18] sm:$0xff]   ;;  %v3078_v48 = vld [vmem:[%s3392_s25 + $0x20] sm:$0xff]  }
  0x1d   : > { %v3075_v45 = vld [vmem:[%s3399_s28 + $0x10] sm:$0xff]   ;;  %v3077_v47 = vld [vmem:[%s3399_s28 + $0x18] sm:$0xff]   ;;  %v3079_v49 = vld [vmem:[%s3399_s28 + $0x20] sm:$0xff]  }
  0x1e   : > { %v3080_v50 = vld [vmem:[%s3392_s25 + $0x28] sm:$0xff]   ;;  %v3082_v52 = vld [vmem:[%s3392_s25 + $0x30] sm:$0xff]   ;;  %v3084_v54 = vld [vmem:[%s3392_s25 + $0x38] sm:$0xff]  }
  0x1f   : > { %v3081_v51 = vld [vmem:[%s3399_s28 + $0x28] sm:$0xff]   ;;  %v3083_v53 = vld [vmem:[%s3399_s28 + $0x30] sm:$0xff]   ;;  %v3085_v55 = vld [vmem:[%s3399_s28 + $0x38] sm:$0xff]  }
  0x20   : > { %v3086_v56 = vld [vmem:[%s3427_s14] sm:$0xff]   ;;  %v3088_v58 = vld [vmem:[%s3427_s14 + $0x8] sm:$0xff]   ;;  %v3090_v60 = vld [vmem:[%s3427_s14 + $0x10] sm:$0xff]  }
  0x21   : > { %v3087_v57 = vld [vmem:[%s3434_s19] sm:$0xff]   ;;  %v3089_v59 = vld [vmem:[%s3434_s19 + $0x8] sm:$0xff]   ;;  %v3091_v61 = vld [vmem:[%s3434_s19 + $0x10] sm:$0xff]  }
  0x22   : > { %2793 = vmatmul.mubr.msk.bf16.gmra.mrb[8].mxu0 %vm620_vm1, %v3048_v15  ;;  %v3092_v62 = vld [vmem:[%s3427_s14 + $0x18] sm:$0xff]   ;;  %v3094_v0 = vld [vmem:[%s3427_s14 + $0x20] sm:$0xff]   ;;  %v3096_v2 = vld [vmem:[%s3427_s14 + $0x28] sm:$0xff]  }
  0x23   : > { %2865 = vmatmul.mubr.msk.bf16.gmra.mrb[8].mxu1 %vm620_vm1, %v3049_v16  ;;  %2796 = vmatprep.mubr.msk.bf16.mxu0 %vm620_vm1, %v3050_v17  ;;  %v3093_v63 = vld [vmem:[%s3434_s19 + $0x18] sm:$0xff]   ;;  %v3095_v1 = vld [vmem:[%s3434_s19 + $0x20] sm:$0xff]   ;;  %v3097_v3 = vld [vmem:[%s3434_s19 + $0x28] sm:$0xff]  }
  0x24   : > { %2868 = vmatprep.mubr.msk.bf16.mxu1 %vm620_vm1, %v3051_v18  ;;  %v3098_v4 = vld [vmem:[%s3427_s14 + $0x30] sm:$0xff]   ;;  %v3100_v6 = vld [vmem:[%s3427_s14 + $0x38] sm:$0xff]   ;;  %v3514_v8 = vld [vmem:[%s3787_s9] ss:$0 sm:$0xff] }
  0x25   : > { %v3099_v5 = vld [vmem:[%s3434_s19 + $0x30] sm:$0xff]   ;;  %v3101_v7 = vld [vmem:[%s3434_s19 + $0x38] sm:$0xff]   ;;  %v3519_v10 = vld [vmem:[%s3788_s10] ss:$0 sm:$0xff] }
  0x2a   : > { %2797 = vmatmul.mubr.msk.bf16.gmra.mrb[12].mxu0 %vm620_vm1, %v3052_v19 }
  0x2b   : > { %2869 = vmatmul.mubr.msk.bf16.gmra.mrb[12].mxu1 %vm620_vm1, %v3053_v20  ;;  %2802 = vmatprep.mubr.msk.bf16.mxu0 %vm620_vm1, %v3054_v21 }
  0x2c   : > { %2874 = vmatprep.mubr.msk.bf16.mxu1 %vm620_vm1, %v3055_v22 }
  0x32   : > { %2803 = vmatmul.mubr.msk.bf16.vlgmr.msra.gmra.mrb[0].mxu0 %vm620_vm1, %v3056_v23 }
  0x33   : > { %2819 = vmatpush3.bf16.msra.mxu0 %v993_v25  ;;  %2875 = vmatmul.mubr.msk.bf16.vlgmr.msra.gmra.mrb[0].mxu1 %vm620_vm1, %v3057_v24 }
  0x34   : > { %2891 = vmatpush3.bf16.msra.mxu1 %v993_v25  ;;  %2806 = vmatprep.mubr.msk.bf16.mxu0 %vm620_vm1, %v3058_v26 }
  0x35   : > { %2878 = vmatprep.mubr.msk.bf16.mxu1 %vm620_vm1, %v3059_v27  ;;  %3025 = vmatprep.subr.msk.bf16.mxu0 %vm645_vm0, %v2593_v28 }
  0x36   : > { %3029 = vmatprep.subr.msk.bf16.mxu1 %vm645_vm0, %v2593_v28 }
  0x3a   : > { %2807 = vmatmul.mubr.msk.bf16.gmra.mrb[4].mxu0 %vm620_vm1, %v3060_v29 }
  0x3b   : > { %2879 = vmatmul.mubr.msk.bf16.gmra.mrb[4].mxu1 %vm620_vm1, %v3061_v30  ;;  %2810 = vmatprep.mubr.msk.bf16.mxu0 %vm620_vm1, %v3062_v31 }
  0x3c   : > { %2882 = vmatprep.mubr.msk.bf16.mxu1 %vm620_vm1, %v3063_v32 }
  0x42   : > { %2811 = vmatmul.mubr.msk.bf16.gmra.mrb[8].mxu0 %vm620_vm1, %v3064_v33 }
  0x43   : > { %2883 = vmatmul.mubr.msk.bf16.gmra.mrb[8].mxu1 %vm620_vm1, %v3065_v34  ;;  %2814 = vmatprep.mubr.msk.bf16.mxu0 %vm620_vm1, %v3066_v35 }
  0x44   : > { %2886 = vmatprep.mubr.msk.bf16.mxu1 %vm620_vm1, %v3067_v36 }
  0x4a   : > { %2815 = vmatmul.mubr.msk.bf16.gmra.mrb[12].mxu0 %vm620_vm1, %v3068_v37 }
  0x4b   : > { %2887 = vmatmul.mubr.msk.bf16.gmra.mrb[12].mxu1 %vm620_vm1, %v3069_v38  ;;  %2820 = vmatprep.mubr.msk.bf16.mxu0 %vm620_vm1, %v3070_v39 }
  0x4c   : > { %2892 = vmatprep.mubr.msk.bf16.mxu1 %vm620_vm1, %v3071_v40 }
  0x52   : > { %2821 = vmatmul.mubr.msk.bf16.vlgmr.msra.gmra.mrb[0].mxu0 %vm620_vm1, %v3072_v41 }
  0x53   : > { %2837 = vmatpush3.bf16.msra.mxu0 %v1191_v43  ;;  %2893 = vmatmul.mubr.msk.bf16.vlgmr.msra.gmra.mrb[0].mxu1 %vm620_vm1, %v3073_v42 }
  0x54   : > { %2909 = vmatpush3.bf16.msra.mxu1 %v1191_v43  ;;  %2824 = vmatprep.mubr.msk.bf16.mxu0 %vm620_vm1, %v3074_v44 }
  0x55   : > { %2896 = vmatprep.mubr.msk.bf16.mxu1 %vm620_vm1, %v3075_v45 }
  0x5a   : > { %2825 = vmatmul.mubr.msk.bf16.gmra.mrb[4].mxu0 %vm620_vm1, %v3076_v46 }
  0x5b   : > { %2897 = vmatmul.mubr.msk.bf16.gmra.mrb[4].mxu1 %vm620_vm1, %v3077_v47  ;;  %2828 = vmatprep.mubr.msk.bf16.mxu0 %vm620_vm1, %v3078_v48 }
  0x5c   : > { %2900 = vmatprep.mubr.msk.bf16.mxu1 %vm620_vm1, %v3079_v49 }
  0x62   : > { %2829 = vmatmul.mubr.msk.bf16.gmra.mrb[8].mxu0 %vm620_vm1, %v3080_v50 }
  0x63   : > { %2901 = vmatmul.mubr.msk.bf16.gmra.mrb[8].mxu1 %vm620_vm1, %v3081_v51  ;;  %2832 = vmatprep.mubr.msk.bf16.mxu0 %vm620_vm1, %v3082_v52 }
  0x64   : > { %2904 = vmatprep.mubr.msk.bf16.mxu1 %vm620_vm1, %v3083_v53 }
  0x6a   : > { %2833 = vmatmul.mubr.msk.bf16.gmra.mrb[12].mxu0 %vm620_vm1, %v3084_v54 }
  0x6b   : > { %2905 = vmatmul.mubr.msk.bf16.gmra.mrb[12].mxu1 %vm620_vm1, %v3085_v55  ;;  %2838 = vmatprep.mubr.msk.bf16.mxu0 %vm620_vm1, %v3086_v56 }
  0x6c   : > { %2910 = vmatprep.mubr.msk.bf16.mxu1 %vm620_vm1, %v3087_v57 }
  0x72   : > { %2839 = vmatmul.mubr.msk.bf16.vlgmr.msra.gmra.mrb[0].mxu0 %vm620_vm1, %v3088_v58 }
  0x73   : > { %2911 = vmatmul.mubr.msk.bf16.vlgmr.msra.gmra.mrb[0].mxu1 %vm620_vm1, %v3089_v59  ;;  %2842 = vmatprep.mubr.msk.bf16.mxu0 %vm620_vm1, %v3090_v60 }
  0x74   : > { %2914 = vmatprep.mubr.msk.bf16.mxu1 %vm620_vm1, %v3091_v61 }
  0x7a   : > { %2843 = vmatmul.mubr.msk.bf16.gmra.mrb[4].mxu0 %vm620_vm1, %v3092_v62 }
  0x7b   : > { %2915 = vmatmul.mubr.msk.bf16.gmra.mrb[4].mxu1 %vm620_vm1, %v3093_v63  ;;  %2846 = vmatprep.mubr.msk.bf16.mxu0 %vm620_vm1, %v3094_v0 }
  0x7c   : > { %2918 = vmatprep.mubr.msk.bf16.mxu1 %vm620_vm1, %v3095_v1 }
  0x82   : > { %2847 = vmatmul.mubr.msk.bf16.gmra.mrb[8].mxu0 %vm620_vm1, %v3096_v2 }
  0x83   : > { %2919 = vmatmul.mubr.msk.bf16.gmra.mrb[8].mxu1 %vm620_vm1, %v3097_v3  ;;  %2850 = vmatprep.mubr.msk.bf16.mxu0 %vm620_vm1, %v3098_v4 }
  0x84   : > { %2922 = vmatprep.mubr.msk.bf16.mxu1 %vm620_vm1, %v3099_v5 }
  0x8a   : > { %2851 = vmatmul.mubr.msk.bf16.gmra.mrb[12].mxu0 %vm620_vm1, %v3100_v6 }
  0x8b   : > { %2923 = vmatmul.mubr.msk.bf16.gmra.mrb[12].mxu1 %vm620_vm1, %v3101_v7 }
 0x145   : > { %v2840_v9 = vpop.f32.mrb[0].mxu0 }
 0x146   : > { %v1315_v11 = vmul.f32 %v2840_v9, %v3514_v8  ;;  %v2912_v12 = vpop.f32.mrb[0].mxu1  ;;  %v1227_v13 = vpop.f32.mrb[1].mxu0 }
 0x147   : > { %v2094_v14 = vmul.f32 %v2912_v12, %v3514_v8  ;;  %v1313_v15 = vmul.f32 %v3514_v8, %v1227_v13  ;;  %v2013_v16 = vpop.f32.mrb[1].mxu1  ;;  %v2841_v17 = vpop.f32.mrb[2].mxu0 }
 0x148   : > { %v3525_v18 = vadd.f32 %v3519_v10, %v1315_v11  ;;  %v2092_v19 = vmul.f32 %v3514_v8, %v2013_v16  ;;  %v1316_v20 = vmul.f32 %v2841_v17, %v3514_v8  ;;  %v2913_v21 = vpop.f32.mrb[2].mxu1  ;;  %v1230_v22 = vpop.f32.mrb[3].mxu0 }
 0x149   : > { %v3530_v23 = vadd.f32 %v3519_v10, %v2094_v14  ;;  %v3533_v24 = vadd.f32 %v3519_v10, %v1313_v15  ;;  %v2095_v25 = vmul.f32 %v2913_v21, %v3514_v8  ;;  %v1314_v26 = vmul.f32 %v3514_v8, %v1230_v22  ;;  %v2016_v27 = vpop.f32.mrb[3].mxu1 }
 0x14a   : > { %v2678_v28 = vmul.f32 -1.442695, %v3525_v18  ;;  %v3539_v29 = vadd.f32 %v3519_v10, %v2092_v19  ;;  %v3542_v30 = vadd.f32 %v3519_v10, %v1316_v20  ;;  %v2093_v31 = vmul.f32 %v3514_v8, %v2016_v27 }
 0x14b   : > { %v2694_v32 = vmul.f32 -1.442695, %v3530_v23  ;;  %v2676_v33 = vmul.f32 -1.442695, %v3533_v24  ;;  %v3548_v34 = vadd.f32 %v3519_v10, %v2095_v25  ;;  %v3551_v35 = vadd.f32 %v3519_v10, %v1314_v26 }
 0x14c   : > { %3102 = vpow2.f32 %v2678_v28  ;;  %v2692_v36 = vmul.f32 -1.442695, %v3539_v29  ;;  %v2679_v37 = vmul.f32 -1.442695, %v3542_v30  ;;  %v3556_v38 = vadd.f32 %v3519_v10, %v2093_v31 }
 0x14d   : > { %3104 = vpow2.f32 %v2694_v32  ;;  %v2695_v39 = vmul.f32 -1.442695, %v3548_v34  ;;  %v2844_v40 = vpop.f32.mrb[4].mxu0  ;;  %v2677_v41 = vmul.f32 -1.442695, %v3551_v35 }
 0x14e   : > { %3106 = vpow2.f32 %v2676_v33  ;;  %v1319_v42 = vmul.f32 %v2844_v40, %v3514_v8  ;;  %v2916_v43 = vpop.f32.mrb[4].mxu1  ;;  %v1243_v44 = vpop.f32.mrb[5].mxu0  ;;  %v2693_v45 = vmul.f32 -1.442695, %v3556_v38 }
 0x14f   : > { %3108 = vpow2.f32 %v2692_v36  ;;  %v2098_v46 = vmul.f32 %v2916_v43, %v3514_v8  ;;  %v1317_v47 = vmul.f32 %v3514_v8, %v1243_v44  ;;  %v2029_v48 = vpop.f32.mrb[5].mxu1  ;;  %v2845_v49 = vpop.f32.mrb[6].mxu0 }
 0x150   : > { %3110 = vpow2.f32 %v2679_v37  ;;  %v3565_v50 = vadd.f32 %v3519_v10, %v1319_v42  ;;  %v2096_v51 = vmul.f32 %v3514_v8, %v2029_v48  ;;  %v1320_v52 = vmul.f32 %v2845_v49, %v3514_v8  ;;  %v2917_v53 = vpop.f32.mrb[6].mxu1  ;;  %v1246_v54 = vpop.f32.mrb[7].mxu0 }
 0x151   : > { %3112 = vpow2.f32 %v2695_v39  ;;  %v3570_v55 = vadd.f32 %v3519_v10, %v2098_v46  ;;  %v3573_v56 = vadd.f32 %v3519_v10, %v1317_v47  ;;  %v2032_v57 = vpop.f32.mrb[7].mxu1  ;;  %v2099_v3 = vmul.f32 %v2917_v53, %v3514_v8 }
 0x152   : > { %3114 = vpow2.f32 %v2677_v41  ;;  %v2682_v58 = vmul.f32 -1.442695, %v3565_v50  ;;  %v3577_v59 = vadd.f32 %v3519_v10, %v2096_v51  ;;  %v3580_v60 = vadd.f32 %v3519_v10, %v1320_v52 }
 0x153   : > { %3116 = vpow2.f32 %v2693_v45  ;;  %v2698_v61 = vmul.f32 -1.442695, %v3570_v55  ;;  %v2680_v62 = vmul.f32 -1.442695, %v3573_v56  ;;  %v1318_v9 = vmul.f32 %v3514_v8, %v1246_v54 }
 0x154   : > { %3118 = vpow2.f32 %v2682_v58  ;;  %v2696_v63 = vmul.f32 -1.442695, %v3577_v59  ;;  %v2683_v0 = vmul.f32 -1.442695, %v3580_v60  ;;  %v2097_v15 = vmul.f32 %v3514_v8, %v2032_v57 }
 0x155   : > { %3120 = vpow2.f32 %v2698_v61  ;;  %v2848_v1 = vpop.f32.mrb[8].mxu0  ;;  %v3595_v27 = vadd.f32 %v3519_v10, %v2099_v3  ;;  %v3599_v33 = vadd.f32 %v3519_v10, %v1318_v9 }
 0x156   : > { %v3103_v2 = vpop.eup %3102  ;;  %3122 = vpow2.f32 %v2680_v62  ;;  %v2920_v4 = vpop.f32.mrb[8].mxu1  ;;  %v1323_v21 = vmul.f32 %v2848_v1, %v3514_v8  ;;  %v3603_v40 = vadd.f32 %v3519_v10, %v2097_v15 }
 0x157   : > { %v1259_v5 = vpop.f32.mrb[9].mxu0  ;;  %v3105_v6 = vpop.eup %3104  ;;  %v2174_v7 = vadd.f32 1.0, %v3103_v2  ;;  %3124 = vpow2.f32 %v2696_v63  ;;  %v2102_v28 = vmul.f32 %v2920_v4, %v3514_v8  ;;  %v2699_v48 = vmul.f32 -1.442695, %v3595_v27 }
 0x158   : > { %v2045_v11 = vpop.f32.mrb[9].mxu1  ;;  %v2849_v12 = vpop.f32.mrb[10].mxu0  ;;  %v2286_v14 = vadd.f32 1.0, %v3105_v6  ;;  %3126 = vpow2.f32 %v2683_v0  ;;  %v1321_v36 = vmul.f32 %v3514_v8, %v1259_v5  ;;  %v3606_v43 = vadd.f32 %v3519_v10, %v1323_v21 }
 0x159   : > { %v3107_v13 = vpop.eup %3106  ;;  %v2921_v16 = vpop.f32.mrb[10].mxu1  ;;  %3128 = vrcp.f32 %v2174_v7  ;;  %v2100_v44 = vmul.f32 %v3514_v8, %v2045_v11  ;;  %v3611_v49 = vadd.f32 %v3519_v10, %v2102_v28  ;;  %v2681_v57 = vmul.f32 -1.442695, %v3599_v33 }
 0x15a   : > { %v3589_v17 = vpop.f32.mrb[11].mxu0  ;;  %v3109_v19 = vpop.eup %3108  ;;  %v2172_v20 = vadd.f32 1.0, %v3107_v13  ;;  %3130 = vrcp.f32 %v2286_v14  ;;  %v3617_v58 = vadd.f32 %v3519_v10, %v1321_v36  ;;  %v2697_v1 = vmul.f32 -1.442695, %v3603_v40 }
 0x15b   : > { %v3592_v22 = vpop.f32.mrb[11].mxu1  ;;  %v3111_v25 = vpop.eup %3110  ;;  %v2284_v26 = vadd.f32 1.0, %v3109_v19  ;;  %v1324_v2 = vmul.f32 %v2849_v12, %v3514_v8  ;;  %v2686_v7 = vmul.f32 -1.442695, %v3606_v43  ;;  %v3631_v9 = vadd.f32 %v3519_v10, %v2100_v44 }
 0x15c   : > { %v3113_v31 = vpop.eup %3112  ;;  %3132 = vrcp.f32 %v2172_v20  ;;  %v2175_v32 = vadd.f32 1.0, %v3111_v25  ;;  %v2702_v15 = vmul.f32 -1.442695, %v3611_v49  ;;  %v2103_v12 = vmul.f32 %v2921_v16, %v3514_v8 }
 0x15d   : > { %v3115_v37 = vpop.eup %3114  ;;  %3134 = vrcp.f32 %v2284_v26  ;;  %v2287_v39 = vadd.f32 1.0, %v3113_v31  ;;  %v2852_v45 = vpop.f32.mrb[12].mxu0  ;;  %v2684_v21 = vmul.f32 -1.442695, %v3617_v58  ;;  %v1322_v25 = vmul.f32 %v3514_v8, %v3589_v17 }
 0x15e   : > { %v3117_v41 = vpop.eup %3116  ;;  %3136 = vrcp.f32 %v2175_v32  ;;  %v2173_v42 = vadd.f32 1.0, %v3115_v37  ;;  %v2924_v51 = vpop.f32.mrb[12].mxu1  ;;  %v3643_v31 = vadd.f32 %v3519_v10, %v1324_v2  ;;  %v2101_v32 = vmul.f32 %v3514_v8, %v3592_v22 }
 0x15f   : > { %v3119_v46 = vpop.eup %3118  ;;  %3138 = vrcp.f32 %v2287_v39  ;;  %v2285_v47 = vadd.f32 1.0, %v3117_v41  ;;  %v3613_v52 = vpop.f32.mrb[13].mxu0  ;;  %v2700_v37 = vmul.f32 -1.442695, %v3631_v9  ;;  %v1327_v39 = vmul.f32 %v2852_v45, %v3514_v8 }
 0x160   : > { %v3121_v53 = vpop.eup %3120  ;;  %3140 = vrcp.f32 %v2173_v42  ;;  %v2178_v54 = vadd.f32 1.0, %v3119_v46  ;;  %v3619_v61 = vpop.f32.mrb[13].mxu1  ;;  %v3657_v17 = vadd.f32 %v3519_v10, %v2103_v12  ;;  %v3662_v45 = vadd.f32 %v3519_v10, %v1322_v25 }
 0x161   : > { %v3621_v62 = vpop.f32.mrb[14].mxu0  ;;  %v3123_v63 = vpop.eup %3122  ;;  %3142 = vrcp.f32 %v2285_v47  ;;  %v2290_v0 = vadd.f32 1.0, %v3121_v53 }
 0x162   : > { %v3625_v3 = vpop.f32.mrb[14].mxu1  ;;  %v3627_v4 = vpop.f32.mrb[15].mxu0  ;;  %3144 = vrcp.f32 %v2178_v54  ;;  %v2176_v6 = vadd.f32 1.0, %v3123_v63  ;;  %v3673_v54 = vadd.f32 %v3519_v10, %v1327_v39  ;;  %v2703_v63 = vmul.f32 -1.442695, %v3657_v17 }
 0x163   : > { %v3125_v5 = vpop.eup %3124  ;;  %v3633_v11 = vpop.f32.mrb[15].mxu1  ;;  %3146 = vrcp.f32 %v2290_v0 }
 0x164   : > { %v3127_v13 = vpop.eup %3126  ;;  %v2288_v14 = vadd.f32 1.0, %v3125_v5  ;;  %3148 = vrcp.f32 %v2176_v6  ;;  %v2685_v5 = vmul.f32 -1.442695, %v3662_v45 }
 0x165   : > { %v3129_v19 = vpop.eup %3128  ;;  %v2179_v20 = vadd.f32 1.0, %v3127_v13 }
 0x166   : > { %v3131_v26 = vpop.eup %3130  ;;  %v2222_v28 = vmul.f32 %v3129_v19, %v3525_v18  ;;  %3150 = vrcp.f32 %v2288_v14 }
 0x167   : > { %v3133_v16 = vpop.eup %3132  ;;  %v2334_v36 = vmul.f32 %v3131_v26, %v3530_v23  ;;  %3152 = vrcp.f32 %v2179_v20  ;;  %v2106_v23 = vmul.f32 %v2924_v51, %v3514_v8 }
 0x168   : > { %v3135_v41 = vpop.eup %3134  ;;  %v2220_v18 = vmul.f32 %v3133_v16, %v3533_v24  ;;  %3154 = vpow2.f32 %v2699_v48  ;;  %v2687_v24 = vmul.f32 -1.442695, %v3643_v31  ;;  %v3667_v48 = vadd.f32 %v3519_v10, %v2101_v32 }
 0x169   : > { %v3137_v22 = vpop.eup %3136  ;;  %v2350_v42 = vadd.f32 %v2334_v36, %v2222_v28  ;;  %v2332_v44 = vmul.f32 %v3135_v41, %v3539_v29  ;;  %3156 = vpow2.f32 %v2681_v57  ;;  %v3678_v0 = vadd.f32 %v3519_v10, %v2106_v23 }
 0x16a   : > { %v3139_v46 = vpop.eup %3138  ;;  %v2223_v47 = vmul.f32 %v3137_v22, %v3542_v30  ;;  %3158 = vpow2.f32 %v2697_v1  ;;  %v2104_v22 = vmul.f32 %v3514_v8, %v3619_v61  ;;  %v1326_v61 = vmul.f32 %v3514_v8, %v3627_v4 }
 0x16b   : > { %v3141_v53 = vpop.eup %3140  ;;  %2366 = vst.msk [vmem:[%s3653_s26 + $0x10] sm:$0xff] %vm620_vm1, %v2350_v42  ;;  %v2348_v51 = vadd.f32 %v2332_v44, %v2220_v18  ;;  %v2335_v29 = vmul.f32 %v3139_v46, %v3548_v34  ;;  %3160 = vpow2.f32 %v2686_v7  ;;  %v2706_v20 = vmul.f32 -1.442695, %v3678_v0 }
 0x16c   : > { %v3143_v57 = vpop.eup %3142  ;;  %v2221_v30 = vmul.f32 %v3141_v53, %v3551_v35  ;;  %3162 = vpow2.f32 %v2702_v15  ;;  %v2701_v35 = vmul.f32 -1.442695, %v3667_v48  ;;  %v1328_v46 = vmul.f32 %v3621_v62, %v3514_v8 }
 0x16d   : > { %v3145_v1 = vpop.eup %3144  ;;  %2364 = vst.msk [vmem:[%s3653_s26] sm:$0xff] %vm620_vm1, %v2348_v51  ;;  %v2351_v2 = vadd.f32 %v2335_v29, %v2223_v47  ;;  %v2333_v34 = vmul.f32 %v3143_v57, %v3556_v38  ;;  %3164 = vpow2.f32 %v2684_v21  ;;  %v2690_v38 = vmul.f32 -1.442695, %v3673_v54 }
 0x16e   : > { %v3147_v6 = vpop.eup %3146  ;;  %v2226_v7 = vmul.f32 %v3145_v1, %v3565_v50  ;;  %3166 = vpow2.f32 %v2700_v37  ;;  %v2107_v53 = vmul.f32 %v3625_v3, %v3514_v8  ;;  %v3713_v62 = vadd.f32 %v3519_v10, %v2104_v22 }
 0x16f   : > { %v3149_v13 = vpop.eup %3148  ;;  %2367 = vst.msk [vmem:[%s3653_s26 + $0x18] sm:$0xff] %vm620_vm1, %v2351_v2  ;;  %v2349_v14 = vadd.f32 %v2333_v34, %v2221_v30  ;;  %v2338_v15 = vmul.f32 %v3147_v6, %v3570_v55  ;;  %3168 = vpow2.f32 %v2687_v24  ;;  %v3718_v3 = vadd.f32 %v3519_v10, %v1328_v46 }
 0x170   : > { %v3151_v12 = vpop.eup %3150  ;;  %v2224_v19 = vmul.f32 %v3149_v13, %v3573_v56  ;;  %3170 = vpow2.f32 %v2703_v63  ;;  %v2105_v63 = vmul.f32 %v3514_v8, %v3633_v11  ;;  %v3722_v6 = vadd.f32 %v3519_v10, %v2107_v53 }
 0x171   : > { %v3153_v50 = vpop.eup %3152  ;;  %2365 = vst.msk [vmem:[%s3653_s26 + $0x8] sm:$0xff] %vm620_vm1, %v2349_v14  ;;  %v2354_v21 = vadd.f32 %v2338_v15, %v2226_v7  ;;  %v2336_v25 = vmul.f32 %v3151_v12, %v3577_v59  ;;  %3172 = vpow2.f32 %v2685_v5  ;;  %v1325_v59 = vmul.f32 %v3514_v8, %v3613_v52 }
 0x172   : > { %v3155_v26 = vpop.eup %3154  ;;  %3174 = vpow2.f32 %v2701_v35  ;;  %v2227_v35 = vmul.f32 %v3153_v50, %v3580_v60  ;;  %v3726_v8 = vadd.f32 %v3519_v10, %v1326_v61  ;;  %v2704_v15 = vmul.f32 -1.442695, %v3713_v62 }
 0x173   : > { %v3157_v55 = vpop.eup %3156  ;;  %2370 = vst.msk [vmem:[%s3653_s26 + $0x30] sm:$0xff] %vm620_vm1, %v2354_v21  ;;  %v2352_v28 = vadd.f32 %v2336_v25, %v2224_v19  ;;  %v2291_v32 = vadd.f32 1.0, %v3155_v26  ;;  %3176 = vpow2.f32 %v2690_v38  ;;  %v3706_v52 = vadd.f32 %v3519_v10, %v1325_v59 }
 0x174   : > { %v3159_v56 = vpop.eup %3158  ;;  %v2177_v16 = vadd.f32 1.0, %v3157_v55  ;;  %3178 = vpow2.f32 %v2706_v20  ;;  %v3730_v38 = vadd.f32 %v3519_v10, %v2105_v63  ;;  %v2691_v60 = vmul.f32 -1.442695, %v3718_v3 }
 0x175   : > { %v3161_v36 = vpop.eup %3160  ;;  %2368 = vst.msk [vmem:[%s3653_s26 + $0x20] sm:$0xff] %vm620_vm1, %v2352_v28  ;;  %3180 = vrcp.f32 %v2291_v32  ;;  %v2289_v37 = vadd.f32 1.0, %v3159_v56  ;;  %v2688_v4 = vmul.f32 -1.442695, %v3706_v52  ;;  %v2707_v21 = vmul.f32 -1.442695, %v3722_v6 }
 0x176   : > { %v3163_v39 = vpop.eup %3162  ;;  %3182 = vrcp.f32 %v2177_v16  ;;  %v2182_v41 = vadd.f32 1.0, %v3161_v36  ;;  %v2689_v10 = vmul.f32 -1.442695, %v3726_v8  ;;  %v2705_v32 = vmul.f32 -1.442695, %v3730_v38 }
 0x177   : > { %v3165_v18 = vpop.eup %3164  ;;  %3184 = vrcp.f32 %v2289_v37  ;;  %v2294_v23 = vadd.f32 1.0, %v3163_v39 }
 0x178   : > { %v3167_v42 = vpop.eup %3166  ;;  %3186 = vrcp.f32 %v2182_v41  ;;  %v2180_v44 = vadd.f32 1.0, %v3165_v18 }
 0x179   : > { %v3169_v47 = vpop.eup %3168  ;;  %3188 = vrcp.f32 %v2294_v23  ;;  %v2292_v24 = vadd.f32 1.0, %v3167_v42 }
 0x17a   : > { %v3171_v51 = vpop.eup %3170  ;;  %3190 = vrcp.f32 %v2180_v44  ;;  %v2183_v29 = vadd.f32 1.0, %v3169_v47 }
 0x17b   : > { %v3173_v57 = vpop.eup %3172  ;;  %3192 = vrcp.f32 %v2292_v24  ;;  %v2295_v30 = vadd.f32 1.0, %v3171_v51 }
 0x17c   : > { %v3175_v1 = vpop.eup %3174  ;;  %3194 = vrcp.f32 %v2183_v29  ;;  %v2181_v2 = vadd.f32 1.0, %v3173_v57 }
 0x17d   : > { %v3177_v34 = vpop.eup %3176  ;;  %3196 = vrcp.f32 %v2295_v30  ;;  %v2293_v5 = vadd.f32 1.0, %v3175_v1 }
 0x17e   : > { %v3179_v7 = vpop.eup %3178  ;;  %3198 = vrcp.f32 %v2181_v2  ;;  %v2186_v13 = vadd.f32 1.0, %v3177_v34 }
 0x17f   : > { %v3181_v11 = vpop.eup %3180  ;;  %3200 = vrcp.f32 %v2293_v5  ;;  %v2298_v14 = vadd.f32 1.0, %v3179_v7 }
 0x180   : > { %v3183_v12 = vpop.eup %3182  ;;  %v2339_v19 = vmul.f32 %v3181_v11, %v3595_v27  ;;  %3202 = vrcp.f32 %v2186_v13 }
 0x181   : > { %v3185_v20 = vpop.eup %3184  ;;  %v2225_v50 = vmul.f32 %v3183_v12, %v3599_v33  ;;  %3204 = vrcp.f32 %v2298_v14 }
 0x182   : > { %v3187_v25 = vpop.eup %3186  ;;  %v2355_v26 = vadd.f32 %v2339_v19, %v2227_v35  ;;  %v2337_v55 = vmul.f32 %v3185_v20, %v3603_v40  ;;  %3206 = vpow2.f32 %v2688_v4 }
 0x183   : > { %v3189_v28 = vpop.eup %3188  ;;  %v2230_v27 = vmul.f32 %v3187_v25, %v3606_v43  ;;  %3208 = vpow2.f32 %v2704_v15 }
 0x184   : > { %v3191_v56 = vpop.eup %3190  ;;  %2371 = vst.msk [vmem:[%s3653_s26 + $0x38] sm:$0xff] %vm620_vm1, %v2355_v26  ;;  %v2353_v33 = vadd.f32 %v2337_v55, %v2225_v50  ;;  %v2342_v16 = vmul.f32 %v3189_v28, %v3611_v49  ;;  %3210 = vpow2.f32 %v2691_v60 }
 0x185   : > { %v3193_v36 = vpop.eup %3192  ;;  %v2228_v40 = vmul.f32 %v3191_v56, %v3617_v58  ;;  %3212 = vpow2.f32 %v2707_v21 }
 0x186   : > { %v3195_v37 = vpop.eup %3194  ;;  %2369 = vst.msk [vmem:[%s3653_s26 + $0x28] sm:$0xff] %vm620_vm1, %v2353_v33  ;;  %v2358_v43 = vadd.f32 %v2342_v16, %v2230_v27  ;;  %v2340_v59 = vmul.f32 %v3193_v36, %v3631_v9  ;;  %3214 = vpow2.f32 %v2689_v10 }
 0x187   : > { %v3197_v39 = vpop.eup %3196  ;;  %v2231_v41 = vmul.f32 %v3195_v37, %v3643_v31  ;;  %3216 = vpow2.f32 %v2705_v32 }
 0x188   : > { %v3199_v18 = vpop.eup %3198  ;;  %2374 = vst.msk [vmem:[%s3653_s26 + $0x50] sm:$0xff] %vm620_vm1, %v2358_v43  ;;  %v2356_v49 = vadd.f32 %v2340_v59, %v2228_v40  ;;  %v2343_v58 = vmul.f32 %v3197_v39, %v3657_v17 }
 0x189   : > { %v3201_v23 = vpop.eup %3200  ;;  %v2229_v22 = vmul.f32 %v3199_v18, %v3662_v45 }
 0x18a   : > { %v3203_v42 = vpop.eup %3202  ;;  %2372 = vst.msk [vmem:[%s3653_s26 + $0x40] sm:$0xff] %vm620_vm1, %v2356_v49  ;;  %v2359_v9 = vadd.f32 %v2343_v58, %v2231_v41  ;;  %v2341_v44 = vmul.f32 %v3201_v23, %v3667_v48 }
 0x18b   : > { %v3205_v46 = vpop.eup %3204  ;;  %v2234_v31 = vmul.f32 %v3203_v42, %v3673_v54 }
 0x18c   : > { %v3207_v47 = vpop.eup %3206  ;;  %2375 = vst.msk [vmem:[%s3653_s26 + $0x58] sm:$0xff] %vm620_vm1, %v2359_v9  ;;  %v2357_v24 = vadd.f32 %v2341_v44, %v2229_v22  ;;  %v2346_v17 = vmul.f32 %v3205_v46, %v3678_v0 }
 0x18d   : > { %v3209_v53 = vpop.eup %3208  ;;  %v2184_v51 = vadd.f32 1.0, %v3207_v47 }
 0x18e   : > { %v3211_v29 = vpop.eup %3210  ;;  %2373 = vst.msk [vmem:[%s3653_s26 + $0x48] sm:$0xff] %vm620_vm1, %v2357_v24  ;;  %v2362_v45 = vadd.f32 %v2346_v17, %v2234_v31  ;;  %v2296_v61 = vadd.f32 1.0, %v3209_v53 }
 0x18f   : > { %v3213_v57 = vpop.eup %3212  ;;  %3218 = vrcp.f32 %v2184_v51  ;;  %v2187_v48 = vadd.f32 1.0, %v3211_v29 }
 0x190   : > { %v3215_v30 = vpop.eup %3214  ;;  %2378 = vst.msk [vmem:[%s3653_s26 + $0x70] sm:$0xff] %vm620_vm1, %v2362_v45  ;;  %3220 = vrcp.f32 %v2296_v61  ;;  %v2299_v54 = vadd.f32 1.0, %v3213_v57 }
 0x191   : > { %v3217_v63 = vpop.eup %3216  ;;  %3222 = vrcp.f32 %v2187_v48  ;;  %v2185_v1 = vadd.f32 1.0, %v3215_v30 }
 0x192   : > { %3224 = vrcp.f32 %v2299_v54  ;;  %v2297_v0 = vadd.f32 1.0, %v3217_v63 }
 0x193   : > { %3226 = vrcp.f32 %v2185_v1 }
 0x194   : > { %3228 = vrcp.f32 %v2297_v0 }
 0x199   : > { %v3219_v2 = vpop.eup %3218 }
 0x19a   : > { %v3221_v34 = vpop.eup %3220  ;;  %v2232_v5 = vmul.f32 %v3219_v2, %v3706_v52 }
 0x19b   : > { %v3223_v4 = vpop.eup %3222  ;;  %v2344_v7 = vmul.f32 %v3221_v34, %v3713_v62 }
 0x19c   : > { %v3225_v35 = vpop.eup %3224  ;;  %v2235_v13 = vmul.f32 %v3223_v4, %v3718_v3 }
 0x19d   : > { %v3227_v11 = vpop.eup %3226  ;;  %v2360_v14 = vadd.f32 %v2344_v7, %v2232_v5  ;;  %v2347_v15 = vmul.f32 %v3225_v35, %v3722_v6 }
 0x19e   : > { %v3229_v12 = vpop.eup %3228  ;;  %v2233_v19 = vmul.f32 %v3227_v11, %v3726_v8 }
 0x19f   : > { %2376 = vst.msk [vmem:[%s3653_s26 + $0x60] sm:$0xff] %vm620_vm1, %v2360_v14  ;;  %v2363_v60 = vadd.f32 %v2347_v15, %v2235_v13  ;;  %v2345_v20 = vmul.f32 %v3229_v12, %v3730_v38 }
 0x1a1   : > { %2379 = vst.msk [vmem:[%s3653_s26 + $0x78] sm:$0xff] %vm620_vm1, %v2363_v60  ;;  %v2361_v52 = vadd.f32 %v2345_v20, %v2233_v19 }
 0x1a3   : > { %2377 = vst.msk [vmem:[%s3653_s26 + $0x68] sm:$0xff] %vm620_vm1, %v2361_v52 }
 0x1a4 PF: > { %s21_s17 = sadd.s32 1, %s3236_s17  }
 0x1a5   : > { %p18_p4 = scmp.ge.s32.totalorder %s21_s17, 6  }
 0x1a7   :  { %20 = sbr.rel (!%p18_p4) target bundleno = 1 (0x1), region = 118 }

</bundles_post_ra>
